<compile_context>
chip_gen: v6e
topology: v6e:2x2x1
jax: 0.10.0
libtpu: 0.0.40
codegen_flags: <defaults>
</compile_context>

<pallas_src>
import functools

import jax
import jax.numpy as jnp
import numpy as np
from jax.experimental import pallas as pl
from jax.experimental.pallas import tpu as pltpu


def _conv_bn_relu_kernel(x_ref, w_ref, scale_ref, shift_ref, o_ref, xp_ref, *,
                         stride, padding, ksize, out_size, cin):
    # x_ref:     (1, H, W*Cin)       bf16 input image (channels-last, W*Cin fused)
    # w_ref:     (Cout, KH*KW*Cin)   bf16 unscaled conv weights, (kh, kw, cin) order
    # scale_ref: (Cout, 1)           f32 BN scale  = gamma / sqrt(var + eps)
    # shift_ref: (Cout, 1)           f32 BN shift  = (bias - mean) * scale + beta
    # o_ref:     (1, Cout, Ho*Wo)    f32 output (NCHW with H,W flattened -> lane-dense)
    # xp_ref:    (Hp, Wp*Cin)        bf16 VMEM scratch: zero-padded image
    KH, KW = ksize
    Ho, Wo = out_size
    Cin = cin
    _, H, WC = x_ref.shape
    Hp, WpC = xp_ref.shape
    W = WC // Cin

    # Stage the zero-padded image in VMEM (padded tensor never touches HBM).
    # Zero only the pad border; the interior is fully overwritten every step,
    # so this stays correct under megacore sharding of the batch axis.
    if padding > 0:
        zrow = jnp.zeros((padding, WpC), xp_ref.dtype)
        xp_ref[pl.ds(0, padding), :] = zrow
        xp_ref[pl.ds(padding + H, padding), :] = zrow
        zcol = jnp.zeros((H, padding * Cin), xp_ref.dtype)
        xp_ref[pl.ds(padding, H), pl.ds(0, padding * Cin)] = zcol
        xp_ref[pl.ds(padding, H), pl.ds((padding + W) * Cin, padding * Cin)] = zcol
    xp_ref[pl.ds(padding, H), pl.ds(padding * Cin, WC)] = x_ref[0]

    # im2col in registers, bf16: one (Ho, Wo, Cin) tap per (kh, kw), concatenated
    # along the channel axis in (kh, kw, cin) order to match w_ref's layout.
    taps = []
    for kh in range(KH):
        for kw in range(KW):
            if stride == 1:
                sl = xp_ref[pl.ds(kh, Ho), pl.ds(kw * Cin, Wo * Cin)]
            else:
                span = (Wo - 1) * stride + 1
                sl = xp_ref[pl.ds(kh, Ho, stride), pl.ds(kw * Cin, span * Cin)]
                sl = sl.reshape(Ho, span, Cin)[:, ::stride, :].reshape(Ho, Wo * Cin)
            taps.append(sl.reshape(Ho, Wo, Cin))
    cols = jnp.concatenate(taps, axis=-1).reshape(Ho * Wo, KH * KW * Cin)  # bf16

    # Single MXU matmul, contraction on the minor dim of both operands
    # (q @ k.T style): (Cout, K) x (Ho*Wo, K) -> (Cout, Ho*Wo), f32 accum.
    acc = jax.lax.dot_general(
        w_ref[...], cols,
        dimension_numbers=(((1,), (1,)), ((), ())),
        preferred_element_type=jnp.float32)                      # (Cout, Ho*Wo)

    # Fused BatchNorm (inference) + ReLU, all in f32 on the epilogue.
    y = jnp.maximum(acc * scale_ref[...] + shift_ref[...], 0.0)
    o_ref[...] = y[None].astype(o_ref.dtype)                     # lane-dense store


def conv_bn_relu(x_nchw, w_oihw, conv_bias, gamma, beta, run_mean, run_var,
                 *, stride, padding, eps=1e-5):
    """Matches nn.Conv2d(inp, oup, k, stride, padding) + BatchNorm2d(eval) + ReLU."""
    N, Cin, H, W = x_nchw.shape
    Cout, _, KH, KW = w_oihw.shape
    Hp, Wp = H + 2 * padding, W + 2 * padding
    Ho = (Hp - KH) // stride + 1
    Wo = (Wp - KW) // stride + 1
    K = KH * KW * Cin

    if conv_bias is None:
        conv_bias = jnp.zeros((Cout,), jnp.float32)

    # BatchNorm (inference) as a per-channel affine epilogue (kept in f32 so
    # extreme gamma / var values don't lose mantissa bits in bf16 weights).
    scale = (gamma / jnp.sqrt(run_var + eps)).astype(jnp.float32)
    shift = ((conv_bias - run_mean) * scale + beta).astype(jnp.float32)
    scale_col = scale.reshape(Cout, 1)
    shift_col = shift.reshape(Cout, 1)

    # Weights: OIHW -> (Cout, KH*KW*Cin), ordered (kh, kw, cin) to match the
    # in-kernel im2col; unscaled; bf16 for the MXU.
    w_mat = jnp.transpose(w_oihw, (0, 2, 3, 1)).reshape(Cout, K).astype(jnp.bfloat16)

    # Activations: NCHW -> (N, H, W*Cin) bf16 (channels-last with W*Cin fused so
    # the minor/lane dim of the input DMA and staging buffer is as dense as
    # possible for tiny Cin).
    x_flat = (jnp.transpose(x_nchw, (0, 2, 3, 1))
              .reshape(N, H, W * Cin).astype(jnp.bfloat16))

    kernel = functools.partial(_conv_bn_relu_kernel, stride=stride,
                               padding=padding, ksize=(KH, KW),
                               out_size=(Ho, Wo), cin=Cin)

    cost = pl.CostEstimate(
        flops=2 * N * Ho * Wo * K * Cout,
        transcendentals=0,
        bytes_accessed=(x_flat.size * 2 + w_mat.size * 2
                        + (scale_col.size + shift_col.size) * 4
                        + N * Cout * Ho * Wo * 4))

    out = pl.pallas_call(
        kernel,
        out_shape=jax.ShapeDtypeStruct((N, Cout, Ho * Wo), jnp.float32),
        grid=(N,),
        in_specs=[
            pl.BlockSpec((1, H, W * Cin), lambda n: (n, 0, 0)),
            pl.BlockSpec((Cout, K), lambda n: (0, 0)),
            pl.BlockSpec((Cout, 1), lambda n: (0, 0)),
            pl.BlockSpec((Cout, 1), lambda n: (0, 0)),
        ],
        out_specs=pl.BlockSpec((1, Cout, Ho * Wo), lambda n: (n, 0, 0)),
        scratch_shapes=[
            pltpu.VMEM((Hp, Wp * Cin), jnp.bfloat16),
        ],
        compiler_params=pltpu.CompilerParams(
            dimension_semantics=("parallel",)),
        cost_estimate=cost,
    )(x_flat, w_mat, scale_col, shift_col)

    # (N, Cout, Ho*Wo) -> (N, Cout, Ho, Wo): contiguous metadata reshape (NCHW).
    return out.reshape(N, Cout, Ho, Wo)


def _reference(x_nchw, w_oihw, conv_bias, gamma, beta, run_mean, run_var,
               *, stride, padding, eps=1e-5):
    out = jax.lax.conv_general_dilated(
        x_nchw, w_oihw,
        window_strides=(stride, stride),
        padding=[(padding, padding), (padding, padding)],
        dimension_numbers=("NCHW", "OIHW", "NCHW"))
    out = out + conv_bias[None, :, None, None]
    scale = gamma / jnp.sqrt(run_var + eps)
    out = (out - run_mean[None, :, None, None]) * scale[None, :, None, None] \
          + beta[None, :, None, None]
    return jnp.maximum(out, 0.0)


if __name__ == "__main__":
    # ConvBnReLU(inp=4, oup=8, kernel=3, stride=1, padding=1), NCHW input.
    inp, oup, k, stride, padding = 4, 8, 3, 1, 1
    N, H, W = 2, 16, 16

    key = jax.random.PRNGKey(0)
    kx, kw, kb, kg, kbe, km, kv = jax.random.split(key, 7)

    x = jax.random.normal(kx, (N, inp, H, W), dtype=jnp.float32)
    w = jax.random.normal(kw, (oup, inp, k, k), dtype=jnp.float32) * 0.1
    b = jax.random.normal(kb, (oup,), dtype=jnp.float32) * 0.1
    gamma = 1.0 + 0.1 * jax.random.normal(kg, (oup,), dtype=jnp.float32)
    beta = 0.1 * jax.random.normal(kbe, (oup,), dtype=jnp.float32)
    run_mean = 0.1 * jax.random.normal(km, (oup,), dtype=jnp.float32)
    run_var = jnp.abs(1.0 + 0.1 * jax.random.normal(kv, (oup,), dtype=jnp.float32))

    fn = jax.jit(functools.partial(conv_bn_relu, stride=stride, padding=padding))
    out = jax.block_until_ready(fn(x, w, b, gamma, beta, run_mean, run_var))

    ref = _reference(x, w, b, gamma, beta, run_mean, run_var,
                     stride=stride, padding=padding)
    # bf16 activations/weights (f32 accumulation + f32 BN/ReLU epilogue)
    # -> relaxed tolerance vs f32 reference.
    np.testing.assert_allclose(np.asarray(out), np.asarray(ref),
                               rtol=3e-2, atol=3e-2)
    print("KERNEL_OK")
</pallas_src>

<mosaic_0001>
module attributes {stable_mosaic.version = 11 : i64} {
  func.func @_conv_bn_relu_kernel(%arg0: i32, %arg1: memref<1x16x64xbf16, #tpu.memory_space<vmem>>, %arg2: memref<8x36xbf16, #tpu.memory_space<vmem>>, %arg3: memref<8x1xf32, #tpu.memory_space<vmem>>, %arg4: memref<8x1xf32, #tpu.memory_space<vmem>>, %arg5: memref<1x8x256xf32, #tpu.memory_space<vmem>>, %arg6: memref<18x72xbf16, #tpu.memory_space<vmem>>) attributes {dimension_semantics = [#tpu.dimension_semantics<parallel>], iteration_bounds = array<i64: 2>, scalar_prefetch = 0 : i64, scratch_operands = 1 : i64, tpu.core_type = #tpu.core_type<tc>, window_params = [{transform_indices = @transform_0, window_bounds = array<i64: 1, 16, 64>}, {pipeline_mode = #tpu.pipeline_mode<synchronous>, transform_indices = @transform_1, window_bounds = array<i64: 8, 36>}, {pipeline_mode = #tpu.pipeline_mode<synchronous>, transform_indices = @transform_2, window_bounds = array<i64: 8, 1>}, {pipeline_mode = #tpu.pipeline_mode<synchronous>, transform_indices = @transform_3, window_bounds = array<i64: 8, 1>}, {transform_indices = @transform_4, window_bounds = array<i64: 1, 8, 256>}]} {
    %cst = arith.constant 0.000000e+00 : bf16
    %0 = vector.broadcast %cst : bf16 to vector<1x72xbf16>
    %c0 = arith.constant 0 : index
    %c0_0 = arith.constant 0 : index
    %1 = vector.load %arg6[%c0, %c0_0] : memref<18x72xbf16, #tpu.memory_space<vmem>>, vector<1x72xbf16>
    tpu.vector_store %arg6[%c0, %c0_0], %0 {strides = array<i32>} : memref<18x72xbf16, #tpu.memory_space<vmem>>, vector<1x72xbf16>,
    %c17 = arith.constant 17 : index
    %c0_1 = arith.constant 0 : index
    %2 = vector.load %arg6[%c17, %c0_1] : memref<18x72xbf16, #tpu.memory_space<vmem>>, vector<1x72xbf16>
    tpu.vector_store %arg6[%c17, %c0_1], %0 {strides = array<i32>} : memref<18x72xbf16, #tpu.memory_space<vmem>>, vector<1x72xbf16>,
    %cst_2 = arith.constant 0.000000e+00 : bf16
    %3 = vector.broadcast %cst_2 : bf16 to vector<16x4xbf16>
    %c1 = arith.constant 1 : index
    %c0_3 = arith.constant 0 : index
    %4 = vector.load %arg6[%c1, %c0_3] : memref<18x72xbf16, #tpu.memory_space<vmem>>, vector<16x4xbf16>
    tpu.vector_store %arg6[%c1, %c0_3], %3 {strides = array<i32>} : memref<18x72xbf16, #tpu.memory_space<vmem>>, vector<16x4xbf16>,
    %c1_4 = arith.constant 1 : index
    %c68 = arith.constant 68 : index
    %5 = vector.load %arg6[%c1_4, %c68] : memref<18x72xbf16, #tpu.memory_space<vmem>>, vector<16x4xbf16>
    tpu.vector_store %arg6[%c1_4, %c68], %3 {strides = array<i32>} : memref<18x72xbf16, #tpu.memory_space<vmem>>, vector<16x4xbf16>,
    %c0_5 = arith.constant 0 : index
    %c0_6 = arith.constant 0 : index
    %c0_7 = arith.constant 0 : index
    %6 = vector.load %arg1[%c0_5, %c0_6, %c0_7] : memref<1x16x64xbf16, #tpu.memory_space<vmem>>, vector<1x16x64xbf16>
    %7 = vector.shape_cast %6 : vector<1x16x64xbf16> to vector<16x64xbf16>
    %c1_8 = arith.constant 1 : index
    %c4 = arith.constant 4 : index
    %8 = vector.load %arg6[%c1_8, %c4] : memref<18x72xbf16, #tpu.memory_space<vmem>>, vector<16x64xbf16>
    tpu.vector_store %arg6[%c1_8, %c4], %7 {strides = array<i32>} : memref<18x72xbf16, #tpu.memory_space<vmem>>, vector<16x64xbf16>,
    %c0_9 = arith.constant 0 : index
    %c0_10 = arith.constant 0 : index
    %9 = vector.load %arg6[%c0_9, %c0_10] : memref<18x72xbf16, #tpu.memory_space<vmem>>, vector<16x64xbf16>
    %10 = vector.shape_cast %9 : vector<16x64xbf16> to vector<16x16x4xbf16>
    %c0_11 = arith.constant 0 : index
    %c4_12 = arith.constant 4 : index
    %11 = vector.load %arg6[%c0_11, %c4_12] : memref<18x72xbf16, #tpu.memory_space<vmem>>, vector<16x64xbf16>
    %12 = vector.shape_cast %11 : vector<16x64xbf16> to vector<16x16x4xbf16>
    %c0_13 = arith.constant 0 : index
    %c8 = arith.constant 8 : index
    %13 = vector.load %arg6[%c0_13, %c8] : memref<18x72xbf16, #tpu.memory_space<vmem>>, vector<16x64xbf16>
    %14 = vector.shape_cast %13 : vector<16x64xbf16> to vector<16x16x4xbf16>
    %c1_14 = arith.constant 1 : index
    %c0_15 = arith.constant 0 : index
    %15 = vector.load %arg6[%c1_14, %c0_15] : memref<18x72xbf16, #tpu.memory_space<vmem>>, vector<16x64xbf16>
    %16 = vector.shape_cast %15 : vector<16x64xbf16> to vector<16x16x4xbf16>
    %c1_16 = arith.constant 1 : index
    %c4_17 = arith.constant 4 : index
    %17 = vector.load %arg6[%c1_16, %c4_17] : memref<18x72xbf16, #tpu.memory_space<vmem>>, vector<16x64xbf16>
    %18 = vector.shape_cast %17 : vector<16x64xbf16> to vector<16x16x4xbf16>
    %c1_18 = arith.constant 1 : index
    %c8_19 = arith.constant 8 : index
    %19 = vector.load %arg6[%c1_18, %c8_19] : memref<18x72xbf16, #tpu.memory_space<vmem>>, vector<16x64xbf16>
    %20 = vector.shape_cast %19 : vector<16x64xbf16> to vector<16x16x4xbf16>
    %c2 = arith.constant 2 : index
    %c0_20 = arith.constant 0 : index
    %21 = vector.load %arg6[%c2, %c0_20] : memref<18x72xbf16, #tpu.memory_space<vmem>>, vector<16x64xbf16>
    %22 = vector.shape_cast %21 : vector<16x64xbf16> to vector<16x16x4xbf16>
    %c2_21 = arith.constant 2 : index
    %c4_22 = arith.constant 4 : index
    %23 = vector.load %arg6[%c2_21, %c4_22] : memref<18x72xbf16, #tpu.memory_space<vmem>>, vector<16x64xbf16>
    %24 = vector.shape_cast %23 : vector<16x64xbf16> to vector<16x16x4xbf16>
    %c2_23 = arith.constant 2 : index
    %c8_24 = arith.constant 8 : index
    %25 = vector.load %arg6[%c2_23, %c8_24] : memref<18x72xbf16, #tpu.memory_space<vmem>>, vector<16x64xbf16>
    %26 = vector.shape_cast %25 : vector<16x64xbf16> to vector<16x16x4xbf16>
    %27 = tpu.concatenate %10, %12, %14, %16, %18, %20, %22, %24, %26 in 2 : vector<16x16x4xbf16>, vector<16x16x4xbf16>, vector<16x16x4xbf16>, vector<16x16x4xbf16>, vector<16x16x4xbf16>, vector<16x16x4xbf16>, vector<16x16x4xbf16>, vector<16x16x4xbf16>, vector<16x16x4xbf16> -> vector<16x16x36xbf16>
    %28 = vector.shape_cast %27 : vector<16x16x36xbf16> to vector<256x36xbf16>
    %c0_25 = arith.constant 0 : index
    %c0_26 = arith.constant 0 : index
    %29 = vector.load %arg2[%c0_25, %c0_26] : memref<8x36xbf16, #tpu.memory_space<vmem>>, vector<8x36xbf16>
    %cst_27 = arith.constant dense<0.000000e+00> : vector<8x256xf32>
    %30 = tpu.matmul %29, %28, %cst_27 {dimension_numbers = #tpu.dot_dimension_numbers<[1], [1], [0], [0], [0, 0, 1, 0], [], []>} : vector<8x36xbf16>, vector<256x36xbf16>, vector<8x256xf32> -> vector<8x256xf32>
    %c0_28 = arith.constant 0 : index
    %c0_29 = arith.constant 0 : index
    %31 = vector.load %arg3[%c0_28, %c0_29] : memref<8x1xf32, #tpu.memory_space<vmem>>, vector<8x1xf32>
    %32 = vector.broadcast %31 : vector<8x1xf32> to vector<8x256xf32>
    %33 = arith.mulf %30, %32 : vector<8x256xf32>
    %c0_30 = arith.constant 0 : index
    %c0_31 = arith.constant 0 : index
    %34 = vector.load %arg4[%c0_30, %c0_31] : memref<8x1xf32, #tpu.memory_space<vmem>>, vector<8x1xf32>
    %35 = vector.broadcast %34 : vector<8x1xf32> to vector<8x256xf32>
    %36 = arith.addf %33, %35 : vector<8x256xf32>
    %cst_32 = arith.constant 0.000000e+00 : f32
    %37 = vector.broadcast %cst_32 : f32 to vector<8x256xf32>
    %38 = arith.maximumf %36, %37 : vector<8x256xf32>
    %39 = vector.shape_cast %38 : vector<8x256xf32> to vector<1x8x256xf32>
    %c0_33 = arith.constant 0 : index
    %c0_34 = arith.constant 0 : index
    %c0_35 = arith.constant 0 : index
    %40 = vector.load %arg5[%c0_33, %c0_34, %c0_35] : memref<1x8x256xf32, #tpu.memory_space<vmem>>, vector<1x8x256xf32>
    tpu.vector_store %arg5[%c0_33, %c0_34, %c0_35], %39 {strides = array<i32>} : memref<1x8x256xf32, #tpu.memory_space<vmem>>, vector<1x8x256xf32>,
    return
  }
  func.func @transform_0(%arg0: i32) -> (i32, i32, i32) {
    %c0_i32 = arith.constant 0 : i32
    %c0_i32_0 = arith.constant 0 : i32
    %c0_i32_1 = arith.constant 0 : i32
    return %arg0, %c0_i32, %c0_i32_0 : i32, i32, i32
  }
  func.func @transform_1(%arg0: i32) -> (i32, i32) {
    %c0_i32 = arith.constant 0 : i32
    %c0_i32_0 = arith.constant 0 : i32
    %c0_i32_1 = arith.constant 0 : i32
    return %c0_i32, %c0_i32_0 : i32, i32
  }
  func.func @transform_2(%arg0: i32) -> (i32, i32) {
    %c0_i32 = arith.constant 0 : i32
    %c0_i32_0 = arith.constant 0 : i32
    %c0_i32_1 = arith.constant 0 : i32
    return %c0_i32, %c0_i32_0 : i32, i32
  }
  func.func @transform_3(%arg0: i32) -> (i32, i32) {
    %c0_i32 = arith.constant 0 : i32
    %c0_i32_0 = arith.constant 0 : i32
    %c0_i32_1 = arith.constant 0 : i32
    return %c0_i32, %c0_i32_0 : i32, i32
  }
  func.func @transform_4(%arg0: i32) -> (i32, i32, i32) {
    %c0_i32 = arith.constant 0 : i32
    %c0_i32_0 = arith.constant 0 : i32
    %c0_i32_1 = arith.constant 0 : i32
    return %arg0, %c0_i32, %c0_i32_0 : i32, i32, i32
  }
}

</mosaic_0001>

<bundles_post_ra>
// kernel: conv_bn_relu.1
= control target key start
LH: loop header
LB: loop body
LE: loop exit
PB: predicated region body
PF: predicated region fallthrough
CT: control target
= control target key end

     0   :  { %s6293_s15 = smov 0   ;;  %s10737_s0 = inlined_call_operand.vmem [shape: bf16[2,16,64], index: 0, kind: input, shape index: {}]   ;;  %s10738_s1 = inlined_call_operand.vmem [shape: bf16[8,36], index: 1, kind: input, shape index: {}]   ;;  %s10739_s2 = inlined_call_operand.vmem [shape: f32[8,1], index: 2, kind: input, shape index: {}]   ;;  %s10740_s3 = inlined_call_operand.vmem [shape: f32[8,1], index: 3, kind: input, shape index: {}]   ;;  %s10741_s4 = inlined_call_operand.vmem [shape: f32[2,8,256], index: 4, kind: output, shape index: {}]  }
   0x1 LB: > { %s5997_s16 = sadd.s32 4294967295, %s6240_s15   ;;  %p6001_p0 = scmp.ge.s32.totalorder %s6240_s15, 1  ;;  %s6240_s15 = sphi %s6293_s15, %s14_s15  }
   0x2   : > { %p162_p1 = scmp.lt.s32.totalorder %s6240_s15, 3 }
   0x4   : > { %p163_p2 = pnand %p6001_p0, %p162_p1 }
   0x6   : > { %166 = sbr.rel (%p163_p2) target bundleno = 1388 (0x56c), region = 36 }
   0xb   : > { %p188_p3 = scmp.lt.s32.totalorder %s5997_s16, 1  ;;  %vm199_vm0 = vcmask 581632   ;;  %v202_v0 = vld [vmem:[#allocation2] sm:$0x1]  ;;  %vm205_vm1 = vsmask.f32 7938  ;;  %v374_v60 = vlaneseq }
   0xc   : > { %vm200_vm2 = vsmask.f32 256  ;;  %v207_v1 = vld [vmem:[#allocation2 + $0x8] sm:$0x1]  ;;  %vm210_vm3 = vcmask 27648   ;;  %vm222_vm5 = vcmask 585248   ;;  %vm206_vm7 = vmand %vm199_vm0, %vm205_vm1 }
   0xd   : > { %s11957_s16 = smov (!%p188_p3, %s5997_s16), 1  ;;  %vm201_vm4 = vmand %vm199_vm0, %vm200_vm2  ;;  %v10744_v2 = vmov 0   ;;  %vm236_vm6 = vsmask.f32 4368  ;;  %v208_v6 = vsel %vm206_vm7, 0, %v207_v1  ;;  %vm217_vm8 = vcmask 24576  }
   0xe   : > { %s6169_s17 = sshll.u32 %s11957_s16, 3  ;;  %216 = vst.msk [vmem:[#allocation2 + $0x4] sm:$0xf] %vm210_vm3, %v10744_v2  ;;  %6231 = vset.pattern.permute.xlu1 %v10744_v2  ;;  %6232 = vset.pattern.permute.xlu0 %v10744_v2  ;;  %v203_v3 = vsel %vm201_vm4, 0, %v202_v0  ;;  %209 = vst [vmem:[#allocation2 + $0x8] sm:$0x1] %v208_v6 }
   0xf   : > { %s192_s20 = scalar_lea.vmem %s10737_s0, %s6169_s17  ;;  %228 = vst.msk [vmem:[#allocation2 + $0x4] sm:$0xf] %vm222_vm5, %v10744_v2  ;;  %204 = vst [vmem:[#allocation2] sm:$0x1] %v203_v3  ;;  %s6243_s21 = smov 4   ;;  %vm229_vm12 = vcmask 582176  }
  0x10   : > { %v234_v4 = vld [vmem:[%s192_s20] sm:$0xf]  ;;  %v235_v5 = vld [vmem:[%s192_s20 + $0x4] sm:$0xf]  ;;  %vm237_vm9 = vmor %vm200_vm2, %vm236_vm6  ;;  %vm264_vm15 = vcmask 551968   ;;  %vm271_vm0 = vcmask 548896  }
  0x11   : > { %v239_v7 = vshrl.u32 %v234_v4, 16  ;;  %v242_v8 = vshll.u32 %v234_v4, 16  ;;  %v247_v9 = vshrl.u32 %v235_v5, 16  ;;  %v250_v10 = vshll.u32 %v235_v5, 16  ;;  %vm211_vm10 = vmand %vm210_vm3, %vm205_vm1  ;;  %s6244_s22 = smov 124   ;;  %s6245_s23 = smov 120  }
  0x12   : > { %vm218_vm11 = vmand %vm217_vm8, %vm200_vm2  ;;  %s6246_s24 = smov 116   ;;  %s6247_s25 = smov 112   ;;  %v6259_v58 = vmov 1983009808   ;;  %v6474_v1 = vshrl.u32 %v374_v60, 7  ;;  %vm3433_vm6 = vcmask 1042432  }
  0x13   : > { %v241_v11 = vrot.slane %v239_v7, 7  ;;  %v249_v12 = vrot.slane %v247_v9, 7  ;;  %vm223_vm13 = vmand %vm222_vm5, %vm205_vm1  ;;  %s6248_s26 = smov 108   ;;  %s6249_s27 = smov 104   ;;  %v372_v59 = vunpack.c.l.s4 %v6259_v58  ;;  %vm3434_vm7 = vcmask 1046532  }
  0x14   : > { %vm230_vm14 = vmand %vm229_vm12, %vm200_vm2  ;;  %s6250_s28 = smov 100   ;;  %s6251_s29 = smov 96   ;;  %11127 = vst [vmem:[#allocation11_spill] sm:$0xff] %v6474_v1  ;;  %vm5679_vm12 = vcmask 130048  }
  0x15   : > { %v244_v13 = vor.u32 %v242_v8, %v241_v11  ;;  %v245_v14 = vrot.slane %v241_v11, 4  ;;  %v252_v15 = vor.u32 %v250_v10, %v249_v12  ;;  %v254_v16 = vrot.slane %v249_v12, 4  ;;  %v219_v20 = vld [vmem:[#allocation2 + $0x8] sm:$0x1]  ;;  %vm265_vm3 = vmand %vm264_vm15, %vm205_vm1  ;;  %s6252_s30 = smov 92   ;;  %s6253_s5 = smov 88  }
  0x16   : > { %v212_v17 = vld [vmem:[#allocation2] sm:$0xf]  ;;  %v220_v21 = vsel %vm218_vm11, 0, %v219_v20  ;;  %vm272_vm4 = vmand %vm271_vm0, %vm200_vm2  ;;  %s6254_s6 = smov 84   ;;  %s6255_s7 = smov 80   ;;  %v373_v0 = vunpack.c.0.s8 %v372_v59  ;;  %vm5646_vm11 = vcmask 97280  }
  0x17   : > { %255 = vrot.lane.b32.xlu0 %v244_v13, %s6243_s21  ;;  %259 = vrot.lane.b32.xlu1 %v254_v16, %s6243_s21  ;;  %v253_v18 = vsel %vm237_vm9, %v245_v14, %v252_v15  ;;  %v213_v19 = vsel %vm211_vm10, 0, %v212_v17  ;;  %221 = vst [vmem:[#allocation2 + $0x8] sm:$0x1] %v220_v21  ;;  %s6256_s8 = smov 76   ;;  %s6257_s9 = smov 72   ;;  %vm6503_vm8 = vmor %vm3433_vm6, %vm3434_vm7  ;;  %vm5564_vm9 = vcmask 31744  }
  0x18   : > { %214 = vst [vmem:[#allocation2] sm:$0xf] %v213_v19  ;;  %s6258_s10 = smov 68   ;;  %vm1686_vm1 = vsmask.f32 3328  ;;  %v6494_v13 = vsub.s32 %v373_v0, %v6474_v1  ;;  %v11130_v19 = vmov 0 }
  0x19   : > { %vm1687_vm2 = vsmask.f32 7440  ;;  %v6260_v14 = vmov 1934713408   ;;  %v11131_v19 = vsel %vm6503_vm8, 4294967295, %v11130_v19  ;;  %s6261_s11 = smov 8  }
  0x1a   : > { %vm6429_vm5 = vmor %vm1686_vm1, %vm1687_vm2  ;;  %v6498_v15 = vunpack.c.l.s4 %v6260_v14  ;;  %11132 = vst [vmem:[#allocation14_spill] sm:$0xff] %v11131_v19  ;;  %s6262_s12 = smov 12   ;;  %s6263_s13 = smov 16   ;;  %vm5613_vm10 = vcmask 64512   ;;  %vm5811_vm0 = vcmask 261120  }
  0x1b   : > { %257 = vrot.lane.b32.xlu0 %v253_v18, %s6243_s21  ;;  %s6264_s14 = smov 20   ;;  %s6265_s17 = smov 24  }
  0x1c   : > { %11129 = vst [vmem:[#allocation13_spill] sm:$0xff] %v6498_v15  ;;  %s6266_s18 = smov 28   ;;  %s6267_s19 = smov 32  }
  0x1e   : > { %v231_v24 = vld [vmem:[#allocation2 + $0x8] sm:$0x1] }
  0x1f   : > { %v224_v22 = vld [vmem:[#allocation2] sm:$0xf]  ;;  %v232_v25 = vsel %vm230_vm14, 0, %v231_v24  ;;  %vm5745_vm14 = vcmask 195584  }
  0x20   : > { %v225_v23 = vsel %vm223_vm13, 0, %v224_v22  ;;  %233 = vst [vmem:[#allocation2 + $0x8] sm:$0x1] %v232_v25  ;;  %vm5712_vm13 = vcmask 162816  }
  0x21   : > { %226 = vst [vmem:[#allocation2] sm:$0xf] %v225_v23 }
  0x27   : > { %v273_v27 = vld [vmem:[#allocation2 + $0x8] sm:$0x1] }
  0x28   : > { %v266_v26 = vld [vmem:[#allocation2] sm:$0xf] }
  0x89   : > { %v256_v28 = vpop.permute.xlu0 %255  ;;  %v260_v29 = vpop.permute.xlu1 %259 }
  0x8a   : > { %v267_v30 = vsel %vm265_vm3, %v256_v28, %v266_v26  ;;  %v274_v31 = vsel %vm272_vm4, %v260_v29, %v273_v27  ;;  %vm5845_vm3 = vcmask 293888  }
  0x8b   : > { %268 = vst [vmem:[#allocation2] sm:$0xf] %v267_v30  ;;  %275 = vst [vmem:[#allocation2 + $0x8] sm:$0x1] %v274_v31 }
  0x8d   : > { %v258_v32 = vpop.permute.xlu0 %257 }
  0x8e   : > { %270 = vst.msk [vmem:[#allocation2 + $0x4] sm:$0xf] %vm264_vm15, %v258_v32  ;;  %vm5778_vm15 = vcmask 228352  }
  0x92   : > { %v6330_v33 = vld [vmem:[#allocation2] sm:$0xf]  ;;  %v6392_v35 = vld [vmem:[#allocation2 + $0x8] sm:$0x1] }
  0x93   : > { %280 = vrot.lane.b32.xlu1 %v6330_v33, %s6244_s22  ;;  %v1690_v36 = vshrl.u32 %v6330_v33, 16  ;;  %v1693_v37 = vshll.u32 %v6330_v33, 16  ;;  %v1709_v46 = vshll.u32 %v6392_v35, 16  ;;  %v3441_v8 = vrot.slane %v6392_v35, 5 }
  0x95   : > { %v6334_v34 = vld [vmem:[#allocation2 + $0x4] sm:$0xf]  ;;  %v1692_v40 = vrot.slane %v1690_v36, 4  ;;  %v1695_v41 = vrot.slane %v1693_v37, 5  ;;  %v1711_v50 = vrot.slane %v1709_v46, 5 }
  0x96   : > { %11117 = vst [vmem:[#allocation3_spill] sm:$0xff] %v6334_v34  ;;  %282 = vrot.lane.b32.xlu0 %v6334_v34, %s6244_s22  ;;  %v1699_v38 = vshll.u32 %v6334_v34, 16  ;;  %v1703_v39 = vshrl.u32 %v6334_v34, 16  ;;  %v10743_v62 = vrot.slane %v6334_v34, 5 }
  0x97   : > { %286 = vrot.lane.b32.xlu1 %v6330_v33, %s6245_s23  ;;  %v1696_v44 = vor.u32 %v1695_v41, %v1692_v40 }
  0x98   : > { %v1701_v42 = vrot.slane %v1699_v38, 5  ;;  %v1705_v43 = vrot.slane %v1703_v39, 4  ;;  %v3440_v7 = vrot.slane %v10743_v62, 4 }
  0x99   : > { %v1697_v47 = vrot.slane %v1696_v44, 4 }
  0x9a   : > { %288 = vrot.lane.b32.xlu0 %v6334_v34, %s6245_s23  ;;  %v1706_v45 = vor.u32 %v1705_v43, %v1701_v42  ;;  %v6516_v24 = vsel %vm6503_vm8, %v3440_v7, %v3441_v8 }
  0x9b   : > { %292 = vrot.lane.b32.xlu1 %v6330_v33, %s6246_s24  ;;  %v6437_v51 = vsel %vm6429_vm5, %v1697_v47, %v1701_v42  ;;  %11134 = vst [vmem:[#allocation16_spill] sm:$0xff] %v6516_v24 }
  0x9c   : > { %v1707_v49 = vrot.slane %v1706_v45, 4  ;;  %11120 = vst [vmem:[#allocation4_spill] sm:$0xff] %v6437_v51 }
  0x9e   : > { %294 = vrot.lane.b32.xlu0 %v6334_v34, %s6246_s24  ;;  %v6443_v52 = vsel %vm6429_vm5, %v1707_v49, %v1711_v50 }
  0x9f   : > { %298 = vrot.lane.b32.xlu1 %v6330_v33, %s6247_s25  ;;  %11121 = vst [vmem:[#allocation5_spill] sm:$0xff] %v6443_v52 }
  0xa2   : > { %300 = vrot.lane.b32.xlu0 %v6334_v34, %s6247_s25 }
  0xa3   : > { %304 = vrot.lane.b32.xlu1 %v6330_v33, %s6248_s26 }
  0xa6   : > { %306 = vrot.lane.b32.xlu0 %v6334_v34, %s6248_s26 }
  0xa7   : > { %310 = vrot.lane.b32.xlu1 %v6330_v33, %s6249_s27 }
  0xaa   : > { %312 = vrot.lane.b32.xlu0 %v6334_v34, %s6249_s27 }
  0xab   : > { %316 = vrot.lane.b32.xlu1 %v6330_v33, %s6250_s28 }
  0xae   : > { %318 = vrot.lane.b32.xlu0 %v6334_v34, %s6250_s28 }
  0xaf   : > { %322 = vrot.lane.b32.xlu1 %v6330_v33, %s6251_s29 }
  0xb2   : > { %324 = vrot.lane.b32.xlu0 %v6334_v34, %s6251_s29 }
  0xb3   : > { %328 = vrot.lane.b32.xlu1 %v6330_v33, %s6252_s30 }
  0xb6   : > { %330 = vrot.lane.b32.xlu0 %v6334_v34, %s6252_s30 }
  0xb7   : > { %334 = vrot.lane.b32.xlu1 %v6330_v33, %s6253_s5 }
  0xba   : > { %336 = vrot.lane.b32.xlu0 %v6334_v34, %s6253_s5 }
  0xbb   : > { %340 = vrot.lane.b32.xlu1 %v6330_v33, %s6254_s6 }
  0xbe   : > { %342 = vrot.lane.b32.xlu0 %v6334_v34, %s6254_s6 }
  0xbf   : > { %346 = vrot.lane.b32.xlu1 %v6330_v33, %s6255_s7 }
  0xc2   : > { %348 = vrot.lane.b32.xlu0 %v6334_v34, %s6255_s7 }
  0xc3   : > { %352 = vrot.lane.b32.xlu1 %v6330_v33, %s6256_s8 }
  0xc6   : > { %354 = vrot.lane.b32.xlu0 %v6334_v34, %s6256_s8 }
  0xc7   : > { %358 = vrot.lane.b32.xlu1 %v6330_v33, %s6257_s9 }
  0xca   : > { %360 = vrot.lane.b32.xlu0 %v6334_v34, %s6257_s9 }
  0xcb   : > { %364 = vrot.lane.b32.xlu1 %v6330_v33, %s6258_s10 }
  0xce   : > { %366 = vrot.lane.b32.xlu0 %v6334_v34, %s6258_s10 }
  0xcf   : > { %1656 = vrot.lane.b32.xlu1 %v6392_v35, %s6244_s22 }
  0xd2   : > { %1658 = vrot.lane.b32.xlu0 %v6392_v35, %s6245_s23 }
  0xd3   : > { %1660 = vrot.lane.b32.xlu1 %v6392_v35, %s6246_s24 }
  0xd6   : > { %1662 = vrot.lane.b32.xlu0 %v6392_v35, %s6247_s25 }
  0xd7   : > { %1664 = vrot.lane.b32.xlu1 %v6392_v35, %s6248_s26 }
  0xda   : > { %1666 = vrot.lane.b32.xlu0 %v6392_v35, %s6249_s27 }
  0xdb   : > { %1668 = vrot.lane.b32.xlu1 %v6392_v35, %s6250_s28 }
  0xde   : > { %1670 = vrot.lane.b32.xlu0 %v6392_v35, %s6251_s29 }
  0xdf   : > { %1672 = vrot.lane.b32.xlu1 %v6392_v35, %s6252_s30 }
  0xe2   : > { %1674 = vrot.lane.b32.xlu0 %v6392_v35, %s6253_s5 }
  0xe3   : > { %1676 = vrot.lane.b32.xlu1 %v6392_v35, %s6254_s6 }
  0xe6   : > { %1678 = vrot.lane.b32.xlu0 %v6392_v35, %s6255_s7 }
  0xe7   : > { %1680 = vrot.lane.b32.xlu1 %v6392_v35, %s6256_s8 }
  0xea   : > { %1682 = vrot.lane.b32.xlu0 %v6392_v35, %s6257_s9 }
  0xeb   : > { %1684 = vrot.lane.b32.xlu1 %v6392_v35, %s6258_s10 }
  0xee   : > { %2473 = vrot.lane.b32.xlu0 %v6437_v51, %s6244_s22 }
  0xef   : > { %2475 = vrot.lane.b32.xlu1 %v6443_v52, %s6244_s22 }
 0x105   : > { %v6447_v53 = vpop.permute.xlu1 %280 }
 0x106   : > { %11122 = vst [vmem:[#allocation6_spill] sm:$0xff] %v6447_v53  ;;  %738 = vrot.lane.b32.xlu1 %v6447_v53, %s6244_s22  ;;  %v1714_v6 = vshrl.u32 %v6447_v53, 16  ;;  %v1717_v10 = vshll.u32 %v6447_v53, 16 }
 0x108   : > { %v6451_v54 = vpop.permute.xlu0 %282  ;;  %v6511_v22 = vrot.slane %v1714_v6, 4  ;;  %v1719_v26 = vrot.slane %v1717_v10, 5 }
 0x109   : > { %11123 = vst [vmem:[#allocation7_spill] sm:$0xff] %v6451_v54  ;;  %v6453_v55 = vpop.permute.xlu1 %286  ;;  %740 = vrot.lane.b32.xlu0 %v6451_v54, %s6244_s22  ;;  %v1723_v31 = vshll.u32 %v6451_v54, 16  ;;  %v1727_v35 = vshrl.u32 %v6451_v54, 16  ;;  %v10742_v49 = vrot.slane %v6451_v54, 5 }
 0x10a   : > { %11124 = vst [vmem:[#allocation8_spill] sm:$0xff] %v6453_v55  ;;  %742 = vrot.lane.b32.xlu1 %v6453_v55, %s6244_s22  ;;  %v1738_v11 = vshrl.u32 %v6453_v55, 16  ;;  %v1741_v12 = vshll.u32 %v6453_v55, 16 }
 0x10c   : > { %v6459_v56 = vpop.permute.xlu0 %288  ;;  %v1740_v27 = vrot.slane %v1738_v11, 4  ;;  %v1743_v28 = vrot.slane %v1741_v12, 5 }
 0x10d   : > { %11125 = vst [vmem:[#allocation9_spill] sm:$0xff] %v6459_v56  ;;  %v6461_v57 = vpop.permute.xlu1 %292  ;;  %744 = vrot.lane.b32.xlu0 %v6459_v56, %s6244_s22  ;;  %v1747_v45 = vshll.u32 %v6459_v56, 16 }
 0x10e   : > { %746 = vrot.lane.b32.xlu1 %v6461_v57, %s6244_s22  ;;  %v1762_v29 = vshrl.u32 %v6461_v57, 16  ;;  %v1765_v32 = vshll.u32 %v6461_v57, 16  ;;  %v1744_v46 = vor.u32 %v1743_v28, %v1740_v27 }
 0x110   : > { %v6467_v61 = vpop.permute.xlu0 %294  ;;  %v1764_v47 = vrot.slane %v1762_v29, 4  ;;  %v1767_v59 = vrot.slane %v1765_v32, 5 }
 0x111   : > { %11126 = vst [vmem:[#allocation10_spill] sm:$0xff] %v6467_v61  ;;  %v6470_v63 = vpop.permute.xlu1 %298  ;;  %748 = vrot.lane.b32.xlu0 %v6467_v61, %s6244_s22  ;;  %v1771_v27 = vshll.u32 %v6467_v61, 16 }
 0x112   : > { %750 = vrot.lane.b32.xlu1 %v6470_v63, %s6244_s22  ;;  %v1786_v3 = vshrl.u32 %v6470_v63, 16  ;;  %v1789_v4 = vshll.u32 %v6470_v63, 16  ;;  %v370_v20 = vcombine.low %v6330_v33, %v6470_v63  ;;  %v1768_v28 = vor.u32 %v1767_v59, %v1764_v47 }
 0x113   : > { %v6602_v47 = vrot.slane %v10742_v49, 4 }
 0x114   : > { %v6480_v5 = vpop.permute.xlu0 %300  ;;  %v1788_v16 = vrot.slane %v1786_v3, 4  ;;  %v1791_v17 = vrot.slane %v1789_v4, 5  ;;  %v6532_v39 = vrot.slane %v370_v20, %v6494_v13  ;;  %v1745_v20 = vrot.slane %v1744_v46, 4 }
 0x115   : > { %11128 = vst [vmem:[#allocation12_spill] sm:$0xff] %v6480_v5  ;;  %v6486_v9 = vpop.permute.xlu1 %304  ;;  %752 = vrot.lane.b32.xlu0 %v6480_v5, %s6244_s22  ;;  %v1795_v33 = vshll.u32 %v6480_v5, 16  ;;  %v1751_v46 = vshrl.u32 %v6459_v56, 16  ;;  %11144 = vst [vmem:[#allocation26_spill] sm:$0xff] %v6602_v47 }
 0x116   : > { %754 = vrot.lane.b32.xlu1 %v6486_v9, %s6244_s22  ;;  %v1810_v18 = vshrl.u32 %v6486_v9, 16  ;;  %v1813_v23 = vshll.u32 %v6486_v9, 16  ;;  %v1792_v36 = vor.u32 %v1791_v17, %v1788_v16  ;;  %11135 = vst [vmem:[#allocation17_spill] sm:$0xff] %v6532_v39  ;;  %v404_v40 = vcombine.low %v6447_v53, %v6486_v9 }
 0x117   : > { %v6554_v60 = vrot.slane %v1795_v33, 5  ;;  %v6571_v16 = vrot.slane %v1723_v31, 5  ;;  %v1720_v17 = vor.u32 %v1719_v26, %v6511_v22  ;;  %v1753_v2 = vrot.slane %v1751_v46, 4 }
 0x118   : > { %v6509_v21 = vpop.permute.xlu0 %306  ;;  %v1812_v37 = vrot.slane %v1810_v18, 4  ;;  %v1815_v38 = vrot.slane %v1813_v23, 5  ;;  %v1793_v0 = vrot.slane %v1792_v36, 4  ;;  %v6559_v7 = vrot.slane %v404_v40, %v6494_v13 }
 0x119   : > { %11133 = vst [vmem:[#allocation15_spill] sm:$0xff] %v6509_v21  ;;  %v6518_v25 = vpop.permute.xlu1 %310  ;;  %756 = vrot.lane.b32.xlu0 %v6509_v21, %s6244_s22  ;;  %v1819_v3 = vshll.u32 %v6509_v21, 16  ;;  %v6574_v18 = vrot.slane %v1747_v45, 5  ;;  %v1721_v45 = vrot.slane %v1720_v17, 4  ;;  %v1769_v17 = vrot.slane %v1768_v28, 4 }
 0x11a   : > { %v378_v30 = vcombine.low %v6453_v55, %v6518_v25  ;;  %758 = vrot.lane.b32.xlu1 %v6518_v25, %s6244_s22  ;;  %v1834_v43 = vshrl.u32 %v6518_v25, 16  ;;  %v1816_v4 = vor.u32 %v1815_v38, %v1812_v37  ;;  %11138 = vst [vmem:[#allocation20_spill] sm:$0xff] %v6559_v7  ;;  %v1837_v12 = vshll.u32 %v6518_v25, 16 }
 0x11b   : > { %v6586_v31 = vrot.slane %v1819_v3, 5  ;;  %v1799_v28 = vshrl.u32 %v6480_v5, 16 }
 0x11c   : > { %v6537_v41 = vrot.slane %v378_v30, %v6494_v13  ;;  %v6539_v42 = vpop.permute.xlu0 %312  ;;  %v1836_v11 = vrot.slane %v1834_v43, 4  ;;  %v1839_v29 = vrot.slane %v1837_v12, 5  ;;  %v6584_v30 = vsel %vm6429_vm5, %v1793_v0, %v6554_v60 }
 0x11d   : > { %11137 = vst [vmem:[#allocation19_spill] sm:$0xff] %v6539_v42  ;;  %v6542_v44 = vpop.permute.xlu1 %316  ;;  %760 = vrot.lane.b32.xlu0 %v6539_v42, %s6244_s22  ;;  %v1843_v6 = vshll.u32 %v6539_v42, 16  ;;  %11141 = vst [vmem:[#allocation23_spill] sm:$0xff] %v6584_v30  ;;  %v1817_v22 = vrot.slane %v1816_v4, 4  ;;  %v1729_v43 = vrot.slane %v1727_v35, 4  ;;  %v6610_v4 = vsel %vm6429_vm5, %v1745_v20, %v6574_v18 }
 0x11e   : > { %11136 = vst [vmem:[#allocation18_spill] sm:$0xff] %v6537_v41  ;;  %v412_v58 = vcombine.low %v6461_v57, %v6542_v44  ;;  %762 = vrot.lane.b32.xlu1 %v6542_v44, %s6244_s22  ;;  %v1840_v33 = vor.u32 %v1839_v29, %v1836_v11  ;;  %v1858_v37 = vshrl.u32 %v6542_v44, 16  ;;  %v1861_v38 = vshll.u32 %v6542_v44, 16  ;;  %11145 = vst [vmem:[#allocation27_spill] sm:$0xff] %v6610_v4 }
 0x11f   : > { %v6588_v26 = vrot.slane %v1843_v6, 5  ;;  %v6612_v35 = vrot.slane %v1771_v27, 5  ;;  %v2105_v6 = vcombine.low %v6437_v51, %v6584_v30  ;;  %v6619_v11 = vsel %vm6429_vm5, %v1817_v22, %v6586_v31 }
 0x120   : > { %v6562_v8 = vrot.slane %v412_v58, %v6494_v13  ;;  %v6564_v10 = vpop.permute.xlu0 %318  ;;  %v1775_v58 = vshrl.u32 %v6467_v61, 16  ;;  %v1841_v59 = vrot.slane %v1840_v33, 4  ;;  %v1860_v0 = vrot.slane %v1858_v37, 4  ;;  %11146 = vst [vmem:[#allocation28_spill] sm:$0xff] %v6619_v11 }
 0x121   : > { %11140 = vst [vmem:[#allocation22_spill] sm:$0xff] %v6564_v10  ;;  %v6567_v14 = vpop.permute.xlu1 %322  ;;  %764 = vrot.lane.b32.xlu0 %v6564_v10, %s6244_s22  ;;  %v1867_v36 = vshll.u32 %v6564_v10, 16  ;;  %v1863_v3 = vrot.slane %v1861_v38, 5  ;;  %v6637_v22 = vsel %vm6429_vm5, %v1721_v45, %v6571_v16  ;;  %v1823_v37 = vshrl.u32 %v6509_v21, 16 }
 0x122   : > { %11139 = vst [vmem:[#allocation21_spill] sm:$0xff] %v6562_v8  ;;  %766 = vrot.lane.b32.xlu1 %v6567_v14, %s6244_s22  ;;  %v6626_v29 = vsel %vm6429_vm5, %v1841_v59, %v6588_v26  ;;  %11150 = vst [vmem:[#allocation32_spill] sm:$0xff] %v6637_v22  ;;  %v1847_v59 = vshrl.u32 %v6539_v42, 16  ;;  %v1730_v45 = vor.u32 %v1729_v43, %v6571_v16  ;;  %v1777_v34 = vrot.slane %v1775_v58, 4 }
 0x123   : > { %11148 = vst [vmem:[#allocation30_spill] sm:$0xff] %v6626_v29  ;;  %v6628_v20 = vrot.slane %v1867_v36, 5  ;;  %v1864_v27 = vor.u32 %v1863_v3, %v1860_v0  ;;  %v2113_v38 = vcombine.low %v6610_v4, %v6626_v29  ;;  %v2139_v36 = vcombine.low %v6637_v22, %v6619_v11 }
 0x124   : > { %v6590_v32 = vpop.permute.xlu0 %324  ;;  %v1871_v0 = vshrl.u32 %v6564_v10, 16  ;;  %v6651_v49 = vrot.slane %v2105_v6, %v6494_v13  ;;  %v6662_v8 = vsel %vm6429_vm5, %v1769_v17, %v6612_v35  ;;  %v1801_v6 = vrot.slane %v1799_v28, 4 }
 0x125   : > { %11142 = vst [vmem:[#allocation24_spill] sm:$0xff] %v6590_v32  ;;  %v6595_v40 = vpop.permute.xlu1 %328  ;;  %768 = vrot.lane.b32.xlu0 %v6590_v32, %s6244_s22  ;;  %v1865_v3 = vrot.slane %v1864_v27, 4  ;;  %v6654_v62 = vrot.slane %v2113_v38, %v6494_v13  ;;  %11154 = vst [vmem:[#allocation36_spill] sm:$0xff] %v6662_v8  ;;  %v1825_v27 = vrot.slane %v1823_v37, 4  ;;  %v6680_v17 = vrot.slane %v2139_v36, %v6494_v13 }
 0x126   : > { %11143 = vst [vmem:[#allocation25_spill] sm:$0xff] %v6595_v40  ;;  %770 = vrot.lane.b32.xlu1 %v6595_v40, %s6244_s22  ;;  %11151 = vst [vmem:[#allocation33_spill] sm:$0xff] %v6651_v49  ;;  %v1849_v38 = vrot.slane %v1847_v59, 4  ;;  %v1891_v23 = vshll.u32 %v6590_v32, 16  ;;  %v1895_v28 = vshrl.u32 %v6590_v32, 16  ;;  %v1882_v37 = vshrl.u32 %v6567_v14, 16 }
 0x127   : > { %11152 = vst [vmem:[#allocation34_spill] sm:$0xff] %v6654_v62  ;;  %v6667_v16 = vsel %vm6429_vm5, %v1865_v3, %v6628_v20  ;;  %11157 = vst [vmem:[#allocation39_spill] sm:$0xff] %v6680_v17  ;;  %v1873_v3 = vrot.slane %v1871_v0, 4  ;;  %v1885_v46 = vshll.u32 %v6567_v14, 16  ;;  %v1906_v59 = vshrl.u32 %v6595_v40, 16 }
 0x128   : > { %v6621_v12 = vpop.permute.xlu0 %330  ;;  %11155 = vst [vmem:[#allocation37_spill] sm:$0xff] %v6667_v16  ;;  %v2147_v58 = vcombine.low %v6662_v8, %v6667_v16  ;;  %v1909_v0 = vshll.u32 %v6595_v40, 16  ;;  %v1754_v16 = vor.u32 %v1753_v2, %v6574_v18  ;;  %v1778_v29 = vor.u32 %v1777_v34, %v6612_v35 }
 0x129   : > { %11147 = vst [vmem:[#allocation29_spill] sm:$0xff] %v6621_v12  ;;  %v6630_v33 = vpop.permute.xlu1 %334  ;;  %772 = vrot.lane.b32.xlu0 %v6621_v12, %s6244_s22  ;;  %v1915_v39 = vshll.u32 %v6621_v12, 16  ;;  %v1919_v36 = vshrl.u32 %v6621_v12, 16  ;;  %v1802_v30 = vor.u32 %v1801_v6, %v6554_v60  ;;  %v1826_v8 = vor.u32 %v1825_v27, %v6586_v31 }
 0x12a   : > { %11149 = vst [vmem:[#allocation31_spill] sm:$0xff] %v6630_v33  ;;  %774 = vrot.lane.b32.xlu1 %v6630_v33, %s6244_s22  ;;  %v6684_v7 = vrot.slane %v2147_v58, %v6494_v13  ;;  %v6699_v58 = vrot.slane %v1730_v45, 4  ;;  %v1850_v4 = vor.u32 %v1849_v38, %v6588_v26  ;;  %v1874_v22 = vor.u32 %v1873_v3, %v6628_v20 }
 0x12b   : > { %v6711_v45 = vrot.slane %v1891_v23, 5  ;;  %v6713_v49 = vrot.slane %v1895_v28, 4  ;;  %v6715_v2 = vrot.slane %v1882_v37, 4  ;;  %v6717_v34 = vrot.slane %v1885_v46, 5 }
 0x12c   : > { %v6657_v50 = vpop.permute.xlu0 %336  ;;  %11158 = vst [vmem:[#allocation40_spill] sm:$0xff] %v6684_v7  ;;  %v6721_v35 = vrot.slane %v1915_v39, 5  ;;  %v6723_v11 = vrot.slane %v1919_v36, 4  ;;  %v6725_v60 = vrot.slane %v1906_v59, 4  ;;  %v6727_v31 = vrot.slane %v1909_v0, 5 }
 0x12d   : > { %11153 = vst [vmem:[#allocation35_spill] sm:$0xff] %v6657_v50  ;;  %v6669_v43 = vpop.permute.xlu1 %340  ;;  %776 = vrot.lane.b32.xlu0 %v6657_v50, %s6244_s22  ;;  %v6733_v23 = vrot.slane %v1754_v16, 4  ;;  %v6735_v20 = vrot.slane %v1778_v29, 4  ;;  %v11163_v6 = vrot.slane %v6459_v56, 5  ;;  %v6744_v46 = vrot.slane %v1802_v30, 4 }
 0x12e   : > { %11156 = vst [vmem:[#allocation38_spill] sm:$0xff] %v6669_v43  ;;  %778 = vrot.lane.b32.xlu1 %v6669_v43, %s6244_s22  ;;  %v6746_v38 = vrot.slane %v1826_v8, 4  ;;  %v6748_v3 = vrot.slane %v1850_v4, 4  ;;  %v1930_v16 = vshrl.u32 %v6630_v33, 16  ;;  %v6751_v28 = vrot.slane %v1874_v22, 4 }
 0x12f   : > { %v6739_v27 = vrot.slane %v11163_v6, 4  ;;  %v1898_v29 = vor.u32 %v6713_v49, %v6711_v45  ;;  %v1888_v37 = vor.u32 %v6717_v34, %v6715_v2  ;;  %v1933_v36 = vshll.u32 %v6630_v33, 16 }
 0x130   : > { %v6689_v41 = vpop.permute.xlu0 %342  ;;  %v1922_v8 = vor.u32 %v6723_v11, %v6721_v35  ;;  %v1912_v4 = vor.u32 %v6727_v31, %v6725_v60  ;;  %v1939_v22 = vshll.u32 %v6657_v50, 16  ;;  %v1943_v49 = vshrl.u32 %v6657_v50, 16 }
 0x131   : > { %11159 = vst [vmem:[#allocation41_spill] sm:$0xff] %v6689_v41  ;;  %v6695_v51 = vpop.permute.xlu1 %346  ;;  %780 = vrot.lane.b32.xlu0 %v6689_v41, %s6244_s22  ;;  %11164 = vst [vmem:[#allocation45_spill] sm:$0xff] %v6739_v27  ;;  %v1954_v2 = vshrl.u32 %v6669_v43, 16  ;;  %v1957_v34 = vshll.u32 %v6669_v43, 16  ;;  %v1932_v60 = vrot.slane %v1930_v16, 4  ;;  %v1963_v31 = vshll.u32 %v6689_v41, 16 }
 0x132   : > { %11160 = vst [vmem:[#allocation42_spill] sm:$0xff] %v6695_v51  ;;  %782 = vrot.lane.b32.xlu1 %v6695_v51, %s6244_s22  ;;  %v438_v30 = vcombine.low %v6567_v14, %v6695_v51  ;;  %v1978_v6 = vshrl.u32 %v6695_v51, 16  ;;  %v1981_v39 = vshll.u32 %v6695_v51, 16  ;;  %v1935_v17 = vrot.slane %v1933_v36, 5 }
 0x133   : > { %v1967_v7 = vshrl.u32 %v6689_v41, 16  ;;  %v1941_v16 = vrot.slane %v1939_v22, 5  ;;  %v1956_v36 = vrot.slane %v1954_v2, 4  ;;  %v1959_v41 = vrot.slane %v1957_v34, 5 }
 0x134   : > { %v6719_v18 = vpop.permute.xlu0 %348  ;;  %v6786_v50 = vrot.slane %v438_v30, %v6494_v13  ;;  %v1983_v24 = vrot.slane %v1981_v39, 5  ;;  %v1945_v22 = vrot.slane %v1943_v49, 4  ;;  %v1936_v19 = vor.u32 %v1935_v17, %v1932_v60 }
 0x135   : > { %11161 = vst [vmem:[#allocation43_spill] sm:$0xff] %v6719_v18  ;;  %v6729_v26 = vpop.permute.xlu1 %352  ;;  %784 = vrot.lane.b32.xlu0 %v6719_v18, %s6244_s22  ;;  %v1987_v1 = vshll.u32 %v6719_v18, 16  ;;  %v1991_v27 = vshrl.u32 %v6719_v18, 16  ;;  %v1965_v18 = vrot.slane %v1963_v31, 5  ;;  %v1913_v49 = vrot.slane %v1912_v4, 4 }
 0x136   : > { %11162 = vst [vmem:[#allocation44_spill] sm:$0xff] %v6729_v26  ;;  %786 = vrot.lane.b32.xlu1 %v6729_v26, %s6244_s22  ;;  %v472_v62 = vcombine.low %v6595_v40, %v6729_v26  ;;  %11167 = vst [vmem:[#allocation48_spill] sm:$0xff] %v6786_v50  ;;  %v1969_v40 = vrot.slane %v1967_v7, 4  ;;  %v1960_v17 = vor.u32 %v1959_v41, %v1956_v36  ;;  %v2002_v60 = vshrl.u32 %v6729_v26, 16 }
 0x137   : > { %v1989_v2 = vrot.slane %v1987_v1, 5  ;;  %v2005_v31 = vshll.u32 %v6729_v26, 16  ;;  %v10840_v48 = vrot.slane %v6564_v10, 5 }
 0x138   : > { %v6760_v59 = vpop.permute.xlu0 %354  ;;  %v6805_v12 = vrot.slane %v472_v62, %v6494_v13  ;;  %v1889_v62 = vrot.slane %v1888_v37, 4 }
 0x139   : > { %11165 = vst [vmem:[#allocation46_spill] sm:$0xff] %v6760_v59  ;;  %v6767_v0 = vpop.permute.xlu1 %358  ;;  %788 = vrot.lane.b32.xlu0 %v6760_v59, %s6244_s22  ;;  %v2011_v30 = vshll.u32 %v6760_v59, 16 }
 0x13a   : > { %11166 = vst [vmem:[#allocation47_spill] sm:$0xff] %v6767_v0  ;;  %v446_v11 = vcombine.low %v6630_v33, %v6767_v0  ;;  %790 = vrot.lane.b32.xlu1 %v6767_v0, %s6244_s22  ;;  %v1980_v33 = vrot.slane %v1978_v6, 4  ;;  %11170 = vst [vmem:[#allocation51_spill] sm:$0xff] %v6805_v12  ;;  %v1993_v6 = vrot.slane %v1991_v27, 4  ;;  %v1946_v27 = vor.u32 %v1945_v22, %v1941_v16 }
 0x13b   : > { %v2026_v37 = vshrl.u32 %v6767_v0, 16  ;;  %v6831_v4 = vrot.slane %v2011_v30, 5  ;;  %v2029_v22 = vshll.u32 %v6767_v0, 16  ;;  %v2004_v30 = vrot.slane %v2002_v60, 4 }
 0x13c   : > { %v6789_v15 = vrot.slane %v446_v11, %v6494_v13  ;;  %v6791_v47 = vpop.permute.xlu0 %360  ;;  %v1984_v7 = vor.u32 %v1983_v24, %v1980_v33  ;;  %v1970_v24 = vor.u32 %v1969_v40, %v1965_v18  ;;  %v1994_v33 = vor.u32 %v1993_v6, %v1989_v2 }
 0x13d   : > { %11169 = vst [vmem:[#allocation50_spill] sm:$0xff] %v6791_v47  ;;  %v6794_v51 = vpop.permute.xlu1 %364  ;;  %792 = vrot.lane.b32.xlu0 %v6791_v47, %s6244_s22  ;;  %v6850_v40 = vrot.slane %v1946_v27, 4  ;;  %v2007_v6 = vrot.slane %v2005_v31, 5 }
 0x13e   : > { %11168 = vst [vmem:[#allocation49_spill] sm:$0xff] %v6789_v15  ;;  %v480_v11 = vcombine.low %v6669_v43, %v6794_v51  ;;  %794 = vrot.lane.b32.xlu1 %v6794_v51, %s6244_s22  ;;  %v2015_v15 = vshrl.u32 %v6760_v59, 16  ;;  %v6826_v59 = vrot.slane %v1922_v8, 4  ;;  %v1937_v43 = vrot.slane %v1936_v19, 4 }
 0x13f   : > { %v1961_v19 = vrot.slane %v1960_v17, 4  ;;  %v1985_v8 = vrot.slane %v1984_v7, 4  ;;  %v2031_v17 = vrot.slane %v2029_v22, 5 }
 0x140   : > { %v6808_v34 = vrot.slane %v480_v11, %v6494_v13  ;;  %v6810_v39 = vpop.permute.xlu0 %366  ;;  %v6824_v11 = vrot.slane %v1898_v29, 4  ;;  %v2017_v36 = vrot.slane %v2015_v15, 4  ;;  %v6840_v29 = vsel %vm6429_vm5, %v1889_v62, %v6711_v45 }
 0x141   : > { %11172 = vst [vmem:[#allocation53_spill] sm:$0xff] %v6810_v39  ;;  %v6814_v50 = vpop.permute.xlu1 %1656  ;;  %796 = vrot.lane.b32.xlu0 %v6810_v39, %s6244_s22  ;;  %11173 = vst [vmem:[#allocation54_spill] sm:$0xff] %v6840_v29  ;;  %v6848_v15 = vsel %vm6429_vm5, %v1913_v49, %v6721_v35  ;;  %v2035_v45 = vshll.u32 %v6791_v47, 16  ;;  %v2028_v62 = vrot.slane %v2026_v37, 4  ;;  %v6858_v12 = vsel %vm6429_vm5, %v1937_v43, %v1941_v16 }
 0x142   : > { %11171 = vst [vmem:[#allocation52_spill] sm:$0xff] %v6808_v34  ;;  %1196 = vrot.lane.b32.xlu1 %v6447_v53, %s6245_s23  ;;  %11174 = vst [vmem:[#allocation55_spill] sm:$0xff] %v6848_v15  ;;  %v1733_v34 = vshll.u32 %v6814_v50, 16  ;;  %v6862_v35 = vrot.slane %v1994_v33, 4  ;;  %v2018_v49 = vor.u32 %v2017_v36, %v6831_v4  ;;  %v6873_v37 = vsel %vm6429_vm5, %v1961_v19, %v1965_v18 }
 0x143   : > { %11175 = vst [vmem:[#allocation56_spill] sm:$0xff] %v6858_v12  ;;  %11176 = vst [vmem:[#allocation57_spill] sm:$0xff] %v6873_v37  ;;  %v6877_v43 = vsel %vm6429_vm5, %v1985_v8, %v1989_v2  ;;  %v2008_v33 = vor.u32 %v2007_v6, %v2004_v30  ;;  %v2039_v36 = vshrl.u32 %v6791_v47, 16  ;;  %v2032_v18 = vor.u32 %v2031_v17, %v2028_v62 }
 0x144   : > { %v6829_v41 = vpop.permute.xlu0 %1658  ;;  %11177 = vst [vmem:[#allocation58_spill] sm:$0xff] %v6877_v43  ;;  %v1735_v22 = vrot.slane %v1733_v34, 5  ;;  %v2173_v8 = vcombine.low %v6840_v29, %v6877_v43  ;;  %v6891_v0 = vrot.slane %v2018_v49, 4 }
 0x145   : > { %v6833_v1 = vpop.permute.xlu1 %1660  ;;  %1198 = vrot.lane.b32.xlu0 %v6451_v54, %s6245_s23  ;;  %v1757_v27 = vshll.u32 %v6829_v41, 16  ;;  %v6884_v54 = vrot.slane %v2035_v45, 5  ;;  %v2033_v6 = vrot.slane %v2032_v18, 4  ;;  %v2009_v49 = vrot.slane %v2008_v33, 4 }
 0x146   : > { %1200 = vrot.lane.b32.xlu1 %v6453_v55, %s6245_s23  ;;  %v6860_v55 = vrot.slane %v1970_v24, 4  ;;  %v1781_v16 = vshll.u32 %v6833_v1, 16 }
 0x147   : > { %v1759_v26 = vrot.slane %v1757_v27, 5 }
 0x148   : > { %v6854_v7 = vpop.permute.xlu0 %1662  ;;  %v1783_v45 = vrot.slane %v1781_v16, 5 }
 0x149   : > { %v1805_v60 = vshll.u32 %v6854_v7, 16  ;;  %v6867_v31 = vpop.permute.xlu1 %1664  ;;  %1202 = vrot.lane.b32.xlu0 %v6459_v56, %s6245_s23  ;;  %v6936_v33 = vsel %vm6429_vm5, %v6733_v23, %v1759_v26  ;;  %v3469_v43 = vrot.slane %v6854_v7, 5 }
 0x14a   : > { %v1829_v24 = vshll.u32 %v6867_v31, 16  ;;  %1204 = vrot.lane.b32.xlu1 %v6461_v57, %s6245_s23  ;;  %11182 = vst [vmem:[#allocation63_spill] sm:$0xff] %v6936_v33  ;;  %v3476_v7 = vrot.slane %v6867_v31, 5 }
 0x14b   : > { %v1807_v56 = vrot.slane %v1805_v60, 5  ;;  %v6914_v60 = vsel %vm6429_vm5, %v6699_v58, %v1735_v22 }
 0x14c   : > { %v1831_v53 = vrot.slane %v1829_v24, 5  ;;  %v6887_v2 = vpop.permute.xlu0 %1666  ;;  %11180 = vst [vmem:[#allocation61_spill] sm:$0xff] %v6914_v60  ;;  %v2063_v24 = vshrl.u32 %v6810_v39, 16 }
 0x14d   : > { %v1853_v57 = vshll.u32 %v6887_v2, 16  ;;  %v6894_v30 = vpop.permute.xlu1 %1668  ;;  %1206 = vrot.lane.b32.xlu0 %v6467_v61, %s6245_s23  ;;  %v6901_v34 = vsel %vm6429_vm5, %v6744_v46, %v1807_v56  ;;  %v6919_v56 = vsel %vm6429_vm5, %v2033_v6, %v6884_v54  ;;  %v2059_v46 = vshll.u32 %v6810_v39, 16 }
 0x14e   : > { %11178 = vst [vmem:[#allocation59_spill] sm:$0xff] %v6901_v34  ;;  %v1877_v62 = vshll.u32 %v6894_v30, 16  ;;  %1208 = vrot.lane.b32.xlu1 %v6470_v63, %s6245_s23  ;;  %v6909_v17 = vsel %vm6429_vm5, %v6746_v38, %v1831_v53  ;;  %11181 = vst [vmem:[#allocation62_spill] sm:$0xff] %v6919_v56  ;;  %v2241_v53 = vcombine.low %v6443_v52, %v6901_v34 }
 0x14f   : > { %11179 = vst [vmem:[#allocation60_spill] sm:$0xff] %v6909_v17  ;;  %v1855_v27 = vrot.slane %v1853_v57, 5  ;;  %v2181_v38 = vcombine.low %v6858_v12, %v6919_v56  ;;  %v2275_v22 = vcombine.low %v6914_v60, %v6909_v17  ;;  %v2041_v57 = vrot.slane %v2039_v36, 4 }
 0x150   : > { %v1879_v63 = vrot.slane %v1877_v62, 5  ;;  %v6922_v16 = vpop.permute.xlu0 %1670  ;;  %v6950_v6 = vsel %vm6429_vm5, %v6735_v20, %v1783_v45  ;;  %v6966_v36 = vrot.slane %v2059_v46, 5  ;;  %v2050_v20 = vshrl.u32 %v6794_v51, 16 }
 0x151   : > { %v6929_v58 = vpop.permute.xlu1 %1672  ;;  %1210 = vrot.lane.b32.xlu0 %v6480_v5, %s6245_s23  ;;  %v6943_v18 = vsel %vm6429_vm5, %v6748_v3, %v1855_v27  ;;  %11184 = vst [vmem:[#allocation65_spill] sm:$0xff] %v6950_v6  ;;  %v6962_v3 = vsel %vm6429_vm5, %v2009_v49, %v6831_v4  ;;  %v2053_v45 = vshll.u32 %v6794_v51, 16  ;;  %v6973_v27 = vrot.slane %v2241_v53, %v6494_v13 }
 0x152   : > { %11183 = vst [vmem:[#allocation64_spill] sm:$0xff] %v6943_v18  ;;  %1212 = vrot.lane.b32.xlu1 %v6486_v9, %s6245_s23  ;;  %v2249_v26 = vcombine.low %v6936_v33, %v6943_v18  ;;  %v6957_v23 = vsel %vm6429_vm5, %v6751_v28, %v1879_v63  ;;  %11186 = vst [vmem:[#allocation67_spill] sm:$0xff] %v6962_v3  ;;  %v6979_v4 = vrot.slane %v2181_v38, %v6494_v13 }
 0x153   : > { %11185 = vst [vmem:[#allocation66_spill] sm:$0xff] %v6957_v23  ;;  %v2283_v9 = vcombine.low %v6950_v6, %v6957_v23  ;;  %v2065_v49 = vrot.slane %v2063_v24, 4  ;;  %v6987_v19 = vrot.slane %v2275_v22, %v6494_v13  ;;  %v1901_v52 = vshll.u32 %v6922_v16, 16 }
 0x154   : > { %v6970_v62 = vpop.permute.xlu0 %1674  ;;  %v6976_v28 = vrot.slane %v2249_v26, %v6494_v13  ;;  %11187 = vst [vmem:[#allocation68_spill] sm:$0xff] %v6979_v4  ;;  %v2042_v26 = vor.u32 %v2041_v57, %v6884_v54  ;;  %v1925_v38 = vshll.u32 %v6929_v58, 16  ;;  %v7000_v63 = vrot.slane %v2173_v8, %v6494_v13 }
 0x155   : > { %v6982_v46 = vpop.permute.xlu1 %1676  ;;  %1214 = vrot.lane.b32.xlu0 %v6509_v21, %s6245_s23  ;;  %v6990_v53 = vrot.slane %v2283_v9, %v6494_v13  ;;  %v2207_v9 = vcombine.low %v6848_v15, %v6962_v3  ;;  %v2052_v54 = vrot.slane %v2050_v20, 4  ;;  %v2055_v57 = vrot.slane %v2053_v45, 5 }
 0x156   : > { %1216 = vrot.lane.b32.xlu1 %v6518_v25, %s6245_s23  ;;  %11188 = vst [vmem:[#allocation69_spill] sm:$0xff] %v7000_v63  ;;  %v2066_v8 = vor.u32 %v2065_v49, %v6966_v36  ;;  %v1949_v24 = vshll.u32 %v6970_v62, 16  ;;  %v1973_v22 = vshll.u32 %v6982_v46, 16  ;;  %v2043_v20 = vrot.slane %v2042_v26, 4 }
 0x157   : > { %v1903_v45 = vrot.slane %v1901_v52, 5  ;;  %v1927_v56 = vrot.slane %v1925_v38, 5  ;;  %v3483_v49 = vrot.slane %v6887_v2, 5  ;;  %v7026_v23 = vrot.slane %v2207_v9, %v6494_v13 }
 0x158   : > { %v7008_v12 = vpop.permute.xlu0 %1678  ;;  %v2056_v18 = vor.u32 %v2055_v57, %v2052_v54  ;;  %v2067_v31 = vrot.slane %v2066_v8, 4  ;;  %v10838_v52 = vrot.slane %v6480_v5, 5  ;;  %v1951_v38 = vrot.slane %v1949_v24, 5  ;;  %v11256_v5 = vld [vmem:[#allocation34_spill] sm:$0xff] }
 0x159   : > { %v1997_v29 = vshll.u32 %v7008_v12, 16  ;;  %v7016_v3 = vpop.permute.xlu1 %1680  ;;  %1218 = vrot.lane.b32.xlu0 %v6539_v42, %s6245_s23  ;;  %11189 = vst [vmem:[#allocation70_spill] sm:$0xff] %v7026_v23  ;;  %v1975_v6 = vrot.slane %v1973_v22, 5  ;;  %v7048_v24 = vsel %vm6429_vm5, %v6824_v11, %v1903_v45  ;;  %v7053_v22 = vsel %vm6429_vm5, %v6826_v59, %v1927_v56 }
 0x15a   : > { %v2021_v25 = vshll.u32 %v7016_v3, 16  ;;  %1220 = vrot.lane.b32.xlu1 %v6542_v44, %s6245_s23  ;;  %11191 = vst [vmem:[#allocation72_spill] sm:$0xff] %v7048_v24  ;;  %11192 = vst [vmem:[#allocation73_spill] sm:$0xff] %v7053_v22  ;;  %v10839_v54 = vrot.slane %v6509_v21, 5  ;;  %v3468_v59 = vrot.slane %v10838_v52, 4  ;;  %v10837_v56 = vrot.slane %v6539_v42, 5 }
 0x15b   : > { %v1999_v15 = vrot.slane %v1997_v29, 5  ;;  %v11209_v52 = vld [vmem:[#allocation45_spill] sm:$0xff]  ;;  %v2190_v42 = vcombine.high %v7000_v63, %v6979_v4 }
 0x15c   : > { %v2023_v34 = vrot.slane %v2021_v25, 5  ;;  %v7029_v26 = vpop.permute.xlu0 %1682  ;;  %v11198_v25 = vld [vmem:[#allocation25_spill] sm:$0xff]  ;;  %v3475_v45 = vrot.slane %v10839_v54, 4  ;;  %v11213_v54 = vld [vmem:[#allocation26_spill] sm:$0xff] }
 0x15d   : > { %v2045_v33 = vshll.u32 %v7029_v26, 16  ;;  %v7033_v44 = vpop.permute.xlu1 %1684  ;;  %1222 = vrot.lane.b32.xlu0 %v6564_v10, %s6245_s23  ;;  %v7040_v29 = vsel %vm6429_vm5, %v6862_v35, %v1999_v15 }
 0x15e   : > { %11190 = vst [vmem:[#allocation71_spill] sm:$0xff] %v7040_v29  ;;  %v2069_v2 = vshll.u32 %v7033_v44, 16  ;;  %1224 = vrot.lane.b32.xlu1 %v6567_v14, %s6245_s23  ;;  %v7058_v15 = vsel %vm6429_vm5, %v6891_v0, %v2023_v34  ;;  %v2309_v9 = vcombine.low %v7048_v24, %v7040_v29  ;;  %v2057_v14 = vrot.slane %v2056_v18, 4 }
 0x15f   : > { %11193 = vst [vmem:[#allocation74_spill] sm:$0xff] %v7058_v15  ;;  %v2047_v35 = vrot.slane %v2045_v33, 5  ;;  %v2343_v11 = vcombine.low %v7053_v22, %v7058_v15  ;;  %v7073_v0 = vsel %vm6429_vm5, %v6850_v40, %v1951_v38  ;;  %v7078_v34 = vsel %vm6429_vm5, %v6860_v55, %v1975_v6  ;;  %v11253_v6 = vld [vmem:[#allocation39_spill] sm:$0xff] }
 0x160   : > { %v2071_v57 = vrot.slane %v2069_v2, 5  ;;  %11194 = vst [vmem:[#allocation75_spill] sm:$0xff] %v7073_v0  ;;  %11195 = vst [vmem:[#allocation76_spill] sm:$0xff] %v7078_v34  ;;  %v7087_v18 = vsel %vm6429_vm5, %v2057_v14, %v6966_v36  ;;  %v3482_v38 = vrot.slane %v10837_v56, 4  ;;  %v11203_v14 = vld [vmem:[#allocation29_spill] sm:$0xff]  ;;  %v11208_v56 = vrot.slane %v6829_v41, 5 }
 0x161   : > { %1226 = vrot.lane.b32.xlu0 %v6590_v32, %s6245_s23  ;;  %v7082_v33 = vsel %vm6429_vm5, %v2043_v20, %v2047_v35  ;;  %11197 = vst [vmem:[#allocation78_spill] sm:$0xff] %v7087_v18  ;;  %v2215_v55 = vcombine.low %v6873_v37, %v7087_v18  ;;  %v7101_v20 = vsel %vm6503_vm8, %v3468_v59, %v3469_v43  ;;  %v11204_v59 = vld [vmem:[#allocation16_spill] sm:$0xff] }
 0x162   : > { %11196 = vst [vmem:[#allocation77_spill] sm:$0xff] %v7082_v33  ;;  %1228 = vrot.lane.b32.xlu1 %v11198_v25, %s6245_s23  ;;  %v2317_v40 = vcombine.low %v7073_v0, %v7082_v33  ;;  %v7095_v8 = vsel %vm6429_vm5, %v2067_v31, %v2071_v57  ;;  %11201 = vst [vmem:[#allocation79_spill] sm:$0xff] %v7101_v20  ;;  %v7111_v31 = vrot.slane %v2309_v9, %v6494_v13  ;;  %v11258_v18 = vld [vmem:[#allocation32_spill] sm:$0xff]  ;;  %v11259_v33 = vld [vmem:[#allocation63_spill] sm:$0xff] }
 0x163   : > { %11199 = vst [vmem:[#allocation25_spill] sm:$0xff] %v7095_v8  ;;  %v2351_v36 = vcombine.low %v7078_v34, %v7095_v8  ;;  %v7114_v2 = vrot.slane %v2343_v11, %v6494_v13  ;;  %v7120_v35 = vrot.slane %v2215_v55, %v6494_v13  ;;  %v3716_v25 = vcombine.low %v11204_v59, %v7101_v20  ;;  %v11271_v37 = vld [vmem:[#allocation36_spill] sm:$0xff] }
 0x164   : > { %v7117_v43 = vrot.slane %v2317_v40, %v6494_v13  ;;  %v7131_v9 = vsel %vm6503_vm8, %v3475_v45, %v3476_v7  ;;  %v7135_v11 = vsel %vm6503_vm8, %v3482_v38, %v3483_v49  ;;  %v11207_v40 = vld [vmem:[#allocation31_spill] sm:$0xff]  ;;  %v7148_v7 = vsel %vm6503_vm8, %v11209_v52, %v11208_v56  ;;  %v11215_v56 = vld [vmem:[#allocation13_spill] sm:$0xff] }
 0x165   : > { %11202 = vst [vmem:[#allocation80_spill] sm:$0xff] %v7120_v35  ;;  %1230 = vrot.lane.b32.xlu0 %v11203_v14, %s6245_s23  ;;  %v7125_v57 = vrot.slane %v2351_v36, %v6494_v13  ;;  %11205 = vst [vmem:[#allocation81_spill] sm:$0xff] %v7131_v9  ;;  %v11211_v45 = vrot.slane %v6467_v61, 5  ;;  %v3724_v41 = vcombine.low %v7148_v7, %v7135_v11  ;;  %v3489_v52 = vrot.slane %v10840_v48, 4  ;;  %v11216_v38 = vld [vmem:[#allocation35_spill] sm:$0xff]  ;;  %v11257_v61 = vld [vmem:[#allocation33_spill] sm:$0xff] }
 0x166   : > { %11206 = vst [vmem:[#allocation82_spill] sm:$0xff] %v7135_v11  ;;  %1232 = vrot.lane.b32.xlu1 %v11207_v40, %s6245_s23  ;;  %11210 = vst [vmem:[#allocation31_spill] sm:$0xff] %v7148_v7  ;;  %v11212_v40 = vrot.slane %v6814_v50, 5  ;;  %v390_v36 = vunpack.c.0.s8 %v11215_v56  ;;  %v11217_v50 = vrot.slane %v6833_v1, 5  ;;  %v11219_v56 = vrot.slane %v6894_v30, 5 }
 0x167   : > { %v3461_v49 = vrot.slane %v11211_v45, 4  ;;  %v7180_v17 = vrot.slane %v3724_v41, %v6494_v13  ;;  %v3497_v11 = vrot.slane %v6922_v16, 5  ;;  %v3504_v1 = vrot.slane %v6929_v58, 5 }
 0x168   : > { %v7159_v55 = vsel %vm6503_vm8, %v11213_v54, %v11212_v40  ;;  %v7177_v40 = vrot.slane %v3716_v25, %v6494_v13  ;;  %v7186_v48 = vsel %vm6503_vm8, %v3489_v52, %v11219_v56  ;;  %v3511_v41 = vrot.slane %v6970_v62, 5  ;;  %v11223_v62 = vld [vmem:[#allocation41_spill] sm:$0xff] }
 0x169   : > { %11214 = vst [vmem:[#allocation45_spill] sm:$0xff] %v7159_v55  ;;  %v3750_v45 = vcombine.low %v7159_v55, %v7131_v9  ;;  %1234 = vrot.lane.b32.xlu0 %v11216_v38, %s6245_s23  ;;  %v7174_v54 = vsel %vm6503_vm8, %v3461_v49, %v11217_v50  ;;  %11220 = vst [vmem:[#allocation13_spill] sm:$0xff] %v7186_v48  ;;  %v11221_v9 = vld [vmem:[#allocation38_spill] sm:$0xff]  ;;  %v3525_v30 = vrot.slane %v7008_v12, 5  ;;  %v11222_v50 = vld [vmem:[#allocation43_spill] sm:$0xff]  ;;  %v3518_v16 = vrot.slane %v6982_v46, 5 }
 0x16a   : > { %11218 = vst [vmem:[#allocation26_spill] sm:$0xff] %v7174_v54  ;;  %1236 = vrot.lane.b32.xlu1 %v11221_v9, %s6245_s23  ;;  %v3758_v25 = vcombine.low %v7174_v54, %v7186_v48  ;;  %v10855_v56 = vrot.slane %v11222_v50, 5  ;;  %v2258_v58 = vcombine.high %v6973_v27, %v6976_v28  ;;  %v2292_v12 = vcombine.high %v6987_v19, %v6990_v53 }
 0x16b   : > { %v7204_v9 = vrot.slane %v3750_v45, %v6494_v13  ;;  %v3532_v20 = vrot.slane %v7016_v3, 5  ;;  %v11224_v45 = vld [vmem:[#allocation42_spill] sm:$0xff]  ;;  %v11225_v54 = vrot.slane %v6590_v32, 5  ;;  %v3539_v52 = vrot.slane %v7029_v26, 5 }
 0x16c   : > { %v7207_v48 = vrot.slane %v3758_v25, %v6494_v13  ;;  %v3524_v46 = vrot.slane %v10855_v56, 4  ;;  %v11227_v56 = vld [vmem:[#allocation46_spill] sm:$0xff]  ;;  %v2326_v25 = vcombine.high %v7111_v31, %v7117_v43  ;;  %v11229_v26 = vrot.slane %v11203_v14, 5 }
 0x16d   : > { %1238 = vrot.lane.b32.xlu0 %v11223_v62, %s6245_s23  ;;  %v3496_v7 = vrot.slane %v11225_v54, 4  ;;  %v10862_v59 = vrot.slane %v11227_v56, 5  ;;  %v11231_v32 = vrot.slane %v6791_v47, 5  ;;  %v11233_v55 = vrot.slane %v11223_v62, 5 }
 0x16e   : > { %1240 = vrot.lane.b32.xlu1 %v11224_v45, %s6245_s23  ;;  %v7228_v49 = vsel %vm6503_vm8, %v3524_v46, %v3525_v30  ;;  %v3546_v45 = vrot.slane %v7033_v44, 5  ;;  %v3503_v30 = vrot.slane %v11229_v26, 4  ;;  %v11230_v46 = vrot.slane %v11216_v38, 5 }
 0x16f   : > { %11226 = vst [vmem:[#allocation38_spill] sm:$0xff] %v7228_v49  ;;  %v7237_v54 = vsel %vm6503_vm8, %v3496_v7, %v3497_v11  ;;  %v3531_v44 = vrot.slane %v10862_v59, 4  ;;  %v3538_v21 = vrot.slane %v11231_v32, 4  ;;  %v11232_v11 = vld [vmem:[#allocation44_spill] sm:$0xff]  ;;  %v2360_v7 = vcombine.high %v7114_v2, %v7125_v57 }
 0x170   : > { %11228 = vst [vmem:[#allocation42_spill] sm:$0xff] %v7237_v54  ;;  %v3510_v3 = vrot.slane %v11230_v46, 4  ;;  %v3784_v26 = vcombine.low %v7237_v54, %v7228_v49  ;;  %v11234_v46 = vrot.slane %v6810_v39, 5  ;;  %v7262_v59 = vsel %vm6503_vm8, %v3503_v30, %v3504_v1  ;;  %v7276_v49 = vpop.permute.xlu1 %2475  ;;  %v11243_v30 = vld [vmem:[#allocation47_spill] sm:$0xff]  ;;  %v11252_v54 = vld [vmem:[#allocation40_spill] sm:$0xff] }
 0x171   : > { %1242 = vrot.lane.b32.xlu0 %v11222_v50, %s6245_s23  ;;  %v3517_v50 = vrot.slane %v11233_v55, 4  ;;  %11235 = vst [vmem:[#allocation44_spill] sm:$0xff] %v7262_v59  ;;  %v7274_v55 = vsel %vm6503_vm8, %v3538_v21, %v3539_v52  ;;  %11239 = vst [vmem:[#allocation86_spill] sm:$0xff] %v7276_v49  ;;  %v11242_v21 = vld [vmem:[#allocation11_spill] sm:$0xff]  ;;  %v2224_v49 = vcombine.high %v7026_v23, %v7120_v35 }
 0x172   : > { %1244 = vrot.lane.b32.xlu1 %v11232_v11, %s6245_s23  ;;  %v3545_v38 = vrot.slane %v11234_v46, 4  ;;  %v7266_v32 = vsel %vm6503_vm8, %v3510_v3, %v3511_v41  ;;  %v7270_v11 = vsel %vm6503_vm8, %v3531_v44, %v3532_v20  ;;  %11238 = vst [vmem:[#allocation85_spill] sm:$0xff] %v7274_v55  ;;  %v7293_v52 = vsub.s32 %v390_v36, %v11242_v21  ;;  %v7309_v36 = vpop.permute.xlu0 %2473 }
 0x173   : > { %11236 = vst [vmem:[#allocation83_spill] sm:$0xff] %v7266_v32  ;;  %11237 = vst [vmem:[#allocation84_spill] sm:$0xff] %v7270_v11  ;;  %v7280_v46 = vsel %vm6503_vm8, %v3517_v50, %v3518_v16  ;;  %v3818_v1 = vcombine.low %v7262_v59, %v7270_v11  ;;  %v3792_v41 = vcombine.low %v7266_v32, %v7274_v55 }
 0x174   : > { %11240 = vst [vmem:[#allocation87_spill] sm:$0xff] %v7280_v46  ;;  %v7288_v20 = vsel %vm6503_vm8, %v3545_v38, %v3546_v45  ;;  %v3733_v50 = vcombine.high %v7177_v40, %v7180_v17  ;;  %v3767_v16 = vcombine.high %v7204_v9, %v7207_v48  ;;  %v7304_v38 = vrot.slane %v3784_v26, %v6494_v13 }
 0x175   : > { %11241 = vst [vmem:[#allocation88_spill] sm:$0xff] %v7288_v20  ;;  %1246 = vrot.lane.b32.xlu0 %v11227_v56, %s6245_s23  ;;  %v3826_v3 = vcombine.low %v7280_v46, %v7288_v20  ;;  %v7307_v45 = vrot.slane %v3792_v41, %v6494_v13  ;;  %11244 = vst [vmem:[#allocation11_spill] sm:$0xff] %v7309_v36  ;;  %v7312_v44 = vrot.slane %v2258_v58, %v7293_v52  ;;  %v11245_v46 = vmov 0  }
 0x176   : > { %1248 = vrot.lane.b32.xlu1 %v11243_v30, %s6245_s23  ;;  %v7315_v21 = vrot.slane %v2292_v12, %v7293_v52  ;;  %v7318_v55 = vrot.slane %v3818_v1, %v6494_v13  ;;  %v7326_v26 = vrot.slane %v2326_v25, %v7293_v52  ;;  %v7329_v41 = vrot.slane %v2360_v7, %v7293_v52 }
 0x177   : > { %v7321_v20 = vrot.slane %v3826_v3, %v6494_v13  ;;  %v3801_v12 = vcombine.high %v7304_v38, %v7307_v45  ;;  %v7338_v1 = vrot.slane %v3733_v50, %v7293_v52  ;;  %v7341_v3 = vrot.slane %v3767_v16, %v7293_v52 }
 0x178   : > { %v7323_v30 = vpop.permute.xlu1 %738  ;;  %v7359_v16 = vcombine.high %v7312_v44, %v11245_v46  ;;  %v7363_v25 = vcombine.high %v7315_v21, %v11245_v46  ;;  %v2156_v36 = vcombine.high %v11253_v6, %v11252_v54  ;;  %v2122_v10 = vcombine.high %v11257_v61, %v11256_v5 }
 0x179   : > { %1250 = vrot.lane.b32.xlu0 %v6791_v47, %s6245_s23  ;;  %v3835_v7 = vcombine.high %v7318_v55, %v7321_v20  ;;  %v7350_v58 = vrot.slane %v3801_v12, %v7293_v52  ;;  %v7373_v12 = vcombine.high %v7329_v41, %v11245_v46  ;;  %v7383_v59 = vcombine.high %v7341_v3, %v11245_v46 }
 0x17a   : > { %1252 = vrot.lane.b32.xlu1 %v6794_v51, %s6245_s23  ;;  %11246 = vst [vmem:[#allocation47_spill] sm:$0xff] %v7359_v16  ;;  %11247 = vst [vmem:[#allocation89_spill] sm:$0xff] %v7363_v25  ;;  %v7369_v51 = vcombine.high %v7326_v26, %v11245_v46  ;;  %v2421_v14 = vpack.i.b16 %v7363_v25, %v7359_v16  ;;  %v7418_v25 = vrot.slane %v2156_v36, %v7293_v52  ;;  %v11262_v36 = vld [vmem:[#allocation27_spill] sm:$0xff] }
 0x17b   : > { %v7352_v11 = vpop.permute.xlu0 %740  ;;  %v7355_v50 = vrot.slane %v3835_v7, %v7293_v52  ;;  %11249 = vst [vmem:[#allocation91_spill] sm:$0xff] %v7373_v12  ;;  %v7379_v7 = vcombine.high %v7338_v1, %v11245_v46  ;;  %11251 = vst [vmem:[#allocation93_spill] sm:$0xff] %v7383_v59  ;;  %v7393_v62 = vcombine.high %v7350_v58, %v11245_v46  ;;  %v2464_v35 = vshrl.u32 %v7326_v26, 16 }
 0x17c   : > { %v7365_v32 = vpop.permute.xlu1 %742  ;;  %11248 = vst [vmem:[#allocation90_spill] sm:$0xff] %v7369_v51  ;;  %v7421_v16 = vrot.slane %v2224_v49, %v7293_v52  ;;  %v7430_v29 = vrot.slane %v2122_v10, %v7293_v52  ;;  %v2416_v10 = vshrl.u32 %v7312_v44, 16 }
 0x17d   : > { %1254 = vrot.lane.b32.xlu0 %v6810_v39, %s6245_s23  ;;  %11250 = vst [vmem:[#allocation92_spill] sm:$0xff] %v7379_v7  ;;  %11254 = vst [vmem:[#allocation40_spill] sm:$0xff] %v7393_v62  ;;  %v7397_v39 = vcombine.high %v7355_v50, %v11245_v46  ;;  %v3896_v8 = vpack.i.b16 %v7383_v59, %v7379_v7  ;;  %v7433_v59 = vrot.slane %v2190_v42, %v7293_v52 }
 0x17e   : > { %2479 = vrot.lane.b32.xlu1 %v6914_v60, %s6244_s22  ;;  %v2469_v60 = vpack.i.b16 %v7373_v12, %v7369_v51  ;;  %v7447_v49 = vcombine.high %v7421_v16, %v11245_v46  ;;  %v2417_v42 = vshrl.u32 %v7315_v21, 16 }
 0x17f   : > { %11255 = vst [vmem:[#allocation39_spill] sm:$0xff] %v7397_v39  ;;  %v7399_v47 = vpop.permute.xlu0 %744  ;;  %v3944_v12 = vpack.i.b16 %v7397_v39, %v7393_v62  ;;  %v7454_v39 = vcombine.high %v7430_v29, %v11245_v46  ;;  %v7458_v62 = vcombine.high %v7433_v59, %v11245_v46 }
 0x180   : > { %v7403_v56 = vpop.permute.xlu1 %746  ;;  %v7423_v15 = vcombine.low %v2421_v14, %v2469_v60  ;;  %v11263_v60 = vld [vmem:[#allocation65_spill] sm:$0xff]  ;;  %v7443_v14 = vcombine.high %v7418_v25, %v11245_v46  ;;  %11265 = vst [vmem:[#allocation95_spill] sm:$0xff] %v7447_v49 }
 0x181   : > { %2477 = vrot.lane.b32.xlu0 %v11258_v18, %s6244_s22  ;;  %v7435_v7 = vcombine.low %v3896_v8, %v3944_v12  ;;  %v11266_v8 = vld [vmem:[#allocation6_spill] sm:$0xff]  ;;  %11268 = vst [vmem:[#allocation96_spill] sm:$0xff] %v7458_v62  ;;  %v2445_v4 = vpack.i.b16 %v7447_v49, %v7458_v62  ;;  %v3892_v62 = vshrl.u32 %v7341_v3, 16 }
 0x182   : > { %2483 = vrot.lane.b32.xlu1 %v11259_v33, %s6244_s22  ;;  %11260 = vst [vmem:[#allocation34_spill] sm:$0xff] %v7423_v15  ;;  %11264 = vst [vmem:[#allocation94_spill] sm:$0xff] %v7443_v14  ;;  %v2397_v23 = vpack.i.b16 %v7443_v14, %v7454_v39 }
 0x183   : > { %v7427_v51 = vpop.permute.xlu0 %748  ;;  %11261 = vst [vmem:[#allocation33_spill] sm:$0xff] %v7435_v7  ;;  %11267 = vst [vmem:[#allocation6_spill] sm:$0xff] %v7454_v39 }
 0x184   : > { %v751_v18 = vpop.permute.xlu1 %750  ;;  %v7486_v14 = vcombine.low %v2397_v23, %v2445_v4  ;;  %v11278_v23 = vld [vmem:[#allocation60_spill] sm:$0xff] }
 0x185   : > { %2481 = vrot.lane.b32.xlu0 %v11262_v36, %s6244_s22  ;;  %v828_v12 = vcombine.low %v11266_v8, %v751_v18  ;;  %v11270_v36 = vld [vmem:[#allocation7_spill] sm:$0xff]  ;;  %v2465_v18 = vshrl.u32 %v7329_v41, 16 }
 0x186   : > { %2487 = vrot.lane.b32.xlu1 %v11263_v60, %s6244_s22  ;;  %v7460_v60 = vpack.i.b16 %v2417_v42, %v2416_v10  ;;  %v11272_v8 = vld [vmem:[#allocation59_spill] sm:$0xff]  ;;  %v11274_v42 = vcombine.low %v6973_v27, %v6976_v28  ;;  %11276 = vst [vmem:[#allocation100_spill] sm:$0xff] %v7486_v14 }
 0x187   : > { %v753_v7 = vpop.permute.xlu0 %752  ;;  %v7474_v10 = vrot.slane %v828_v12, %v6494_v13  ;;  %v3939_v12 = vshrl.u32 %v7350_v58, 16  ;;  %v11277_v27 = vld [vmem:[#allocation23_spill] sm:$0xff] }
 0x188   : > { %v755_v15 = vpop.permute.xlu1 %754  ;;  %11269 = vst [vmem:[#allocation97_spill] sm:$0xff] %v7460_v60  ;;  %v964_v33 = vcombine.low %v11270_v36, %v753_v7  ;;  %v7480_v36 = vrot.slane %v11274_v42, %v7293_v52  ;;  %v2392_v42 = vshrl.u32 %v7430_v29, 16 }
 0x189   : > { %2485 = vrot.lane.b32.xlu0 %v11271_v37, %s6244_s22  ;;  %11273 = vst [vmem:[#allocation98_spill] sm:$0xff] %v7474_v10  ;;  %v7482_v37 = vpack.i.b16 %v2465_v18, %v2464_v35  ;;  %v862_v63 = vcombine.low %v7323_v30, %v755_v15  ;;  %v3940_v35 = vshrl.u32 %v7355_v50, 16 }
 0x18a   : > { %2491 = vrot.lane.b32.xlu1 %v11272_v8, %s6244_s22  ;;  %v3891_v8 = vshrl.u32 %v7338_v1, 16  ;;  %v971_v49 = vrot.slane %v964_v33, %v6494_v13  ;;  %v2415_v33 = vpack.i.b16 %v7315_v21, %v7312_v44  ;;  %v2440_v44 = vshrl.u32 %v7433_v59, 16 }
 0x18b   : > { %v757_v7 = vpop.permute.xlu0 %756  ;;  %11275 = vst [vmem:[#allocation99_spill] sm:$0xff] %v7482_v37  ;;  %v7509_v18 = vpack.i.b16 %v3940_v35, %v3939_v12  ;;  %v2441_v21 = vshrl.u32 %v7421_v16, 16  ;;  %v11283_v12 = vld [vmem:[#allocation28_spill] sm:$0xff] }
 0x18c   : > { %v759_v39 = vpop.permute.xlu1 %758  ;;  %v998_v15 = vcombine.low %v7352_v11, %v757_v7  ;;  %v7500_v4 = vpack.i.b16 %v3892_v62, %v3891_v8  ;;  %v2393_v11 = vshrl.u32 %v7418_v25, 16 }
 0x18d   : > { %v836_v34 = vcombine.low %v7365_v32, %v759_v39  ;;  %2489 = vrot.lane.b32.xlu0 %v11277_v27, %s6244_s22  ;;  %v2463_v39 = vpack.i.b16 %v7329_v41, %v7326_v26  ;;  %11281 = vst [vmem:[#allocation101_spill] sm:$0xff] %v7509_v18 }
 0x18e   : > { %2495 = vrot.lane.b32.xlu1 %v11278_v23, %s6244_s22  ;;  %11279 = vst [vmem:[#allocation23_spill] sm:$0xff] %v7500_v4 }
 0x18f   : > { %v7507_v32 = vrot.slane %v836_v34, %v6494_v13  ;;  %v761_v30 = vpop.permute.xlu0 %760  ;;  %v7514_v8 = vcombine.low %v2415_v33, %v2463_v39  ;;  %v11284_v33 = vld [vmem:[#allocation64_spill] sm:$0xff]  ;;  %v7530_v39 = vpack.i.b16 %v2393_v11, %v2392_v42  ;;  %v3890_v34 = vpack.i.b16 %v7341_v3, %v7338_v1 }
 0x190   : > { %v972_v7 = vcombine.low %v7399_v47, %v761_v30  ;;  %v763_v62 = vpop.permute.xlu1 %762  ;;  %v7532_v30 = vpack.i.b16 %v2441_v21, %v2440_v44  ;;  %v3938_v42 = vpack.i.b16 %v7355_v50, %v7350_v58  ;;  %v11290_v58 = vld [vmem:[#allocation30_spill] sm:$0xff]  ;;  %v11291_v50 = vcombine.low %v7111_v31, %v7117_v43 }
 0x191   : > { %11280 = vst [vmem:[#allocation60_spill] sm:$0xff] %v7507_v32  ;;  %11282 = vst [vmem:[#allocation102_spill] sm:$0xff] %v7514_v8  ;;  %v845_v26 = vcombine.high %v7474_v10, %v7507_v32  ;;  %v870_v41 = vcombine.low %v7403_v56, %v763_v62  ;;  %2493 = vrot.lane.b32.xlu0 %v11283_v12, %s6244_s22  ;;  %v7537_v56 = vrot.slane %v862_v63, %v6494_v13 }
 0x192   : > { %v979_v35 = vrot.slane %v972_v7, %v6494_v13  ;;  %2499 = vrot.lane.b32.xlu1 %v11284_v33, %s6244_s22  ;;  %11285 = vst [vmem:[#allocation28_spill] sm:$0xff] %v7530_v39  ;;  %11286 = vst [vmem:[#allocation103_spill] sm:$0xff] %v7532_v30  ;;  %v11289_v7 = vcombine.low %v6987_v19, %v6990_v53  ;;  %v11293_v31 = vcombine.low %v7114_v2, %v7125_v57 }
 0x193   : > { %11287 = vst [vmem:[#allocation104_spill] sm:$0xff] %v7537_v56  ;;  %v7540_v62 = vrot.slane %v870_v41, %v6494_v13  ;;  %v765_v28 = vpop.permute.xlu0 %764  ;;  %v7556_v21 = vrot.slane %v845_v26, %v7293_v52  ;;  %v11296_v63 = vcombine.low %v7204_v9, %v7207_v48  ;;  %v11297_v2 = vcombine.low %v7304_v38, %v7307_v45 }
 0x194   : > { %v7546_v47 = vrot.slane %v11289_v7, %v7293_v52  ;;  %v980_v11 = vcombine.low %v971_v49, %v979_v35  ;;  %v981_v44 = vcombine.high %v971_v49, %v979_v35  ;;  %v1006_v1 = vcombine.low %v7427_v51, %v765_v28  ;;  %v7551_v3 = vpop.permute.xlu1 %766  ;;  %v11292_v35 = vld [vmem:[#allocation66_spill] sm:$0xff] }
 0x195   : > { %11288 = vst [vmem:[#allocation105_spill] sm:$0xff] %v7540_v62  ;;  %v879_v53 = vcombine.high %v7537_v56, %v7540_v62  ;;  %2497 = vrot.lane.b32.xlu0 %v11290_v58, %s6244_s22  ;;  %v7568_v51 = vrot.slane %v11291_v50, %v7293_v52  ;;  %v1005_v49 = vrot.slane %v998_v15, %v6494_v13  ;;  %v1115_v48 = vshrl.u32 %v7556_v21, 16 }
 0x196   : > { %v7572_v28 = vrot.slane %v980_v11, %v7293_v52  ;;  %v7575_v26 = vrot.slane %v981_v44, %v7293_v52  ;;  %v1013_v41 = vrot.slane %v1006_v1, %v6494_v13  ;;  %2503 = vrot.lane.b32.xlu1 %v11292_v35, %s6244_s22  ;;  %v7589_v43 = vrot.slane %v11293_v31, %v7293_v52 }
 0x197   : > { %v7581_v7 = vrot.slane %v879_v53, %v7293_v52  ;;  %v7583_v19 = vpop.permute.xlu0 %768  ;;  %v11294_v15 = vcombine.low %v7177_v40, %v7180_v17  ;;  %v7597_v44 = vcombine.low %v3890_v34, %v3938_v42  ;;  %v7605_v32 = vrot.slane %v11296_v63, %v7293_v52  ;;  %v11300_v34 = vld [vmem:[#allocation37_spill] sm:$0xff] }
 0x198   : > { %v1014_v1 = vcombine.low %v1005_v49, %v1013_v41  ;;  %v1015_v50 = vcombine.high %v1005_v49, %v1013_v41  ;;  %v7599_v53 = vpop.permute.xlu1 %770  ;;  %v7611_v57 = vrot.slane %v11297_v2, %v7293_v52  ;;  %v7615_v17 = vcombine.high %v7556_v21, %v11245_v46 }
 0x199   : > { %v7595_v11 = vrot.slane %v11294_v15, %v7293_v52  ;;  %11295 = vst [vmem:[#allocation106_spill] sm:$0xff] %v7597_v44  ;;  %v7619_v40 = vcombine.high %v7581_v7, %v11245_v46  ;;  %2501 = vrot.lane.b32.xlu0 %v11300_v34, %s6244_s22  ;;  %v1116_v9 = vshrl.u32 %v7581_v7, 16  ;;  %v7627_v38 = vcombine.high %v7572_v28, %v11245_v46 }
 0x19a   : > { %11298 = vst [vmem:[#allocation107_spill] sm:$0xff] %v7615_v17  ;;  %v7631_v45 = vcombine.high %v7575_v26, %v11245_v46  ;;  %v7634_v42 = vrot.slane %v1014_v1, %v7293_v52  ;;  %v7637_v63 = vrot.slane %v1015_v50, %v7293_v52  ;;  %2507 = vrot.lane.b32.xlu1 %v7048_v24, %s6244_s22  ;;  %v1139_v41 = vshrl.u32 %v7575_v26, 16 }
 0x19b   : > { %11299 = vst [vmem:[#allocation108_spill] sm:$0xff] %v7619_v40  ;;  %v7641_v49 = vpop.permute.xlu0 %772  ;;  %v7646_v15 = vpack.i.b16 %v1116_v9, %v1115_v48  ;;  %v2273_v2 = vcombine.high %v7480_v36, %v11245_v46  ;;  %v11304_v48 = vld [vmem:[#allocation54_spill] sm:$0xff]  ;;  %v11305_v9 = vcombine.low %v7318_v55, %v7321_v20  ;;  %v2307_v44 = vcombine.high %v7546_v47, %v11245_v46 }
 0x19c   : > { %11301 = vst [vmem:[#allocation109_spill] sm:$0xff] %v7631_v45  ;;  %v7652_v1 = vcombine.high %v7634_v42, %v11245_v46  ;;  %v7656_v50 = vcombine.high %v7637_v63, %v11245_v46  ;;  %v7658_v10 = vpop.permute.xlu1 %774  ;;  %v1140_v62 = vshrl.u32 %v7637_v63, 16  ;;  %v2341_v30 = vcombine.high %v7568_v51, %v11245_v46 }
 0x19d   : > { %11302 = vst [vmem:[#allocation110_spill] sm:$0xff] %v7646_v15  ;;  %2505 = vrot.lane.b32.xlu0 %v11304_v48, %s6244_s22  ;;  %v7669_v56 = vrot.slane %v11305_v9, %v7293_v52  ;;  %v2375_v39 = vcombine.high %v7589_v43, %v11245_v46  ;;  %v1133_v55 = vshrl.u32 %v7627_v38, 16  ;;  %v2410_v18 = vshrl.u32 %v2273_v2, 16 }
 0x19e   : > { %11303 = vst [vmem:[#allocation111_spill] sm:$0xff] %v7656_v50  ;;  %2511 = vrot.lane.b32.xlu1 %v7053_v22, %s6244_s22  ;;  %v7681_v8 = vpack.i.b16 %v1140_v62, %v1139_v41  ;;  %v1134_v20 = vshrl.u32 %v7652_v1, 16  ;;  %v2411_v4 = vshrl.u32 %v2307_v44, 16  ;;  %v2458_v14 = vshrl.u32 %v2341_v30, 16  ;;  %v11308_v62 = vld [vmem:[#allocation55_spill] sm:$0xff] }
 0x19f   : > { %v7685_v9 = vpop.permute.xlu0 %776  ;;  %v2459_v37 = vshrl.u32 %v2375_v39, 16  ;;  %v2391_v35 = vpack.i.b16 %v7418_v25, %v7430_v29  ;;  %v3782_v22 = vcombine.high %v7605_v32, %v11245_v46  ;;  %v3850_v25 = vcombine.high %v7669_v56, %v11245_v46  ;;  %v11313_v29 = vld [vmem:[#allocation56_spill] sm:$0xff] }
 0x1a0   : > { %11306 = vst [vmem:[#allocation112_spill] sm:$0xff] %v7681_v8  ;;  %v7687_v60 = vpop.permute.xlu1 %778  ;;  %v7689_v24 = vpack.i.b16 %v1134_v20, %v1133_v55  ;;  %v7695_v41 = vpack.i.b16 %v2411_v4, %v2410_v18  ;;  %v2439_v55 = vpack.i.b16 %v7421_v16, %v7433_v59  ;;  %v3748_v20 = vcombine.high %v7595_v11, %v11245_v46  ;;  %v11315_v59 = vld [vmem:[#allocation76_spill] sm:$0xff] }
 0x1a1   : > { %2509 = vrot.lane.b32.xlu0 %v11308_v62, %s6244_s22  ;;  %v7697_v31 = vpack.i.b16 %v2459_v37, %v2458_v14  ;;  %v3816_v4 = vcombine.high %v7611_v57, %v11245_v46  ;;  %v11312_v48 = vcombine.low %v11257_v61, %v11256_v5  ;;  %v2457_v34 = vpack.i.b16 %v2375_v39, %v2341_v30  ;;  %v11317_v61 = vld [vmem:[#allocation68_spill] sm:$0xff]  ;;  %v11321_v39 = vld [vmem:[#allocation70_spill] sm:$0xff] }
 0x1a2   : > { %11307 = vst [vmem:[#allocation113_spill] sm:$0xff] %v7689_v24  ;;  %11309 = vst [vmem:[#allocation114_spill] sm:$0xff] %v7695_v41  ;;  %2515 = vrot.lane.b32.xlu1 %v7073_v0, %s6244_s22  ;;  %v7719_v14 = vcombine.low %v2391_v35, %v2439_v55  ;;  %v3885_v18 = vshrl.u32 %v3748_v20, 16  ;;  %v3886_v0 = vshrl.u32 %v3782_v22, 16  ;;  %v2409_v41 = vpack.i.b16 %v2307_v44, %v2273_v2  ;;  %v11322_v30 = vld [vmem:[#allocation80_spill] sm:$0xff] }
 0x1a3   : > { %11310 = vst [vmem:[#allocation115_spill] sm:$0xff] %v7697_v31  ;;  %v7711_v37 = vpop.permute.xlu0 %780  ;;  %v3933_v62 = vshrl.u32 %v3816_v4, 16  ;;  %v7725_v33 = vrot.slane %v11312_v48, %v7293_v52  ;;  %v3934_v31 = vshrl.u32 %v3850_v25, 16  ;;  %v11314_v35 = vcombine.low %v11253_v6, %v11252_v54 }
 0x1a4   : > { %v783_v16 = vpop.permute.xlu1 %782  ;;  %11311 = vst [vmem:[#allocation116_spill] sm:$0xff] %v7719_v14  ;;  %v11316_v14 = vld [vmem:[#allocation69_spill] sm:$0xff]  ;;  %v7743_v58 = vpack.i.b16 %v3886_v0, %v3885_v18  ;;  %v11323_v44 = vcombine.low %v11321_v39, %v11322_v30  ;;  %v7753_v54 = vcombine.low %v2409_v41, %v2457_v34  ;;  %v3884_v39 = vpack.i.b16 %v3782_v22, %v3748_v20  ;;  %v11329_v30 = vld [vmem:[#allocation58_spill] sm:$0xff] }
 0x1a5   : > { %2513 = vrot.lane.b32.xlu0 %v11313_v29, %s6244_s22  ;;  %v7733_v55 = vrot.slane %v11314_v35, %v7293_v52  ;;  %v11318_v5 = vcombine.low %v11316_v14, %v11317_v61  ;;  %v7751_v6 = vpack.i.b16 %v3934_v31, %v3933_v62  ;;  %v7761_v0 = vcombine.high %v7725_v33, %v11245_v46  ;;  %v11328_v31 = vld [vmem:[#allocation71_spill] sm:$0xff] }
 0x1a6   : > { %2519 = vrot.lane.b32.xlu1 %v11315_v59, %s6244_s22  ;;  %11320 = vst [vmem:[#allocation68_spill] sm:$0xff] %v7743_v58  ;;  %v7749_v2 = vrot.slane %v11323_v44, %v7293_v52  ;;  %11326 = vst [vmem:[#allocation117_spill] sm:$0xff] %v7753_v54  ;;  %v11327_v59 = vld [vmem:[#allocation57_spill] sm:$0xff]  ;;  %v896_v18 = vcombine.low %v7551_v3, %v783_v16  ;;  %v3932_v54 = vpack.i.b16 %v3850_v25, %v3816_v4  ;;  %v11331_v58 = vld [vmem:[#allocation74_spill] sm:$0xff] }
 0x1a7   : > { %v7741_v48 = vrot.slane %v11318_v5, %v7293_v52  ;;  %v785_v29 = vpop.permute.xlu0 %784  ;;  %11325 = vst [vmem:[#allocation80_spill] sm:$0xff] %v7751_v6  ;;  %v7769_v34 = vcombine.high %v7733_v55, %v11245_v46  ;;  %v1128_v4 = vshrl.u32 %v7634_v42, 16 }
 0x1a8   : > { %11324 = vst [vmem:[#allocation70_spill] sm:$0xff] %v7749_v2  ;;  %v787_v35 = vpop.permute.xlu1 %786  ;;  %v1032_v61 = vcombine.low %v7583_v19, %v785_v29  ;;  %v7777_v5 = vcombine.high %v7749_v2, %v11245_v46  ;;  %v2386_v19 = vshrl.u32 %v7761_v0, 16  ;;  %v7787_v6 = vrot.slane %v896_v18, %v6494_v13 }
 0x1a9   : > { %11319 = vst [vmem:[#allocation69_spill] sm:$0xff] %v7741_v48  ;;  %2517 = vrot.lane.b32.xlu0 %v11327_v59, %s6244_s22  ;;  %v7773_v62 = vcombine.high %v7741_v48, %v11245_v46  ;;  %v2387_v29 = vshrl.u32 %v7769_v34, 16  ;;  %v930_v20 = vcombine.low %v7599_v53, %v787_v35  ;;  %v7800_v59 = vcombine.low %v3884_v39, %v3932_v54  ;;  %v11336_v39 = vld [vmem:[#allocation67_spill] sm:$0xff] }
 0x1aa   : > { %2523 = vrot.lane.b32.xlu1 %v11328_v31, %s6244_s22  ;;  %v2435_v14 = vshrl.u32 %v7777_v5, 16  ;;  %11330 = vst [vmem:[#allocation118_spill] sm:$0xff] %v7787_v6  ;;  %v1039_v22 = vrot.slane %v1032_v61, %v6494_v13  ;;  %v1127_v53 = vshrl.u32 %v7572_v28, 16  ;;  %v2404_v35 = vshrl.u32 %v7480_v36, 16 }
 0x1ab   : > { %v789_v41 = vpop.permute.xlu0 %788  ;;  %v2434_v44 = vshrl.u32 %v7773_v62, 16  ;;  %v7793_v31 = vpack.i.b16 %v2387_v29, %v2386_v19  ;;  %11335 = vst [vmem:[#allocation122_spill] sm:$0xff] %v7800_v59  ;;  %v2405_v61 = vshrl.u32 %v7546_v47, 16  ;;  %v7825_v59 = vrot.slane %v930_v20, %v6494_v13  ;;  %v11342_v20 = vld [vmem:[#allocation62_spill] sm:$0xff] }
 0x1ac   : > { %v791_v3 = vpop.permute.xlu1 %790  ;;  %v1066_v29 = vcombine.low %v7641_v49, %v789_v41  ;;  %v11352_v48 = vpack.i.b16 %v7619_v40, %v7615_v17 }
 0x1ad   : > { %v904_v16 = vcombine.low %v7658_v10, %v791_v3  ;;  %2521 = vrot.lane.b32.xlu0 %v11329_v30, %s6244_s22  ;;  %11332 = vst [vmem:[#allocation119_spill] sm:$0xff] %v7793_v31  ;;  %v7798_v30 = vpack.i.b16 %v2435_v14, %v2434_v44  ;;  %v11337_v44 = vld [vmem:[#allocation77_spill] sm:$0xff]  ;;  %v7822_v19 = vpack.i.b16 %v2405_v61, %v2404_v35  ;;  %11340 = vst [vmem:[#allocation125_spill] sm:$0xff] %v7825_v59 }
 0x1ae   : > { %2527 = vrot.lane.b32.xlu1 %v11331_v58, %s6244_s22  ;;  %v1073_v35 = vrot.slane %v1066_v29, %v6494_v13 }
 0x1af   : > { %v7796_v10 = vrot.slane %v904_v16, %v6494_v13  ;;  %v793_v3 = vpop.permute.xlu0 %792  ;;  %11334 = vst [vmem:[#allocation121_spill] sm:$0xff] %v7798_v30  ;;  %11339 = vst [vmem:[#allocation124_spill] sm:$0xff] %v7822_v19  ;;  %v11376_v19 = vld [vmem:[#allocation59_spill] sm:$0xff] }
 0x1b0   : > { %v1040_v25 = vcombine.low %v7685_v9, %v793_v3  ;;  %v795_v18 = vpop.permute.xlu1 %794  ;;  %v7820_v3 = vpack.i.b16 %v1128_v4, %v1127_v53  ;;  %v11401_v17 = vld [vmem:[#allocation69_spill] sm:$0xff] }
 0x1b1   : > { %11333 = vst [vmem:[#allocation120_spill] sm:$0xff] %v7796_v10  ;;  %v913_v14 = vcombine.high %v7787_v6, %v7796_v10  ;;  %v938_v54 = vcombine.low %v7687_v60, %v795_v18  ;;  %2525 = vrot.lane.b32.xlu0 %v11336_v39, %s6244_s22  ;;  %v2428_v40 = vshrl.u32 %v11401_v17, 16 }
 0x1b2   : > { %v1047_v16 = vrot.slane %v1040_v25, %v6494_v13  ;;  %2531 = vrot.lane.b32.xlu1 %v11337_v44, %s6244_s22  ;;  %11338 = vst [vmem:[#allocation123_spill] sm:$0xff] %v7820_v3 }
 0x1b3   : > { %v7828_v60 = vrot.slane %v938_v54, %v6494_v13  ;;  %v797_v18 = vpop.permute.xlu0 %796  ;;  %v927_v25 = vrot.slane %v913_v14, %v7293_v52  ;;  %v11343_v14 = vld [vmem:[#allocation25_spill] sm:$0xff] }
 0x1b4   : > { %v1048_v10 = vcombine.low %v1039_v22, %v1047_v16  ;;  %v1049_v9 = vcombine.high %v1039_v22, %v1047_v16  ;;  %v1074_v49 = vcombine.low %v7711_v37, %v797_v18  ;;  %v7831_v41 = vpop.permute.xlu1 %1196 }
 0x1b5   : > { %11341 = vst [vmem:[#allocation126_spill] sm:$0xff] %v7828_v60  ;;  %v947_v53 = vcombine.high %v7825_v59, %v7828_v60  ;;  %2529 = vrot.lane.b32.xlu0 %v11342_v20, %s6244_s22  ;;  %v7854_v29 = vcombine.high %v927_v25, %v11245_v46  ;;  %v11348_v60 = vld [vmem:[#allocation5_spill] sm:$0xff] }
 0x1b6   : > { %v7842_v61 = vrot.slane %v1048_v10, %v7293_v52  ;;  %v1063_v37 = vrot.slane %v1049_v9, %v7293_v52  ;;  %v1081_v22 = vrot.slane %v1074_v49, %v6494_v13  ;;  %2535 = vrot.lane.b32.xlu1 %v11343_v14, %s6244_s22  ;;  %v11346_v9 = vld [vmem:[#allocation78_spill] sm:$0xff]  ;;  %v1163_v49 = vshrl.u32 %v927_v25, 16 }
 0x1b7   : > { %v961_v54 = vrot.slane %v947_v53, %v7293_v52  ;;  %v7849_v16 = vpop.permute.xlu0 %1198  ;;  %11344 = vst [vmem:[#allocation127_spill] sm:$0xff] %v7854_v29 }
 0x1b8   : > { %v1082_v18 = vcombine.low %v1073_v35, %v1081_v22  ;;  %v1083_v4 = vcombine.high %v1073_v35, %v1081_v22  ;;  %v7851_v30 = vpop.permute.xlu1 %1200  ;;  %v1064_v53 = vcombine.high %v7842_v61, %v11245_v46  ;;  %v7864_v6 = vcombine.high %v1063_v37, %v11245_v46 }
 0x1b9   : > { %v7857_v10 = vcombine.high %v961_v54, %v11245_v46  ;;  %2533 = vrot.lane.b32.xlu0 %v11346_v9, %s6244_s22  ;;  %v1164_v31 = vshrl.u32 %v961_v54, 16  ;;  %v1187_v14 = vshrl.u32 %v1063_v37, 16  ;;  %v1162_v58 = vpack.i.b16 %v961_v54, %v927_v25 }
 0x1ba   : > { %11347 = vst [vmem:[#allocation129_spill] sm:$0xff] %v7864_v6  ;;  %v7867_v35 = vrot.slane %v1082_v18, %v7293_v52  ;;  %v1097_v22 = vrot.slane %v1083_v4, %v7293_v52  ;;  %2939 = vrot.lane.b32.xlu1 %v11348_v60, %s6245_s23  ;;  %v11351_v60 = vld [vmem:[#allocation4_spill] sm:$0xff]  ;;  %v11354_v25 = vpack.i.b16 %v7581_v7, %v7556_v21 }
 0x1bb   : > { %11345 = vst [vmem:[#allocation128_spill] sm:$0xff] %v7857_v10  ;;  %v7872_v59 = vpop.permute.xlu0 %1202  ;;  %v1168_v44 = vpack.i.b16 %v7857_v10, %v7854_v29  ;;  %v7876_v9 = vpack.i.b16 %v1164_v31, %v1163_v49  ;;  %v2452_v49 = vshrl.u32 %v7568_v51, 16  ;;  %v2453_v31 = vshrl.u32 %v7589_v43, 16  ;;  %v11402_v10 = vld [vmem:[#allocation70_spill] sm:$0xff] }
 0x1bc   : > { %v1098_v20 = vcombine.high %v7867_v35, %v11245_v46  ;;  %v7881_v18 = vcombine.high %v1097_v22, %v11245_v46  ;;  %v7883_v39 = vpop.permute.xlu1 %1204  ;;  %v1188_v4 = vshrl.u32 %v1097_v22, 16  ;;  %v1186_v2 = vpack.i.b16 %v1097_v22, %v1063_v37  ;;  %v11356_v37 = vld [vmem:[#allocation61_spill] sm:$0xff] }
 0x1bd   : > { %11349 = vst [vmem:[#allocation5_spill] sm:$0xff] %v7876_v9  ;;  %2937 = vrot.lane.b32.xlu0 %v11351_v60, %s6245_s23  ;;  %v7890_v29 = vcombine.low %v11352_v48, %v1168_v44  ;;  %v7897_v54 = vcombine.low %v11354_v25, %v1162_v58  ;;  %v11358_v48 = vpack.i.b16 %v7637_v63, %v7575_v26  ;;  %v1181_v58 = vshrl.u32 %v1064_v53, 16  ;;  %v11362_v26 = vld [vmem:[#allocation32_spill] sm:$0xff] }
 0x1be   : > { %11350 = vst [vmem:[#allocation130_spill] sm:$0xff] %v7881_v18  ;;  %2943 = vrot.lane.b32.xlu1 %v11356_v37, %s6245_s23  ;;  %v1192_v22 = vpack.i.b16 %v7881_v18, %v7864_v6  ;;  %v7904_v60 = vpack.i.b16 %v1188_v4, %v1187_v14  ;;  %v1182_v7 = vshrl.u32 %v1098_v20, 16  ;;  %v1180_v25 = vpack.i.b16 %v1098_v20, %v1064_v53  ;;  %v11366_v20 = vld [vmem:[#allocation63_spill] sm:$0xff] }
 0x1bf   : > { %11353 = vst [vmem:[#allocation4_spill] sm:$0xff] %v7890_v29  ;;  %11355 = vst [vmem:[#allocation131_spill] sm:$0xff] %v7897_v54  ;;  %v7909_v44 = vcombine.low %v11358_v48, %v1186_v2  ;;  %v7912_v21 = vpop.permute.xlu0 %1206  ;;  %v11360_v37 = vpack.i.b16 %v7656_v50, %v7631_v45  ;;  %v11364_v2 = vpack.i.b16 %v7652_v1, %v7627_v38  ;;  %v1175_v53 = vshrl.u32 %v7842_v61, 16  ;;  %v11369_v1 = vld [vmem:[#allocation27_spill] sm:$0xff]  ;;  %v11406_v45 = vld [vmem:[#allocation24_spill] sm:$0xff] }
 0x1c0   : > { %11357 = vst [vmem:[#allocation61_spill] sm:$0xff] %v7904_v60  ;;  %v1209_v54 = vpop.permute.xlu1 %1208  ;;  %v7923_v63 = vpack.i.b16 %v1182_v7, %v1181_v58  ;;  %v7934_v48 = vpack.i.b16 %v2453_v31, %v2452_v49  ;;  %v2433_v31 = vpack.i.b16 %v7777_v5, %v7773_v62  ;;  %v11370_v49 = vld [vmem:[#allocation65_spill] sm:$0xff]  ;;  %v3928_v62 = vshrl.u32 %v7669_v56, 16  ;;  %v11405_v50 = vld [vmem:[#allocation43_spill] sm:$0xff] }
 0x1c1   : > { %11359 = vst [vmem:[#allocation132_spill] sm:$0xff] %v7909_v44  ;;  %v7917_v9 = vcombine.low %v11360_v37, %v1192_v22  ;;  %2941 = vrot.lane.b32.xlu0 %v11362_v26, %s6245_s23  ;;  %v7928_v4 = vcombine.low %v11364_v2, %v1180_v25  ;;  %v1176_v22 = vshrl.u32 %v7867_v35, 16  ;;  %v2385_v25 = vpack.i.b16 %v7769_v34, %v7761_v0  ;;  %v11375_v2 = vld [vmem:[#allocation9_spill] sm:$0xff] }
 0x1c2   : > { %11363 = vst [vmem:[#allocation32_spill] sm:$0xff] %v7923_v63  ;;  %2947 = vrot.lane.b32.xlu1 %v11366_v20, %s6245_s23  ;;  %11367 = vst [vmem:[#allocation63_spill] sm:$0xff] %v7934_v48  ;;  %v3879_v20 = vshrl.u32 %v7595_v11, 16  ;;  %v3927_v0 = vshrl.u32 %v7611_v57, 16  ;;  %v11396_v63 = vld [vmem:[#allocation7_spill] sm:$0xff]  ;;  %v2429_v6 = vshrl.u32 %v11402_v10, 16  ;;  %v3878_v18 = vpack.i.b16 %v7605_v32, %v7595_v11 }
 0x1c3   : > { %11361 = vst [vmem:[#allocation133_spill] sm:$0xff] %v7917_v9  ;;  %11365 = vst [vmem:[#allocation134_spill] sm:$0xff] %v7928_v4  ;;  %v1211_v37 = vpop.permute.xlu0 %1210  ;;  %v7938_v7 = vpack.i.b16 %v1176_v22, %v1175_v53  ;;  %v3880_v53 = vshrl.u32 %v7605_v32, 16  ;;  %v11371_v22 = vld [vmem:[#allocation8_spill] sm:$0xff]  ;;  %v3926_v32 = vpack.i.b16 %v7669_v56, %v7611_v57  ;;  %v11412_v57 = vld [vmem:[#allocation46_spill] sm:$0xff] }
 0x1c4   : > { %v1213_v58 = vpop.permute.xlu1 %1212  ;;  %v1286_v38 = vcombine.low %v11371_v22, %v1209_v54  ;;  %v1422_v48 = vcombine.low %v11375_v2, %v1211_v37  ;;  %v7967_v54 = vpack.i.b16 %v3928_v62, %v3927_v0 }
 0x1c5   : > { %11368 = vst [vmem:[#allocation135_spill] sm:$0xff] %v7938_v7  ;;  %2945 = vrot.lane.b32.xlu0 %v11369_v1, %s6245_s23  ;;  %v7955_v1 = vcombine.low %v2385_v25, %v2433_v31  ;;  %v7958_v14 = vpack.i.b16 %v3880_v53, %v3879_v20  ;;  %v2403_v31 = vpack.i.b16 %v7546_v47, %v7480_v36  ;;  %v11391_v7 = vld [vmem:[#allocation22_spill] sm:$0xff] }
 0x1c6   : > { %2951 = vrot.lane.b32.xlu1 %v11370_v49, %s6245_s23  ;;  %v11374_v49 = vld [vmem:[#allocation36_spill] sm:$0xff]  ;;  %11377 = vst [vmem:[#allocation8_spill] sm:$0xff] %v7967_v54  ;;  %v7974_v20 = vrot.slane %v1286_v38, %v6494_v13 }
 0x1c7   : > { %v1215_v26 = vpop.permute.xlu0 %1214  ;;  %11372 = vst [vmem:[#allocation27_spill] sm:$0xff] %v7955_v1  ;;  %11373 = vst [vmem:[#allocation65_spill] sm:$0xff] %v7958_v14  ;;  %v11390_v14 = vld [vmem:[#allocation19_spill] sm:$0xff] }
 0x1c8   : > { %v1217_v34 = vpop.permute.xlu1 %1216  ;;  %11378 = vst [vmem:[#allocation36_spill] sm:$0xff] %v7974_v20  ;;  %v514_v1 = vcombine.low %v11375_v2, %v11390_v14 }
 0x1c9   : > { %v1294_v5 = vcombine.low %v7851_v30, %v1217_v34  ;;  %2949 = vrot.lane.b32.xlu0 %v11374_v49, %s6245_s23  ;;  %v1320_v30 = vcombine.low %v7831_v41, %v1213_v58  ;;  %v1429_v58 = vrot.slane %v1422_v48, %v6494_v13  ;;  %v11392_v34 = vld [vmem:[#allocation10_spill] sm:$0xff] }
 0x1ca   : > { %2955 = vrot.lane.b32.xlu1 %v11376_v19, %s6245_s23  ;;  %v2451_v19 = vpack.i.b16 %v7589_v43, %v7568_v51  ;;  %v1456_v51 = vcombine.low %v7849_v16, %v1215_v26  ;;  %v8008_v16 = vld [vmem:[#allocation2] sm:$0xe]  ;;  %v548_v3 = vcombine.low %v11392_v34, %v11391_v7 }
 0x1cb   : > { %v7978_v53 = vrot.slane %v1294_v5, %v6494_v13  ;;  %v1219_v37 = vpop.permute.xlu0 %1218  ;;  %v8000_v38 = vrot.slane %v1320_v30, %v6494_v13 }
 0x1cc   : > { %v1430_v22 = vcombine.low %v7872_v59, %v1219_v37  ;;  %v1221_v0 = vpop.permute.xlu1 %1220  ;;  %v7997_v59 = vcombine.low %v2403_v31, %v2451_v19  ;;  %v1463_v30 = vrot.slane %v1456_v51, %v6494_v13 }
 0x1cd   : > { %11379 = vst [vmem:[#allocation9_spill] sm:$0xff] %v7978_v53  ;;  %v1303_v47 = vcombine.high %v7974_v20, %v7978_v53  ;;  %v1328_v41 = vcombine.low %v7883_v39, %v1221_v0  ;;  %2953 = vrot.lane.b32.xlu0 %v11277_v27, %s6245_s23  ;;  %11381 = vst [vmem:[#allocation136_spill] sm:$0xff] %v8000_v38  ;;  %v2380_v53 = vshrl.u32 %v7725_v33, 16 }
 0x1ce   : > { %v1437_v43 = vrot.slane %v1430_v22, %v6494_v13  ;;  %2959 = vrot.lane.b32.xlu1 %v11278_v23, %s6245_s23  ;;  %11380 = vst [vmem:[#allocation59_spill] sm:$0xff] %v7997_v59 }
 0x1cf   : > { %v8003_v62 = vrot.slane %v1328_v41, %v6494_v13  ;;  %v1223_v39 = vpop.permute.xlu0 %1222  ;;  %v8011_v26 = vrot.slane %v1303_v47, %v7293_v52 }
 0x1d0   : > { %v1438_v5 = vcombine.low %v1429_v58, %v1437_v43  ;;  %v1439_v27 = vcombine.high %v1429_v58, %v1437_v43  ;;  %v1464_v48 = vcombine.low %v7912_v21, %v1223_v39  ;;  %v8006_v49 = vpop.permute.xlu1 %1224  ;;  %v11385_v43 = vld [vmem:[#allocation30_spill] sm:$0xff] }
 0x1d1   : > { %11382 = vst [vmem:[#allocation137_spill] sm:$0xff] %v8003_v62  ;;  %v1337_v31 = vcombine.high %v8000_v38, %v8003_v62  ;;  %2957 = vrot.lane.b32.xlu0 %v11283_v12, %s6245_s23  ;;  %v8038_v58 = vcombine.high %v8011_v26, %v11245_v46  ;;  %v1573_v39 = vshrl.u32 %v8011_v26, 16  ;;  %v11395_v38 = vld [vmem:[#allocation15_spill] sm:$0xff] }
 0x1d2   : > { %v8021_v21 = vrot.slane %v1438_v5, %v7293_v52  ;;  %v8024_v37 = vrot.slane %v1439_v27, %v7293_v52  ;;  %v1471_v19 = vrot.slane %v1464_v48, %v6494_v13  ;;  %3403 = vrot.lane.b32.xlu1 %v8008_v16, %s6244_s22  ;;  %v540_v24 = vcombine.low %v11396_v63, %v11395_v38 }
 0x1d3   : > { %v8030_v22 = vrot.slane %v1337_v31, %v7293_v52  ;;  %v8032_v0 = vpop.permute.xlu0 %1226  ;;  %11383 = vst [vmem:[#allocation138_spill] sm:$0xff] %v8038_v58 }
 0x1d4   : > { %v1472_v47 = vcombine.low %v1463_v30, %v1471_v19  ;;  %v1473_v12 = vcombine.high %v1463_v30, %v1471_v19  ;;  %v8034_v41 = vpop.permute.xlu1 %1228  ;;  %v8050_v27 = vcombine.high %v8021_v21, %v11245_v46  ;;  %v8054_v48 = vcombine.high %v8024_v37, %v11245_v46 }
 0x1d5   : > { %v8042_v51 = vcombine.high %v8030_v22, %v11245_v46  ;;  %2961 = vrot.lane.b32.xlu0 %v11385_v43, %s6245_s23  ;;  %v1574_v5 = vshrl.u32 %v8030_v22, 16  ;;  %v1597_v43 = vshrl.u32 %v8024_v37, 16  ;;  %v1585_v15 = vshrl.u32 %v8021_v21, 16 }
 0x1d6   : > { %11386 = vst [vmem:[#allocation30_spill] sm:$0xff] %v8054_v48  ;;  %v8057_v31 = vrot.slane %v1472_v47, %v7293_v52  ;;  %v8060_v30 = vrot.slane %v1473_v12, %v7293_v52  ;;  %3407 = vrot.lane.b32.xlu1 %v8008_v16, %s6246_s24  ;;  %v1591_v23 = vshrl.u32 %v8050_v27, 16 }
 0x1d7   : > { %11384 = vst [vmem:[#allocation139_spill] sm:$0xff] %v8042_v51  ;;  %v8064_v19 = vpop.permute.xlu0 %1230  ;;  %v8069_v36 = vpack.i.b16 %v1574_v5, %v1573_v39  ;;  %v11451_v38 = vpack.i.b16 %v8042_v51, %v8038_v58 }
 0x1d8   : > { %v8075_v47 = vcombine.high %v8057_v31, %v11245_v46  ;;  %v8079_v12 = vcombine.high %v8060_v30, %v11245_v46  ;;  %v8081_v25 = vpop.permute.xlu1 %1232  ;;  %v1598_v59 = vshrl.u32 %v8060_v30, 16  ;;  %v1586_v44 = vshrl.u32 %v8057_v31, 16 }
 0x1d9   : > { %11387 = vst [vmem:[#allocation140_spill] sm:$0xff] %v8069_v36  ;;  %3405 = vrot.lane.b32.xlu0 %v8008_v16, %s6245_s23 }
 0x1da   : > { %11388 = vst [vmem:[#allocation141_spill] sm:$0xff] %v8079_v12  ;;  %3411 = vrot.lane.b32.xlu1 %v8008_v16, %s6248_s26  ;;  %v8092_v5 = vpack.i.b16 %v1598_v59, %v1597_v43  ;;  %v1592_v54 = vshrl.u32 %v8075_v47, 16  ;;  %v6233_v59 = vld [vmem:[#allocation2 + $0x4] sm:$0xf]  ;;  %v11394_v43 = vld [vmem:[#allocation12_spill] sm:$0xff]  ;;  %v8127_v60 = vpack.i.b16 %v1586_v44, %v1585_v15  ;;  %v574_v15 = vcombine.low %v11406_v45, %v11405_v50  ;;  %s6170_s26 = sshll.u32 %s11957_s16, 4 }
 0x1db   : > { %v8100_v4 = vpop.permute.xlu0 %1234  ;;  %v506_v62 = vcombine.low %v6233_v59, %v11394_v43  ;;  %v8123_v59 = vrot.slane %v548_v3, %v6494_v13  ;;  %v8139_v3 = vrot.slane %v540_v24, %v6494_v13  ;;  %v1174_v44 = vpack.i.b16 %v7867_v35, %v7842_v61  ;;  %v11413_v61 = vld [vmem:[#allocation29_spill] sm:$0xff]  ;;  %v11414_v35 = vld [vmem:[#allocation50_spill] sm:$0xff] }
 0x1dc   : > { %11389 = vst [vmem:[#allocation142_spill] sm:$0xff] %v8092_v5  ;;  %v8104_v20 = vpop.permute.xlu1 %1236  ;;  %v8106_v39 = vpack.i.b16 %v1592_v54, %v1591_v23  ;;  %v2381_v54 = vshrl.u32 %v7733_v55, 16  ;;  %v8120_v23 = vrot.slane %v514_v1, %v6494_v13  ;;  %11399 = vst [vmem:[#allocation145_spill] sm:$0xff] %v8127_v60  ;;  %v11408_v50 = vpack.i.b16 %v7634_v42, %v7572_v28  ;;  %v11504_v60 = vld [vmem:[#allocation16_spill] sm:$0xff]  ;;  %v11523_v5 = vld [vmem:[#allocation82_spill] sm:$0xff] }
 0x1dd   : > { %3409 = vrot.lane.b32.xlu0 %v8008_v16, %s6247_s25  ;;  %11398 = vst [vmem:[#allocation144_spill] sm:$0xff] %v8123_v59  ;;  %v8136_v1 = vrot.slane %v506_v62, %v6494_v13  ;;  %11404 = vst [vmem:[#allocation70_spill] sm:$0xff] %v8139_v3  ;;  %v556_v62 = vcombine.low %v8139_v3, %v8123_v59  ;;  %v8168_v56 = vrot.slane %v574_v15, %v6494_v13 }
 0x1de   : > { %11393 = vst [vmem:[#allocation143_spill] sm:$0xff] %v8106_v39  ;;  %3415 = vrot.lane.b32.xlu1 %v8008_v16, %s6250_s28  ;;  %11397 = vst [vmem:[#allocation7_spill] sm:$0xff] %v8120_v23  ;;  %v8129_v9 = vpack.i.b16 %v2381_v54, %v2380_v53  ;;  %v8149_v53 = vpack.i.b16 %v2429_v6, %v2428_v40  ;;  %v8161_v14 = vcombine.low %v11408_v50, %v1174_v44  ;;  %v11416_v50 = vld [vmem:[#allocation53_spill] sm:$0xff] }
 0x1df   : > { %v8125_v29 = vpop.permute.xlu0 %1238  ;;  %11403 = vst [vmem:[#allocation69_spill] sm:$0xff] %v8136_v1  ;;  %v522_v24 = vcombine.low %v8136_v1, %v8120_v23  ;;  %v8165_v6 = vcombine.low %v3878_v18, %v3926_v32  ;;  %11411 = vst [vmem:[#allocation150_spill] sm:$0xff] %v8168_v56  ;;  %v2379_v42 = vpack.i.b16 %v7733_v55, %v7725_v33  ;;  %v11417_v18 = vld [vmem:[#allocation41_spill] sm:$0xff]  ;;  %v11422_v55 = vld [vmem:[#allocation18_spill] sm:$0xff] }
 0x1e0   : > { %v1241_v8 = vpop.permute.xlu1 %1240  ;;  %11400 = vst [vmem:[#allocation146_spill] sm:$0xff] %v8129_v9  ;;  %11407 = vst [vmem:[#allocation147_spill] sm:$0xff] %v8149_v53  ;;  %v616_v15 = vcombine.low %v11417_v18, %v11416_v50  ;;  %v8187_v40 = vrot.slane %v556_v62, %v7293_v52  ;;  %v11421_v33 = vld [vmem:[#allocation17_spill] sm:$0xff] }
 0x1e1   : > { %3413 = vrot.lane.b32.xlu0 %v8008_v16, %s6249_s27  ;;  %v1354_v54 = vcombine.low %v8006_v49, %v1241_v8  ;;  %11409 = vst [vmem:[#allocation148_spill] sm:$0xff] %v8161_v14  ;;  %11410 = vst [vmem:[#allocation149_spill] sm:$0xff] %v8165_v6  ;;  %v608_v8 = vcombine.low %v11413_v61, %v11412_v57  ;;  %v11415_v49 = vld [vmem:[#allocation35_spill] sm:$0xff]  ;;  %v8184_v32 = vrot.slane %v522_v24, %v7293_v52  ;;  %v11424_v24 = vld [vmem:[#allocation20_spill] sm:$0xff] }
 0x1e2   : > { %3419 = vrot.lane.b32.xlu1 %v8008_v16, %s6252_s30  ;;  %v582_v1 = vcombine.low %v11415_v49, %v11414_v35  ;;  %11419 = vst [vmem:[#allocation152_spill] sm:$0xff] %v8187_v40  ;;  %v2427_v6 = vpack.i.b16 %v11402_v10, %v11401_v17  ;;  %v11423_v9 = vcombine.low %v11421_v33, %v11422_v55  ;;  %v11425_v23 = vld [vmem:[#allocation21_spill] sm:$0xff]  ;;  %v11432_v55 = vld [vmem:[#allocation52_spill] sm:$0xff] }
 0x1e3   : > { %v1243_v11 = vpop.permute.xlu0 %1242  ;;  %11418 = vst [vmem:[#allocation151_spill] sm:$0xff] %v8184_v32  ;;  %v11426_v62 = vcombine.low %v11424_v24, %v11425_v23 }
 0x1e4   : > { %v1245_v45 = vpop.permute.xlu1 %1244  ;;  %v1490_v28 = vcombine.low %v8032_v0, %v1243_v11  ;;  %v8192_v0 = vrot.slane %v1354_v54, %v6494_v13  ;;  %v8199_v14 = vrot.slane %v11423_v9, %v7293_v52  ;;  %v8210_v10 = vcombine.low %v2379_v42, %v2427_v6  ;;  %v11431_v9 = vld [vmem:[#allocation51_spill] sm:$0xff] }
 0x1e5   : > { %3417 = vrot.lane.b32.xlu0 %v8008_v16, %s6251_s29  ;;  %v1388_v11 = vcombine.low %v8034_v41, %v1245_v45  ;;  %v8205_v3 = vrot.slane %v11426_v62, %v7293_v52  ;;  %v11428_v45 = vld [vmem:[#allocation48_spill] sm:$0xff]  ;;  %v11429_v41 = vld [vmem:[#allocation49_spill] sm:$0xff]  ;;  %v11433_v59 = vcombine.low %v11431_v9, %v11432_v55  ;;  %s197_s29 = scalar_lea.vmem %s10741_s4, %s6170_s26 }
 0x1e6   : > { %3423 = vrot.lane.b32.xlu1 %v8008_v16, %s6254_s6  ;;  %11420 = vst [vmem:[#allocation153_spill] sm:$0xff] %v8192_v0  ;;  %11427 = vst [vmem:[#allocation154_spill] sm:$0xff] %v8210_v10  ;;  %v11430_v54 = vcombine.low %v11428_v45, %v11429_v41  ;;  %v1497_v62 = vrot.slane %v1490_v28, %v6494_v13 }
 0x1e7   : > { %v1247_v44 = vpop.permute.xlu0 %1246  ;;  %v8222_v24 = vrot.slane %v11433_v59, %v7293_v52  ;;  %v8234_v6 = vcombine.high %v8205_v3, %v11245_v46 }
 0x1e8   : > { %v1249_v53 = vpop.permute.xlu1 %1248  ;;  %v8216_v33 = vrot.slane %v11430_v54, %v7293_v52 }
 0x1e9   : > { %v1362_v17 = vcombine.low %v8081_v25, %v1249_v53  ;;  %3421 = vrot.lane.b32.xlu0 %v8008_v16, %s6253_s5  ;;  %v1524_v25 = vcombine.low %v8064_v19, %v1247_v44  ;;  %v8230_v53 = vcombine.high %v8199_v14, %v11245_v46  ;;  %v8245_v19 = vcombine.high %v8222_v24, %v11245_v46 }
 0x1ea   : > { %3427 = vrot.lane.b32.xlu1 %v8008_v16, %s6256_s8  ;;  %v8241_v28 = vcombine.high %v8216_v33, %v11245_v46  ;;  %v670_v44 = vshrl.u32 %v8187_v40, 16  ;;  %v652_v41 = vshrl.u32 %v8234_v6, 16 }
 0x1eb   : > { %v8237_v42 = vrot.slane %v1362_v17, %v6494_v13  ;;  %v1251_v59 = vpop.permute.xlu0 %1250  ;;  %v651_v45 = vshrl.u32 %v8230_v53, 16  ;;  %v669_v17 = vshrl.u32 %v8184_v32, 16  ;;  %v700_v49 = vshrl.u32 %v8245_v19, 16 }
 0x1ec   : > { %v1498_v54 = vcombine.low %v8100_v4, %v1251_v59  ;;  %v1253_v10 = vpop.permute.xlu1 %1252  ;;  %v699_v4 = vshrl.u32 %v8241_v28, 16 }
 0x1ed   : > { %11434 = vst [vmem:[#allocation155_spill] sm:$0xff] %v8237_v42  ;;  %v1371_v9 = vcombine.high %v8192_v0, %v8237_v42  ;;  %v1396_v55 = vcombine.low %v8104_v20, %v1253_v10  ;;  %3425 = vrot.lane.b32.xlu0 %v8008_v16, %s6255_s7  ;;  %v8263_v35 = vpack.i.b16 %v652_v41, %v651_v45 }
 0x1ee   : > { %v1505_v59 = vrot.slane %v1498_v54, %v6494_v13  ;;  %3431 = vrot.lane.b32.xlu1 %v8008_v16, %s6258_s10  ;;  %v8266_v23 = vpack.i.b16 %v670_v44, %v669_v17  ;;  %v8269_v42 = vrot.slane %v582_v1, %v6494_v13  ;;  %v8272_v20 = vrot.slane %v616_v15, %v6494_v13 }
 0x1ef   : > { %11435 = vst [vmem:[#allocation156_spill] sm:$0xff] %v8263_v35  ;;  %v8275_v10 = vrot.slane %v1388_v11, %v6494_v13  ;;  %v8278_v54 = vrot.slane %v1396_v55, %v6494_v13  ;;  %v1255_v0 = vpop.permute.xlu0 %1254  ;;  %v8283_v44 = vpack.i.b16 %v700_v49, %v699_v4  ;;  %v8286_v1 = vrot.slane %v608_v8, %v6494_v13  ;;  %v11496_v35 = vld [vmem:[#allocation77_spill] sm:$0xff] }
 0x1f0   : > { %11436 = vst [vmem:[#allocation157_spill] sm:$0xff] %v8266_v23  ;;  %11437 = vst [vmem:[#allocation158_spill] sm:$0xff] %v8269_v42  ;;  %v1506_v50 = vcombine.low %v1497_v62, %v1505_v59  ;;  %v1507_v45 = vcombine.high %v1497_v62, %v1505_v59  ;;  %v1532_v41 = vcombine.low %v8125_v29, %v1255_v0  ;;  %v8281_v18 = vpop.permute.xlu1 %2479 }
 0x1f1   : > { %11438 = vst [vmem:[#allocation159_spill] sm:$0xff] %v8272_v20  ;;  %11439 = vst [vmem:[#allocation160_spill] sm:$0xff] %v8275_v10  ;;  %v1385_v15 = vrot.slane %v1371_v9, %v7293_v52  ;;  %v1405_v55 = vcombine.high %v8275_v10, %v8278_v54  ;;  %3429 = vrot.lane.b32.xlu0 %v8008_v16, %s6257_s9  ;;  %v1531_v29 = vrot.slane %v1524_v25, %v6494_v13  ;;  %v11443_v9 = vld [vmem:[#allocation37_spill] sm:$0xff] }
 0x1f2   : > { %11440 = vst [vmem:[#allocation161_spill] sm:$0xff] %v8278_v54  ;;  %11441 = vst [vmem:[#allocation162_spill] sm:$0xff] %v8283_v44  ;;  %v8297_v0 = vrot.slane %v1506_v50, %v7293_v52  ;;  %v1521_v49 = vrot.slane %v1507_v45, %v7293_v52  ;;  %v1539_v8 = vrot.slane %v1532_v41, %v6494_v13  ;;  %2965 = vrot.lane.b32.xlu1 %v11443_v9, %s6245_s23 }
 0x1f3   : > { %11442 = vst [vmem:[#allocation163_spill] sm:$0xff] %v8286_v1  ;;  %v1419_v62 = vrot.slane %v1405_v55, %v7293_v52  ;;  %v8304_v17 = vpop.permute.xlu0 %2477  ;;  %v590_v25 = vcombine.low %v8168_v56, %v8269_v42  ;;  %v624_v50 = vcombine.low %v8286_v1, %v8272_v20  ;;  %v8313_v45 = vcombine.high %v1385_v15, %v11245_v46  ;;  %v11446_v55 = vld [vmem:[#allocation64_spill] sm:$0xff]  ;;  %v11448_v42 = vld [vmem:[#allocation54_spill] sm:$0xff] }
 0x1f4   : > { %v1540_v4 = vcombine.low %v1531_v29, %v1539_v8  ;;  %v1541_v59 = vcombine.high %v1531_v29, %v1539_v8  ;;  %v8306_v11 = vpop.permute.xlu1 %2483  ;;  %v1621_v9 = vshrl.u32 %v1385_v15, 16  ;;  %v1522_v29 = vcombine.high %v8297_v0, %v11245_v46 }
 0x1f5   : > { %11444 = vst [vmem:[#allocation37_spill] sm:$0xff] %v8313_v45  ;;  %v8316_v41 = vcombine.high %v1419_v62, %v11245_v46  ;;  %2963 = vrot.lane.b32.xlu0 %v11446_v55, %s6245_s23  ;;  %v1622_v54 = vshrl.u32 %v1419_v62, 16  ;;  %v8323_v8 = vcombine.high %v1521_v49, %v11245_v46  ;;  %v1645_v20 = vshrl.u32 %v1521_v49, 16 }
 0x1f6   : > { %v8326_v10 = vrot.slane %v1540_v4, %v7293_v52  ;;  %v1555_v56 = vrot.slane %v1541_v59, %v7293_v52  ;;  %2969 = vrot.lane.b32.xlu1 %v11448_v42, %s6245_s23  ;;  %v1620_v57 = vpack.i.b16 %v1419_v62, %v1385_v15  ;;  %v11450_v42 = vld [vmem:[#allocation66_spill] sm:$0xff]  ;;  %v11453_v15 = vpack.i.b16 %v8030_v22, %v8011_v26 }
 0x1f7   : > { %11445 = vst [vmem:[#allocation164_spill] sm:$0xff] %v8316_v41  ;;  %11447 = vst [vmem:[#allocation64_spill] sm:$0xff] %v8323_v8  ;;  %v8331_v1 = vpop.permute.xlu0 %2481  ;;  %v1626_v55 = vpack.i.b16 %v8316_v41, %v8313_v45  ;;  %v8335_v61 = vpack.i.b16 %v1622_v54, %v1621_v9  ;;  %v8359_v9 = vrot.slane %v624_v50, %v7293_v52  ;;  %v1639_v26 = vshrl.u32 %v1522_v29, 16 }
 0x1f8   : > { %v1556_v7 = vcombine.high %v8326_v10, %v11245_v46  ;;  %v8340_v4 = vcombine.high %v1555_v56, %v11245_v46  ;;  %v8342_v43 = vpop.permute.xlu1 %2487  ;;  %v1646_v59 = vshrl.u32 %v1555_v56, 16  ;;  %v1644_v34 = vpack.i.b16 %v1555_v56, %v1521_v49  ;;  %v11456_v56 = vld [vmem:[#allocation55_spill] sm:$0xff] }
 0x1f9   : > { %11449 = vst [vmem:[#allocation54_spill] sm:$0xff] %v8335_v61  ;;  %2967 = vrot.lane.b32.xlu0 %v11450_v42, %s6245_s23  ;;  %v8349_v45 = vcombine.low %v11451_v38, %v1626_v55  ;;  %v8356_v62 = vcombine.low %v11453_v15, %v1620_v57  ;;  %11455 = vst [vmem:[#allocation166_spill] sm:$0xff] %v8359_v9  ;;  %v11458_v38 = vpack.i.b16 %v8060_v30, %v8024_v37 }
 0x1fa   : > { %2973 = vrot.lane.b32.xlu1 %v11456_v56, %s6245_s23  ;;  %v1650_v49 = vpack.i.b16 %v8340_v4, %v8323_v8  ;;  %v8365_v42 = vpack.i.b16 %v1646_v59, %v1645_v20  ;;  %v1640_v22 = vshrl.u32 %v1556_v7, 16  ;;  %v1638_v57 = vpack.i.b16 %v1556_v7, %v1522_v29  ;;  %v11467_v29 = vld [vmem:[#allocation56_spill] sm:$0xff] }
 0x1fb   : > { %11452 = vst [vmem:[#allocation66_spill] sm:$0xff] %v8349_v45  ;;  %11454 = vst [vmem:[#allocation165_spill] sm:$0xff] %v8356_v62  ;;  %v8370_v55 = vcombine.low %v11458_v38, %v1644_v34  ;;  %v8372_v54 = vpop.permute.xlu0 %2485  ;;  %v8375_v50 = vrot.slane %v590_v25, %v7293_v52  ;;  %v11461_v56 = vpack.i.b16 %v8079_v12, %v8054_v48  ;;  %v11463_v34 = vld [vmem:[#allocation72_spill] sm:$0xff]  ;;  %v718_v25 = vshrl.u32 %v8359_v9, 16  ;;  %v11472_v38 = vld [vmem:[#allocation57_spill] sm:$0xff] }
 0x1fc   : > { %11457 = vst [vmem:[#allocation55_spill] sm:$0xff] %v8365_v42  ;;  %v2492_v15 = vpop.permute.xlu1 %2491  ;;  %v8386_v37 = vpack.i.b16 %v1640_v22, %v1639_v26  ;;  %v11465_v7 = vpack.i.b16 %v8075_v47, %v8050_v27  ;;  %v1633_v59 = vshrl.u32 %v8297_v0, 16  ;;  %v11468_v47 = vld [vmem:[#allocation86_spill] sm:$0xff]  ;;  %v692_v23 = vpack.i.b16 %v8222_v24, %v8216_v33  ;;  %v11578_v48 = vld [vmem:[#allocation24_spill] sm:$0xff] }
 0x1fd   : > { %11459 = vst [vmem:[#allocation167_spill] sm:$0xff] %v8370_v55  ;;  %11460 = vst [vmem:[#allocation168_spill] sm:$0xff] %v8375_v50  ;;  %v8380_v62 = vcombine.low %v11461_v56, %v1650_v49  ;;  %2971 = vrot.lane.b32.xlu0 %v11463_v34, %s6245_s23  ;;  %v1634_v49 = vshrl.u32 %v8326_v10, 16  ;;  %v717_v27 = vshrl.u32 %v8375_v50, 16  ;;  %v2705_v22 = vcombine.low %v11468_v47, %v2492_v15 }
 0x1fe   : > { %11464 = vst [vmem:[#allocation72_spill] sm:$0xff] %v8386_v37  ;;  %v8391_v30 = vcombine.low %v11465_v7, %v1638_v57  ;;  %2977 = vrot.lane.b32.xlu1 %v11467_v29, %s6245_s23  ;;  %v11470_v7 = vld [vmem:[#allocation73_spill] sm:$0xff]  ;;  %v650_v15 = vpack.i.b16 %v8234_v6, %v8230_v53  ;;  %v716_v26 = vpack.i.b16 %v8359_v9, %v8375_v50  ;;  %v11474_v6 = vld [vmem:[#allocation75_spill] sm:$0xff] }
 0x1ff   : > { %11462 = vst [vmem:[#allocation169_spill] sm:$0xff] %v8380_v62  ;;  %v2490_v56 = vpop.permute.xlu0 %2489  ;;  %v8404_v34 = vpack.i.b16 %v1634_v49, %v1633_v59  ;;  %v8410_v20 = vpack.i.b16 %v718_v25, %v717_v27  ;;  %v698_v49 = vpack.i.b16 %v8245_v19, %v8241_v28  ;;  %v11473_v25 = vld [vmem:[#allocation11_spill] sm:$0xff]  ;;  %v645_v28 = vshrl.u32 %v8199_v14, 16 }
 0x200   : > { %11466 = vst [vmem:[#allocation170_spill] sm:$0xff] %v8391_v30  ;;  %v2496_v57 = vpop.permute.xlu1 %2495  ;;  %v2569_v27 = vcombine.low %v11473_v25, %v2490_v56  ;;  %v646_v19 = vshrl.u32 %v8205_v3, 16  ;;  %v11476_v56 = vld [vmem:[#allocation58_spill] sm:$0xff]  ;;  %v693_v25 = vshrl.u32 %v8216_v33, 16  ;;  %v11507_v30 = vld [vmem:[#allocation45_spill] sm:$0xff] }
 0x201   : > { %11469 = vst [vmem:[#allocation56_spill] sm:$0xff] %v8404_v34  ;;  %2975 = vrot.lane.b32.xlu0 %v11470_v7, %s6245_s23  ;;  %11471 = vst [vmem:[#allocation86_spill] sm:$0xff] %v8410_v20  ;;  %v2712_v7 = vrot.slane %v2705_v22, %v6494_v13  ;;  %v8431_v59 = vcombine.low %v650_v15, %v698_v49  ;;  %v694_v20 = vshrl.u32 %v8222_v24, 16  ;;  %v11484_v24 = vld [vmem:[#allocation67_spill] sm:$0xff] }
 0x202   : > { %2981 = vrot.lane.b32.xlu1 %v11472_v38, %s6245_s23  ;;  %v668_v38 = vpack.i.b16 %v8187_v40, %v8184_v32 }
 0x203   : > { %v2494_v47 = vpop.permute.xlu0 %2493  ;;  %11475 = vst [vmem:[#allocation73_spill] sm:$0xff] %v8431_v59 }
 0x204   : > { %v2500_v29 = vpop.permute.xlu1 %2499  ;;  %v8437_v22 = vcombine.low %v668_v38, %v716_v26 }
 0x205   : > { %v2713_v53 = vcombine.low %v8306_v11, %v2500_v29  ;;  %2979 = vrot.lane.b32.xlu0 %v11474_v6, %s6245_s23  ;;  %v644_v11 = vpack.i.b16 %v8205_v3, %v8199_v14  ;;  %v2739_v29 = vcombine.low %v8281_v18, %v2496_v57  ;;  %v8445_v6 = vpack.i.b16 %v646_v19, %v645_v28  ;;  %v11480_v14 = vld [vmem:[#allocation76_spill] sm:$0xff] }
 0x206   : > { %2985 = vrot.lane.b32.xlu1 %v11476_v56, %s6245_s23  ;;  %11477 = vst [vmem:[#allocation57_spill] sm:$0xff] %v8437_v22  ;;  %v8450_v56 = vpack.i.b16 %v694_v20, %v693_v25  ;;  %v8458_v18 = vrot.slane %v2569_v27, %v6494_v13  ;;  %v2603_v57 = vcombine.low %v8304_v17, %v2494_v47 }
 0x207   : > { %v2720_v15 = vrot.slane %v2713_v53, %v6494_v13  ;;  %v2498_v49 = vpop.permute.xlu0 %2497  ;;  %11478 = vst [vmem:[#allocation11_spill] sm:$0xff] %v8445_v6  ;;  %v8455_v3 = vcombine.low %v644_v11, %v692_v23 }
 0x208   : > { %v2577_v26 = vcombine.low %v8331_v1, %v2498_v49  ;;  %v2504_v38 = vpop.permute.xlu1 %2503  ;;  %11479 = vst [vmem:[#allocation75_spill] sm:$0xff] %v8450_v56  ;;  %11482 = vst [vmem:[#allocation76_spill] sm:$0xff] %v8458_v18 }
 0x209   : > { %v2721_v22 = vcombine.low %v2712_v7, %v2720_v15  ;;  %v2722_v59 = vcombine.high %v2712_v7, %v2720_v15  ;;  %v2747_v44 = vcombine.low %v8342_v43, %v2504_v38  ;;  %2983 = vrot.lane.b32.xlu0 %v11480_v14, %s6245_s23  ;;  %11481 = vst [vmem:[#allocation58_spill] sm:$0xff] %v8455_v3  ;;  %v11497_v14 = vld [vmem:[#allocation3_spill] sm:$0xff] }
 0x20a   : > { %v8462_v33 = vrot.slane %v2577_v26, %v6494_v13  ;;  %2989 = vrot.lane.b32.xlu1 %v11484_v24, %s6245_s23  ;;  %v2746_v43 = vrot.slane %v2739_v29, %v6494_v13  ;;  %v11488_v29 = vld [vmem:[#allocation62_spill] sm:$0xff] }
 0x20b   : > { %v8470_v20 = vrot.slane %v2721_v22, %v7293_v52  ;;  %v2754_v23 = vrot.slane %v2747_v44, %v6494_v13  ;;  %v2502_v7 = vpop.permute.xlu0 %2501  ;;  %v8474_v27 = vrot.slane %v2722_v59, %v7293_v52  ;;  %v11485_v22 = vld [vmem:[#allocation71_spill] sm:$0xff]  ;;  %v8486_v44 = vrot.slane %v2603_v57, %v6494_v13 }
 0x20c   : > { %11483 = vst [vmem:[#allocation171_spill] sm:$0xff] %v8462_v33  ;;  %v2586_v47 = vcombine.high %v8458_v18, %v8462_v33  ;;  %v2611_v53 = vcombine.low %v8372_v54, %v2502_v7  ;;  %v8481_v28 = vpop.permute.xlu1 %2507  ;;  %v11505_v33 = vpack.i.b16 %v8057_v31, %v8021_v21 }
 0x20d   : > { %v2755_v19 = vcombine.low %v2746_v43, %v2754_v23  ;;  %v2756_v25 = vcombine.high %v2746_v43, %v2754_v23  ;;  %2987 = vrot.lane.b32.xlu0 %v11485_v22, %s6245_s23  ;;  %11486 = vst [vmem:[#allocation67_spill] sm:$0xff] %v8486_v44  ;;  %v8490_v59 = vcombine.high %v8470_v20, %v11245_v46  ;;  %v2880_v43 = vshrl.u32 %v8474_v27, 16  ;;  %v11492_v22 = vld [vmem:[#allocation78_spill] sm:$0xff] }
 0x20e   : > { %v8493_v11 = vrot.slane %v2611_v53, %v6494_v13  ;;  %2993 = vrot.lane.b32.xlu1 %v11488_v29, %s6245_s23  ;;  %v8498_v54 = vrot.slane %v2586_v47, %v7293_v52  ;;  %v8510_v38 = vcombine.high %v8474_v27, %v11245_v46  ;;  %v11491_v47 = vld [vmem:[#allocation74_spill] sm:$0xff]  ;;  %v6006_v29 = vrot.slane %v8008_v16, 9 }
 0x20f   : > { %v8501_v15 = vrot.slane %v2755_v19, %v7293_v52  ;;  %v8504_v49 = vrot.slane %v2756_v25, %v7293_v52  ;;  %v8506_v26 = vpop.permute.xlu0 %2505  ;;  %v2874_v1 = vshrl.u32 %v8490_v59, 16 }
 0x210   : > { %11487 = vst [vmem:[#allocation71_spill] sm:$0xff] %v8493_v11  ;;  %11489 = vst [vmem:[#allocation62_spill] sm:$0xff] %v8510_v38  ;;  %v2620_v57 = vcombine.high %v8486_v44, %v8493_v11  ;;  %v2512_v24 = vpop.permute.xlu1 %2511  ;;  %v8539_v17 = vcombine.high %v8498_v54, %v11245_v46  ;;  %v2856_v16 = vshrl.u32 %v8498_v54, 16  ;;  %v11508_v44 = vld [vmem:[#allocation31_spill] sm:$0xff] }
 0x211   : > { %v8519_v23 = vcombine.high %v8501_v15, %v11245_v46  ;;  %v8523_v7 = vcombine.high %v8504_v49, %v11245_v46  ;;  %2991 = vrot.lane.b32.xlu0 %v11491_v47, %s6245_s23  ;;  %v2881_v53 = vshrl.u32 %v8504_v49, 16  ;;  %v2869_v34 = vshrl.u32 %v8501_v15, 16 }
 0x212   : > { %v8531_v25 = vrot.slane %v2620_v57, %v7293_v52  ;;  %2997 = vrot.lane.b32.xlu1 %v11492_v22, %s6245_s23  ;;  %11493 = vst [vmem:[#allocation74_spill] sm:$0xff] %v8539_v17  ;;  %v11520_v36 = vpack.i.b16 %v8504_v49, %v8474_v27 }
 0x213   : > { %11490 = vst [vmem:[#allocation172_spill] sm:$0xff] %v8523_v7  ;;  %v2510_v47 = vpop.permute.xlu0 %2509  ;;  %v8543_v3 = vpack.i.b16 %v2881_v53, %v2880_v43  ;;  %v2875_v57 = vshrl.u32 %v8519_v23, 16  ;;  %v11498_v43 = vrot.slane %v11497_v14, 5  ;;  %v2868_v14 = vshrl.u32 %v8470_v20, 16 }
 0x214   : > { %v8548_v19 = vcombine.high %v8531_v25, %v11245_v46  ;;  %v2516_v22 = vpop.permute.xlu1 %2515  ;;  %v2857_v56 = vshrl.u32 %v8531_v25, 16  ;;  %v11528_v58 = vpack.i.b16 %v8531_v25, %v8498_v54 }
 0x215   : > { %11494 = vst [vmem:[#allocation78_spill] sm:$0xff] %v8543_v3  ;;  %2995 = vrot.lane.b32.xlu0 %v11496_v35, %s6245_s23  ;;  %v8560_v32 = vsel %vm6503_vm8, %v6006_v29, %v11498_v43  ;;  %v8562_v50 = vpack.i.b16 %v2875_v57, %v2874_v1  ;;  %v11502_v1 = vld [vmem:[#allocation25_spill] sm:$0xff]  ;;  %v8576_v57 = vpack.i.b16 %v2869_v34, %v2868_v14  ;;  %v11556_v3 = vld [vmem:[#allocation19_spill] sm:$0xff] }
 0x216   : > { %11495 = vst [vmem:[#allocation173_spill] sm:$0xff] %v8548_v19  ;;  %3948 = vrot.lane.b32.xlu1 %v8560_v32, %s6244_s22  ;;  %v8570_v9 = vpack.i.b16 %v2857_v56, %v2856_v16  ;;  %v1632_v56 = vpack.i.b16 %v8326_v10, %v8297_v0 }
 0x217   : > { %11500 = vst [vmem:[#allocation77_spill] sm:$0xff] %v8562_v50  ;;  %v2514_v35 = vpop.permute.xlu0 %2513  ;;  %11503 = vst [vmem:[#allocation14_spill] sm:$0xff] %v8576_v57  ;;  %v11540_v57 = vld [vmem:[#allocation87_spill] sm:$0xff] }
 0x218   : > { %11501 = vst [vmem:[#allocation3_spill] sm:$0xff] %v8570_v9  ;;  %v2520_v29 = vpop.permute.xlu1 %2519  ;;  %v8585_v18 = vcombine.low %v11505_v33, %v1632_v56 }
 0x219   : > { %2999 = vrot.lane.b32.xlu0 %v11502_v1, %s6245_s23 }
 0x21a   : > { %11506 = vst [vmem:[#allocation25_spill] sm:$0xff] %v8585_v18 }
 0x21b   : > { %v2518_v43 = vpop.permute.xlu0 %2517 }
 0x21c   : > { %v2524_v40 = vpop.permute.xlu1 %2523 }
 0x21d   : > { %3950 = vrot.lane.b32.xlu0 %v11504_v60, %s6244_s22  ;;  %v2773_v34 = vcombine.low %v8481_v28, %v2524_v40  ;;  %v11509_v40 = vld [vmem:[#allocation26_spill] sm:$0xff] }
 0x21f   : > { %v2522_v16 = vpop.permute.xlu0 %2521  ;;  %v2780_v0 = vrot.slane %v2773_v34, %v6494_v13 }
 0x220   : > { %v2528_v6 = vpop.permute.xlu1 %2527  ;;  %v2637_v10 = vcombine.low %v8506_v26, %v2522_v16 }
 0x221   : > { %3954 = vrot.lane.b32.xlu0 %v11507_v30, %s6244_s22  ;;  %v2807_v37 = vcombine.low %v2512_v24, %v2528_v6 }
 0x222   : > { %v8598_v28 = vrot.slane %v2637_v10, %v6494_v13 }
 0x223   : > { %v2526_v14 = vpop.permute.xlu0 %2525  ;;  %v2814_v6 = vrot.slane %v2807_v37, %v6494_v13  ;;  %v11512_v37 = vld [vmem:[#allocation79_spill] sm:$0xff] }
 0x224   : > { %v2532_v1 = vpop.permute.xlu1 %2531  ;;  %11510 = vst [vmem:[#allocation16_spill] sm:$0xff] %v8598_v28 }
 0x225   : > { %v2781_v11 = vcombine.low %v2516_v22, %v2532_v1  ;;  %3958 = vrot.lane.b32.xlu0 %v11508_v44, %s6244_s22  ;;  %v2671_v22 = vcombine.low %v2510_v47, %v2526_v14 }
 0x227   : > { %v2788_v21 = vrot.slane %v2781_v11, %v6494_v13  ;;  %v2530_v31 = vpop.permute.xlu0 %2529 }
 0x228   : > { %v2645_v33 = vcombine.low %v2514_v35, %v2530_v31  ;;  %v2536_v56 = vpop.permute.xlu1 %2535 }
 0x229   : > { %v2789_v18 = vcombine.low %v2780_v0, %v2788_v21  ;;  %v2790_v39 = vcombine.high %v2780_v0, %v2788_v21  ;;  %v2815_v61 = vcombine.low %v2520_v29, %v2536_v56  ;;  %3962 = vrot.lane.b32.xlu0 %v11509_v40, %s6244_s22 }
 0x22a   : > { %v8601_v26 = vrot.slane %v2645_v33, %v6494_v13 }
 0x22b   : > { %v8605_v11 = vrot.slane %v2789_v18, %v7293_v52  ;;  %v2822_v24 = vrot.slane %v2815_v61, %v6494_v13  ;;  %v2534_v35 = vpop.permute.xlu0 %2533  ;;  %v2804_v29 = vrot.slane %v2790_v39, %v7293_v52  ;;  %v8618_v18 = vrot.slane %v2671_v22, %v6494_v13 }
 0x22c   : > { %11511 = vst [vmem:[#allocation45_spill] sm:$0xff] %v8601_v26  ;;  %v2654_v34 = vcombine.high %v8598_v28, %v8601_v26  ;;  %v2679_v47 = vcombine.low %v2518_v43, %v2534_v35  ;;  %v8613_v14 = vpop.permute.xlu1 %2939 }
 0x22d   : > { %v2823_v1 = vcombine.low %v2814_v6, %v2822_v24  ;;  %v2824_v10 = vcombine.high %v2814_v6, %v2822_v24  ;;  %3966 = vrot.lane.b32.xlu0 %v11512_v37, %s6244_s22  ;;  %11513 = vst [vmem:[#allocation31_spill] sm:$0xff] %v8618_v18  ;;  %v2805_v39 = vcombine.high %v8605_v11, %v11245_v46  ;;  %v2928_v24 = vshrl.u32 %v2804_v29, 16 }
 0x22e   : > { %v8623_v61 = vrot.slane %v2679_v47, %v6494_v13  ;;  %v2668_v0 = vrot.slane %v2654_v34, %v7293_v52  ;;  %v8631_v33 = vcombine.high %v2804_v29, %v11245_v46  ;;  %v11517_v47 = vld [vmem:[#allocation81_spill] sm:$0xff]  ;;  %v2916_v25 = vshrl.u32 %v8605_v11, 16 }
 0x22f   : > { %v8627_v43 = vrot.slane %v2823_v1, %v7293_v52  ;;  %v2838_v21 = vrot.slane %v2824_v10, %v7293_v52  ;;  %v2938_v31 = vpop.permute.xlu0 %2937  ;;  %v2922_v56 = vshrl.u32 %v2805_v39, 16 }
 0x230   : > { %11514 = vst [vmem:[#allocation26_spill] sm:$0xff] %v8623_v61  ;;  %11515 = vst [vmem:[#allocation79_spill] sm:$0xff] %v8631_v33  ;;  %v2688_v22 = vcombine.high %v8618_v18, %v8623_v61  ;;  %v8637_v6 = vpop.permute.xlu1 %2943  ;;  %v8648_v26 = vcombine.high %v2668_v0, %v11245_v46 }
 0x231   : > { %v2839_v35 = vcombine.high %v8627_v43, %v11245_v46  ;;  %v8642_v34 = vcombine.high %v2838_v21, %v11245_v46  ;;  %3970 = vrot.lane.b32.xlu0 %v11517_v47, %s6244_s22  ;;  %v2929_v1 = vshrl.u32 %v2838_v21, 16  ;;  %v2927_v10 = vpack.i.b16 %v2838_v21, %v2804_v29 }
 0x232   : > { %v2702_v16 = vrot.slane %v2688_v22, %v7293_v52  ;;  %11518 = vst [vmem:[#allocation81_spill] sm:$0xff] %v8648_v26  ;;  %v2904_v22 = vshrl.u32 %v2668_v0, 16 }
 0x233   : > { %11516 = vst [vmem:[#allocation174_spill] sm:$0xff] %v8642_v34  ;;  %v8650_v28 = vpop.permute.xlu0 %2941  ;;  %v2933_v61 = vpack.i.b16 %v8642_v34, %v8631_v33  ;;  %v8654_v18 = vpack.i.b16 %v2929_v1, %v2928_v24  ;;  %v8659_v55 = vcombine.low %v11520_v36, %v2927_v10  ;;  %v2923_v42 = vshrl.u32 %v2839_v35, 16  ;;  %v11566_v33 = vld [vmem:[#allocation29_spill] sm:$0xff] }
 0x234   : > { %v8662_v29 = vcombine.high %v2702_v16, %v11245_v46  ;;  %v8664_v21 = vpop.permute.xlu1 %2947  ;;  %v2905_v45 = vshrl.u32 %v2702_v16, 16  ;;  %v11524_v24 = vpack.i.b16 %v8523_v7, %v8510_v38  ;;  %v2903_v27 = vpack.i.b16 %v2702_v16, %v2668_v0  ;;  %v11532_v0 = vld [vmem:[#allocation13_spill] sm:$0xff] }
 0x235   : > { %11519 = vst [vmem:[#allocation175_spill] sm:$0xff] %v8654_v18  ;;  %11521 = vst [vmem:[#allocation176_spill] sm:$0xff] %v8659_v55  ;;  %3974 = vrot.lane.b32.xlu0 %v11523_v5, %s6244_s22  ;;  %v8679_v55 = vpack.i.b16 %v2923_v42, %v2922_v56  ;;  %v2921_v41 = vpack.i.b16 %v2839_v35, %v2805_v39  ;;  %v2917_v39 = vshrl.u32 %v8627_v43, 16  ;;  %v11567_v7 = vrot.slane %v11566_v33, 5 }
 0x236   : > { %11522 = vst [vmem:[#allocation177_spill] sm:$0xff] %v8662_v29  ;;  %v8671_v1 = vcombine.low %v11524_v24, %v2933_v61  ;;  %v2909_v49 = vpack.i.b16 %v8662_v29, %v8648_v26  ;;  %v8677_v10 = vpack.i.b16 %v2905_v45, %v2904_v22  ;;  %v8684_v51 = vcombine.low %v11528_v58, %v2903_v27 }
 0x237   : > { %11527 = vst [vmem:[#allocation179_spill] sm:$0xff] %v8679_v55  ;;  %v2946_v62 = vpop.permute.xlu0 %2945  ;;  %v11530_v24 = vpack.i.b16 %v8548_v19, %v8539_v17  ;;  %v11533_v58 = vpack.i.b16 %v8519_v23, %v8490_v59  ;;  %v2867_v56 = vpack.i.b16 %v8501_v15, %v8470_v20  ;;  %v8710_v22 = vpack.i.b16 %v2917_v39, %v2916_v25  ;;  %v11538_v25 = vld [vmem:[#allocation83_spill] sm:$0xff] }
 0x238   : > { %11525 = vst [vmem:[#allocation82_spill] sm:$0xff] %v8671_v1  ;;  %11526 = vst [vmem:[#allocation178_spill] sm:$0xff] %v8677_v10  ;;  %v8686_v61 = vpop.permute.xlu1 %2951  ;;  %v11539_v45 = vrot.slane %v11396_v63, 5  ;;  %v11543_v55 = vld [vmem:[#allocation15_spill] sm:$0xff] }
 0x239   : > { %11529 = vst [vmem:[#allocation180_spill] sm:$0xff] %v8684_v51  ;;  %v8691_v16 = vcombine.low %v11530_v24, %v2909_v49  ;;  %3978 = vrot.lane.b32.xlu0 %v11532_v0, %s6244_s22  ;;  %v8702_v54 = vcombine.low %v11533_v58, %v2921_v41  ;;  %11535 = vst [vmem:[#allocation182_spill] sm:$0xff] %v8710_v22  ;;  %v11536_v49 = vld [vmem:[#allocation42_spill] sm:$0xff]  ;;  %v11537_v24 = vld [vmem:[#allocation44_spill] sm:$0xff]  ;;  %v11542_v51 = vrot.slane %v11375_v2, 5  ;;  %v11544_v50 = vrot.slane %v11543_v55, 5 }
 0x23a   : > { %v11547_v2 = vld [vmem:[#allocation10_spill] sm:$0xff] }
 0x23b   : > { %11531 = vst [vmem:[#allocation181_spill] sm:$0xff] %v8691_v16  ;;  %11534 = vst [vmem:[#allocation13_spill] sm:$0xff] %v8702_v54  ;;  %v8708_v35 = vpop.permute.xlu0 %2949  ;;  %v11548_v9 = vrot.slane %v11547_v2, 5 }
 0x23c   : > { %v8712_v27 = vpop.permute.xlu1 %2955 }
 0x23d   : > { %3982 = vrot.lane.b32.xlu0 %v11536_v49, %s6244_s22 }
 0x23f   : > { %v2954_v59 = vpop.permute.xlu0 %2953 }
 0x240   : > { %v8718_v23 = vpop.permute.xlu1 %2959  ;;  %v3033_v39 = vcombine.low %v2938_v31, %v2954_v59 }
 0x241   : > { %3986 = vrot.lane.b32.xlu0 %v11537_v24, %s6244_s22 }
 0x243   : > { %v8722_v58 = vpop.permute.xlu0 %2957 }
 0x244   : > { %v3404_v20 = vpop.permute.xlu1 %3403 }
 0x245   : > { %v6007_v15 = vrot.slane %v3404_v20, 9  ;;  %3990 = vrot.lane.b32.xlu0 %v11538_v25, %s6244_s22  ;;  %v8737_v20 = vrot.slane %v3033_v39, %v6494_v13 }
 0x247   : > { %v2962_v42 = vpop.permute.xlu0 %2961  ;;  %v8730_v41 = vsel %vm6503_vm8, %v6007_v15, %v11539_v45 }
 0x248   : > { %v3041_v36 = vcombine.low %v2946_v62, %v2962_v42  ;;  %3952 = vrot.lane.b32.xlu1 %v8730_v41, %s6244_s22  ;;  %v3408_v22 = vpop.permute.xlu1 %3407  ;;  %v11541_v42 = vld [vmem:[#allocation38_spill] sm:$0xff] }
 0x249   : > { %3994 = vrot.lane.b32.xlu0 %v11540_v57, %s6244_s22  ;;  %v6009_v54 = vrot.slane %v3408_v22, 9  ;;  %v11546_v22 = vld [vmem:[#allocation84_spill] sm:$0xff] }
 0x24a   : > { %v8740_v31 = vrot.slane %v3041_v36, %v6494_v13 }
 0x24b   : > { %v3406_v59 = vpop.permute.xlu0 %3405 }
 0x24c   : > { %v6008_v45 = vrot.slane %v3406_v59, 9  ;;  %v3412_v15 = vpop.permute.xlu1 %3411 }
 0x24d   : > { %v6011_v62 = vrot.slane %v3412_v15, 9  ;;  %3998 = vrot.lane.b32.xlu0 %v11541_v42, %s6244_s22 }
 0x24e   : > { %v8750_v39 = vsel %vm6503_vm8, %v6008_v45, %v11542_v51  ;;  %v8766_v51 = vsel %vm6503_vm8, %v6009_v54, %v11548_v9  ;;  %v11549_v45 = vld [vmem:[#allocation12_spill] sm:$0xff] }
 0x24f   : > { %3956 = vrot.lane.b32.xlu1 %v8750_v39, %s6244_s22  ;;  %v3410_v36 = vpop.permute.xlu0 %3409  ;;  %v8758_v59 = vsel %vm6503_vm8, %v6011_v62, %v11544_v50  ;;  %v11550_v16 = vrot.slane %v11549_v45, 5  ;;  %v11551_v62 = vld [vmem:[#allocation22_spill] sm:$0xff] }
 0x250   : > { %11545 = vst [vmem:[#allocation42_spill] sm:$0xff] %v8758_v59  ;;  %v6010_v15 = vrot.slane %v3410_v36, 9  ;;  %v3416_v63 = vpop.permute.xlu1 %3415  ;;  %v3614_v50 = vcombine.low %v8730_v41, %v8758_v59  ;;  %v11552_v36 = vrot.slane %v11551_v62, 5  ;;  %v11557_v62 = vrot.slane %v11556_v3, 5 }
 0x251   : > { %v6013_v10 = vrot.slane %v3416_v63, 9  ;;  %4002 = vrot.lane.b32.xlu0 %v11546_v22, %s6244_s22 }
 0x252   : > { %v8772_v55 = vsel %vm6503_vm8, %v6010_v15, %v11550_v16  ;;  %v11554_v16 = vld [vmem:[#allocation85_spill] sm:$0xff]  ;;  %v8791_v18 = vrot.slane %v3614_v50, %v6494_v13  ;;  %v2915_v50 = vpack.i.b16 %v8627_v43, %v8605_v11 }
 0x253   : > { %3960 = vrot.lane.b32.xlu1 %v8766_v51, %s6244_s22  ;;  %v3414_v63 = vpop.permute.xlu0 %3413  ;;  %v8782_v2 = vsel %vm6503_vm8, %v6013_v10, %v11552_v36  ;;  %v3580_v15 = vcombine.low %v8560_v32, %v8772_v55 }
 0x254   : > { %11553 = vst [vmem:[#allocation44_spill] sm:$0xff] %v8782_v2  ;;  %v6012_v9 = vrot.slane %v3414_v63, 9  ;;  %v3420_v54 = vpop.permute.xlu1 %3419  ;;  %v3622_v45 = vcombine.low %v8766_v51, %v8782_v2  ;;  %11555 = vst [vmem:[#allocation83_spill] sm:$0xff] %v8791_v18  ;;  %v8820_v17 = vcombine.low %v2867_v56, %v2915_v50 }
 0x255   : > { %4006 = vrot.lane.b32.xlu0 %v11554_v16, %s6244_s22 }
 0x256   : > { %v8797_v10 = vsel %vm6503_vm8, %v6012_v9, %v11557_v62  ;;  %v8800_v63 = vrot.slane %v3622_v45, %v6494_v13  ;;  %v8813_v45 = vrot.slane %v3580_v15, %v6494_v13  ;;  %v11561_v62 = vld [vmem:[#allocation88_spill] sm:$0xff]  ;;  %11563 = vst [vmem:[#allocation10_spill] sm:$0xff] %v8820_v17 }
 0x257   : > { %11558 = vst [vmem:[#allocation87_spill] sm:$0xff] %v8797_v10  ;;  %3964 = vrot.lane.b32.xlu1 %v8772_v55, %s6244_s22  ;;  %v3418_v36 = vpop.permute.xlu0 %3417  ;;  %v3588_v1 = vcombine.low %v8750_v39, %v8797_v10 }
 0x258   : > { %11559 = vst [vmem:[#allocation38_spill] sm:$0xff] %v8800_v63  ;;  %v3424_v26 = vpop.permute.xlu1 %3423  ;;  %v3631_v9 = vcombine.high %v8791_v18, %v8800_v63  ;;  %11560 = vst [vmem:[#allocation15_spill] sm:$0xff] %v8813_v45  ;;  %v6015_v63 = vrot.slane %v3420_v54, 9  ;;  %v11564_v54 = vld [vmem:[#allocation46_spill] sm:$0xff] }
 0x259   : > { %4010 = vrot.lane.b32.xlu0 %v11561_v62, %s6244_s22  ;;  %v8818_v29 = vrot.slane %v3588_v1, %v6494_v13 }
 0x25a   : > { %v8823_v11 = vrot.slane %v3631_v9, %v7293_v52  ;;  %v6017_v9 = vrot.slane %v3424_v26, 9  ;;  %v11572_v26 = vld [vmem:[#allocation41_spill] sm:$0xff] }
 0x25b   : > { %11562 = vst [vmem:[#allocation84_spill] sm:$0xff] %v8818_v29  ;;  %3968 = vrot.lane.b32.xlu1 %v8758_v59, %s6244_s22  ;;  %v3422_v43 = vpop.permute.xlu0 %3421  ;;  %v3597_v15 = vcombine.high %v8813_v45, %v8818_v29  ;;  %v11565_v29 = vrot.slane %v11564_v54, 5  ;;  %v8860_v54 = vsel %vm6503_vm8, %v6015_v63, %v11567_v7  ;;  %v11579_v59 = vrot.slane %v11578_v48, 5 }
 0x25c   : > { %v3428_v18 = vpop.permute.xlu1 %3427  ;;  %v8833_v1 = vcombine.high %v8823_v11, %v11245_v46  ;;  %v3868_v17 = vshrl.u32 %v8823_v11, 16  ;;  %11568 = vst [vmem:[#allocation12_spill] sm:$0xff] %v8860_v54 }
 0x25d   : > { %v6019_v56 = vrot.slane %v3428_v18, 9  ;;  %4414 = vrot.lane.b32.xlu0 %v11504_v60, %s6245_s23  ;;  %v8838_v50 = vrot.slane %v3597_v15, %v7293_v52  ;;  %v6014_v15 = vrot.slane %v3418_v36, 9 }
 0x25f   : > { %3972 = vrot.lane.b32.xlu1 %v8797_v10, %s6244_s22  ;;  %v3426_v3 = vpop.permute.xlu0 %3425  ;;  %v8847_v45 = vsel %vm6503_vm8, %v6019_v56, %v11565_v29  ;;  %v8851_v18 = vcombine.high %v8838_v50, %v11245_v46  ;;  %v3867_v60 = vshrl.u32 %v8838_v50, 16  ;;  %v3874_v29 = vshrl.u32 %v8833_v1, 16  ;;  %v11570_v10 = vld [vmem:[#allocation43_spill] sm:$0xff] }
 0x260   : > { %v6018_v19 = vrot.slane %v3426_v3, 9  ;;  %v3432_v38 = vpop.permute.xlu1 %3431  ;;  %v6016_v3 = vrot.slane %v3422_v43, 9  ;;  %v11571_v33 = vrot.slane %v11570_v10, 5  ;;  %v11575_v10 = vld [vmem:[#allocation53_spill] sm:$0xff] }
 0x261   : > { %v6021_v56 = vrot.slane %v3432_v38, 9  ;;  %4418 = vrot.lane.b32.xlu0 %v11507_v30, %s6245_s23  ;;  %v3873_v34 = vshrl.u32 %v8851_v18, 16  ;;  %v8868_v36 = vpack.i.b16 %v3868_v17, %v3867_v60  ;;  %v3682_v38 = vcombine.low %v8860_v54, %v8847_v45 }
 0x262   : > { %v8874_v7 = vsel %vm6503_vm8, %v6018_v19, %v11571_v33  ;;  %v3067_v30 = vcombine.low %v8650_v28, %v8722_v58  ;;  %v11573_v17 = vrot.slane %v11572_v26, 5  ;;  %v11576_v60 = vrot.slane %v11575_v10, 5 }
 0x263   : > { %11569 = vst [vmem:[#allocation22_spill] sm:$0xff] %v8868_v36  ;;  %3976 = vrot.lane.b32.xlu1 %v8782_v2, %s6244_s22  ;;  %v3430_v63 = vpop.permute.xlu0 %3429  ;;  %v8894_v33 = vpack.i.b16 %v3874_v29, %v3873_v34  ;;  %v3050_v28 = vcombine.high %v8737_v20, %v8740_v31  ;;  %v8902_v26 = vsel %vm6503_vm8, %v6014_v15, %v11579_v59 }
 0x264   : > { %v8886_v43 = vsel %vm6503_vm8, %v6017_v9, %v11573_v17  ;;  %v8892_v19 = vsel %vm6503_vm8, %v6021_v56, %v11576_v60  ;;  %v6020_v58 = vrot.slane %v3430_v63, 9  ;;  %v2966_v2 = vpop.permute.xlu1 %2965  ;;  %11580 = vst [vmem:[#allocation46_spill] sm:$0xff] %v8902_v26  ;;  %v3169_v56 = vcombine.low %v8613_v14, %v8712_v27  ;;  %v11581_v63 = vld [vmem:[#allocation35_spill] sm:$0xff]  ;;  %v11584_v17 = vld [vmem:[#allocation50_spill] sm:$0xff] }
 0x265   : > { %11574 = vst [vmem:[#allocation85_spill] sm:$0xff] %v8886_v43  ;;  %11577 = vst [vmem:[#allocation19_spill] sm:$0xff] %v8894_v33  ;;  %v3690_v9 = vcombine.low %v8886_v43, %v8892_v19  ;;  %v3075_v34 = vcombine.low %v8708_v35, %v2966_v2  ;;  %4422 = vrot.lane.b32.xlu0 %v11508_v44, %s6245_s23  ;;  %v3648_v29 = vcombine.low %v8902_v26, %v8874_v7 }
 0x266   : > { %v11582_v48 = vrot.slane %v11581_v63, 5  ;;  %v3689_v15 = vrot.slane %v3682_v38, %v6494_v13  ;;  %v11585_v10 = vrot.slane %v11584_v17, 5  ;;  %v8928_v44 = vrot.slane %v3067_v30, %v6494_v13 }
 0x267   : > { %v3697_v35 = vrot.slane %v3690_v9, %v6494_v13  ;;  %v8931_v27 = vrot.slane %v3075_v34, %v6494_v13  ;;  %3980 = vrot.lane.b32.xlu1 %v8902_v26, %s6244_s22  ;;  %v2964_v2 = vpop.permute.xlu0 %2963  ;;  %v8938_v38 = vrot.slane %v3050_v28, %v7293_v52  ;;  %v3655_v63 = vrot.slane %v3648_v29, %v6494_v13 }
 0x268   : > { %v8917_v59 = vsel %vm6503_vm8, %v6016_v3, %v11582_v48  ;;  %v8924_v14 = vsel %vm6503_vm8, %v6020_v58, %v11585_v10  ;;  %v3177_v53 = vcombine.low %v8664_v21, %v2964_v2  ;;  %v8941_v60 = vpop.permute.xlu1 %2969  ;;  %v3176_v48 = vrot.slane %v3169_v56, %v6494_v13 }
 0x269   : > { %11583 = vst [vmem:[#allocation29_spill] sm:$0xff] %v8917_v59  ;;  %v3656_v3 = vcombine.low %v8917_v59, %v8924_v14  ;;  %v3698_v58 = vcombine.low %v3689_v15, %v3697_v35  ;;  %v3699_v30 = vcombine.high %v3689_v15, %v3697_v35  ;;  %v3084_v34 = vcombine.high %v8928_v44, %v8931_v27 }
 0x26a   : > { %4426 = vrot.lane.b32.xlu0 %v11509_v40, %s6245_s23  ;;  %v3203_v21 = vcombine.low %v8637_v6, %v8718_v23  ;;  %v3184_v15 = vrot.slane %v3177_v53, %v6494_v13  ;;  %v8966_v6 = vcombine.high %v8938_v38, %v11245_v46 }
 0x26b   : > { %v3663_v28 = vrot.slane %v3656_v3, %v6494_v13  ;;  %v8956_v17 = vrot.slane %v3084_v34, %v7293_v52  ;;  %3984 = vrot.lane.b32.xlu1 %v8860_v54, %s6244_s22  ;;  %v2968_v10 = vpop.permute.xlu0 %2967  ;;  %v3713_v29 = vrot.slane %v3699_v30, %v7293_v52 }
 0x26c   : > { %v3185_v2 = vcombine.low %v3176_v48, %v3184_v15  ;;  %v3186_v3 = vcombine.high %v3176_v48, %v3184_v15  ;;  %v3211_v56 = vcombine.low %v8686_v61, %v2968_v10  ;;  %v8962_v9 = vpop.permute.xlu1 %2973  ;;  %v3210_v30 = vrot.slane %v3203_v21, %v6494_v13 }
 0x26d   : > { %v3664_v35 = vcombine.low %v3655_v63, %v3663_v28  ;;  %v3665_v40 = vcombine.high %v3655_v63, %v3663_v28  ;;  %v8970_v23 = vcombine.high %v8956_v17, %v11245_v46  ;;  %v3321_v15 = vshrl.u32 %v8956_v17, 16 }
 0x26e   : > { %4430 = vrot.lane.b32.xlu0 %v11512_v37, %s6245_s23  ;;  %v8977_v34 = vrot.slane %v3185_v2, %v7293_v52  ;;  %v8980_v61 = vrot.slane %v3186_v3, %v7293_v52  ;;  %v3218_v63 = vrot.slane %v3211_v56, %v6494_v13  ;;  %v8991_v37 = vcombine.high %v3713_v29, %v11245_v46 }
 0x26f   : > { %v3679_v53 = vrot.slane %v3665_v40, %v7293_v52  ;;  %3988 = vrot.lane.b32.xlu1 %v8917_v59, %s6244_s22  ;;  %v8985_v28 = vpop.permute.xlu0 %2971  ;;  %v3320_v3 = vshrl.u32 %v8938_v38, 16  ;;  %v9004_v33 = vrot.slane %v3664_v35, %v7293_v52  ;;  %v9007_v59 = vrot.slane %v3698_v58, %v7293_v52 }
 0x270   : > { %11587 = vst [vmem:[#allocation41_spill] sm:$0xff] %v8991_v37  ;;  %v3219_v10 = vcombine.low %v3210_v30, %v3218_v63  ;;  %v3220_v40 = vcombine.high %v3210_v30, %v3218_v63  ;;  %v2978_v2 = vpop.permute.xlu1 %2977  ;;  %v8999_v56 = vcombine.high %v8977_v34, %v11245_v46  ;;  %v9013_v30 = vcombine.high %v8980_v61, %v11245_v46 }
 0x271   : > { %v8988_v48 = vcombine.high %v3679_v53, %v11245_v46  ;;  %11588 = vst [vmem:[#allocation53_spill] sm:$0xff] %v9004_v33  ;;  %11589 = vst [vmem:[#allocation24_spill] sm:$0xff] %v9007_v59  ;;  %v3344_v35 = vshrl.u32 %v8980_v61, 16  ;;  %v3915_v26 = vshrl.u32 %v3679_v53, 16 }
 0x272   : > { %4434 = vrot.lane.b32.xlu0 %v11517_v47, %s6245_s23  ;;  %v9016_v63 = vrot.slane %v3219_v10, %v7293_v52  ;;  %v9019_v54 = vrot.slane %v3220_v40, %v7293_v52  ;;  %v9021_v47 = vpack.i.b16 %v3321_v15, %v3320_v3  ;;  %v3916_v10 = vshrl.u32 %v3713_v29, 16 }
 0x273   : > { %11586 = vst [vmem:[#allocation43_spill] sm:$0xff] %v8988_v48  ;;  %v3920_v21 = vpack.i.b16 %v8991_v37, %v8988_v48  ;;  %3992 = vrot.lane.b32.xlu1 %v8886_v43, %s6244_s22  ;;  %v9025_v58 = vpop.permute.xlu0 %2975  ;;  %v11591_v37 = vpack.i.b16 %v8833_v1, %v8851_v18 }
 0x274   : > { %11590 = vst [vmem:[#allocation35_spill] sm:$0xff] %v9021_v47  ;;  %v9035_v40 = vcombine.high %v9016_v63, %v11245_v46  ;;  %v9039_v15 = vcombine.high %v9019_v54, %v11245_v46  ;;  %v2982_v3 = vpop.permute.xlu1 %2981  ;;  %v3345_v43 = vshrl.u32 %v9019_v54, 16  ;;  %v9046_v1 = vpack.i.b16 %v3916_v10, %v3915_v26 }
 0x275   : > { %v9031_v48 = vcombine.low %v11591_v37, %v3920_v21  ;;  %v3914_v26 = vpack.i.b16 %v3713_v29, %v3679_v53  ;;  %v11596_v29 = vpack.i.b16 %v8823_v11, %v8838_v50  ;;  %v3333_v10 = vshrl.u32 %v9016_v63, 16 }
 0x276   : > { %4438 = vrot.lane.b32.xlu0 %v11523_v5, %s6245_s23  ;;  %11593 = vst [vmem:[#allocation183_spill] sm:$0xff] %v9046_v1  ;;  %v9052_v21 = vpack.i.b16 %v3345_v43, %v3344_v35  ;;  %v3339_v62 = vshrl.u32 %v9035_v40, 16  ;;  %v9066_v43 = vcombine.high %v9004_v33, %v11245_v46  ;;  %v9070_v35 = vcombine.high %v9007_v59, %v11245_v46 }
 0x277   : > { %11592 = vst [vmem:[#allocation50_spill] sm:$0xff] %v9031_v48  ;;  %v3338_v48 = vshrl.u32 %v8999_v56, 16  ;;  %3996 = vrot.lane.b32.xlu1 %v8874_v7, %s6244_s22  ;;  %v2980_v8 = vpop.permute.xlu0 %2979  ;;  %v9077_v53 = vcombine.low %v11596_v29, %v3914_v26 }
 0x278   : > { %v2986_v18 = vpop.permute.xlu1 %2985  ;;  %11594 = vst [vmem:[#allocation184_spill] sm:$0xff] %v9066_v43  ;;  %11595 = vst [vmem:[#allocation185_spill] sm:$0xff] %v9070_v35  ;;  %v3909_v5 = vshrl.u32 %v9066_v43, 16 }
 0x279   : > { %v9062_v12 = vpack.i.b16 %v3339_v62, %v3338_v48  ;;  %11597 = vst [vmem:[#allocation186_spill] sm:$0xff] %v9077_v53  ;;  %v3910_v62 = vshrl.u32 %v9070_v35, 16  ;;  %v3332_v48 = vshrl.u32 %v8977_v34, 16  ;;  %v3101_v11 = vcombine.low %v8941_v60, %v2986_v18 }
 0x27a   : > { %4442 = vrot.lane.b32.xlu0 %v11532_v0, %s6245_s23 }
 0x27b   : > { %4000 = vrot.lane.b32.xlu1 %v8847_v45, %s6244_s22  ;;  %v2984_v37 = vpop.permute.xlu0 %2983  ;;  %v9085_v36 = vpack.i.b16 %v3910_v62, %v3909_v5  ;;  %v9087_v0 = vpack.i.b16 %v3333_v10, %v3332_v48  ;;  %v3108_v53 = vrot.slane %v3101_v11, %v6494_v13 }
 0x27c   : > { %v2990_v1 = vpop.permute.xlu1 %2989 }
 0x27d   : > { %11598 = vst [vmem:[#allocation187_spill] sm:$0xff] %v9085_v36  ;;  %11599 = vst [vmem:[#allocation188_spill] sm:$0xff] %v9087_v0  ;;  %v3135_v5 = vcombine.low %v8962_v9, %v2990_v1  ;;  %v11601_v1 = vcombine.low %v8928_v44, %v8931_v27  ;;  %v11603_v44 = vld [vmem:[#allocation111_spill] sm:$0xff] }
 0x27e   : > { %4446 = vrot.lane.b32.xlu0 %v11536_v49, %s6245_s23  ;;  %v1146_v27 = vshrl.u32 %v11603_v44, 16 }
 0x27f   : > { %4004 = vrot.lane.b32.xlu1 %v8924_v14, %s6244_s22  ;;  %v2988_v50 = vpop.permute.xlu0 %2987  ;;  %v9114_v11 = vrot.slane %v11601_v1, %v7293_v52 }
 0x280   : > { %v2994_v26 = vpop.permute.xlu1 %2993  ;;  %v3237_v9 = vcombine.low %v8985_v28, %v2988_v50  ;;  %v11602_v28 = vld [vmem:[#allocation109_spill] sm:$0xff] }
 0x281   : > { %v3109_v29 = vcombine.low %v2978_v2, %v2994_v26  ;;  %v1145_v50 = vshrl.u32 %v11602_v28, 16 }
 0x282   : > { %4450 = vrot.lane.b32.xlu0 %v11537_v24, %s6245_s23  ;;  %v11600_v24 = vcombine.low %v8737_v20, %v8740_v31 }
 0x283   : > { %v3116_v10 = vrot.slane %v3109_v29, %v6494_v13  ;;  %4008 = vrot.lane.b32.xlu1 %v8892_v19, %s6244_s22  ;;  %v2992_v49 = vpop.permute.xlu0 %2991 }
 0x284   : > { %v2998_v60 = vpop.permute.xlu1 %2997  ;;  %v9107_v2 = vrot.slane %v11600_v24, %v7293_v52 }
 0x285   : > { %v3117_v18 = vcombine.low %v3108_v53, %v3116_v10  ;;  %v3118_v62 = vcombine.high %v3108_v53, %v3116_v10  ;;  %v3143_v48 = vcombine.low %v2982_v3, %v2998_v60  ;;  %v3142_v53 = vrot.slane %v3135_v5, %v6494_v13  ;;  %v11604_v5 = vld [vmem:[#allocation130_spill] sm:$0xff] }
 0x286   : > { %4454 = vrot.lane.b32.xlu0 %v11538_v25, %s6245_s23  ;;  %v3271_v3 = vcombine.low %v9025_v58, %v2992_v49  ;;  %v1194_v58 = vshrl.u32 %v11604_v5, 16  ;;  %v9129_v49 = vcombine.high %v9107_v2, %v11245_v46 }
 0x287   : > { %v3150_v25 = vrot.slane %v3143_v48, %v6494_v13  ;;  %4412 = vrot.lane.b32.xlu1 %v8560_v32, %s6245_s23  ;;  %v2996_v20 = vpop.permute.xlu0 %2995  ;;  %v3132_v31 = vrot.slane %v3118_v62, %v7293_v52  ;;  %v3244_v32 = vrot.slane %v3237_v9, %v6494_v13  ;;  %v9133_v60 = vrot.slane %v3117_v18, %v7293_v52 }
 0x288   : > { %v3245_v26 = vcombine.low %v2980_v8, %v2996_v20  ;;  %v9138_v62 = vcombine.high %v9114_v11, %v11245_v46 }
 0x289   : > { %v3151_v29 = vcombine.low %v3142_v53, %v3150_v25  ;;  %v3152_v10 = vcombine.high %v3142_v53, %v3150_v25  ;;  %v9148_v18 = vcombine.high %v3132_v31, %v11245_v46 }
 0x28a   : > { %4458 = vrot.lane.b32.xlu0 %v11540_v57, %s6245_s23  ;;  %v3252_v8 = vrot.slane %v3245_v26, %v6494_v13  ;;  %v3278_v57 = vrot.slane %v3271_v3, %v6494_v13  ;;  %v3368_v3 = vshrl.u32 %v3132_v31, 16 }
 0x28b   : > { %v9142_v48 = vrot.slane %v3151_v29, %v7293_v52  ;;  %v3166_v24 = vrot.slane %v3152_v10, %v7293_v52  ;;  %4416 = vrot.lane.b32.xlu1 %v8730_v41, %s6245_s23  ;;  %v3000_v9 = vpop.permute.xlu0 %2999  ;;  %v9157_v29 = vcombine.high %v9133_v60, %v11245_v46 }
 0x28c   : > { %v3253_v1 = vcombine.low %v3244_v32, %v3252_v8  ;;  %v3254_v53 = vcombine.high %v3244_v32, %v3252_v8  ;;  %v3279_v25 = vcombine.low %v2984_v37, %v3000_v9  ;;  %v11606_v32 = vpack.i.b16 %v8956_v17, %v8938_v38 }
 0x28d   : > { %v9151_v20 = vcombine.high %v3166_v24, %v11245_v46  ;;  %v3369_v26 = vshrl.u32 %v3166_v24, 16  ;;  %v3367_v28 = vpack.i.b16 %v3166_v24, %v3132_v31  ;;  %v9161_v41 = vcombine.high %v9142_v48, %v11245_v46 }
 0x28e   : > { %4462 = vrot.lane.b32.xlu0 %v11541_v42, %s6245_s23  ;;  %v9164_v10 = vrot.slane %v3253_v1, %v7293_v52  ;;  %v3286_v37 = vrot.slane %v3279_v25, %v6494_v13  ;;  %v3268_v44 = vrot.slane %v3254_v53, %v7293_v52  ;;  %v11608_v1 = vld [vmem:[#allocation129_spill] sm:$0xff]  ;;  %v11609_v53 = vpack.i.b16 %v8970_v23, %v8966_v6 }
 0x28f   : > { %4420 = vrot.lane.b32.xlu1 %v8750_v39, %s6245_s23  ;;  %v9170_v42 = vpop.permute.xlu0 %3950  ;;  %v3373_v31 = vpack.i.b16 %v9151_v20, %v9148_v18  ;;  %v9174_v5 = vpack.i.b16 %v3369_v26, %v3368_v3  ;;  %v9179_v8 = vcombine.low %v11606_v32, %v3367_v28  ;;  %v1193_v25 = vshrl.u32 %v11608_v1, 16 }
 0x290   : > { %v3287_v24 = vcombine.low %v3278_v57, %v3286_v37  ;;  %v3288_v9 = vcombine.high %v3278_v57, %v3286_v37  ;;  %v1147_v39 = vpack.i.b16 %v1146_v27, %v1145_v50  ;;  %v3315_v38 = vshrl.u32 %v9138_v62, 16 }
 0x291   : > { %11605 = vst [vmem:[#allocation109_spill] sm:$0xff] %v9174_v5  ;;  %11607 = vst [vmem:[#allocation111_spill] sm:$0xff] %v9179_v8  ;;  %v9187_v36 = vcombine.low %v11609_v53, %v3373_v31  ;;  %v3269_v17 = vcombine.high %v9164_v10, %v11245_v46  ;;  %v9199_v50 = vcombine.high %v3268_v44, %v11245_v46  ;;  %v3314_v28 = vshrl.u32 %v9129_v49, 16 }
 0x292   : > { %4466 = vrot.lane.b32.xlu0 %v11546_v22, %s6245_s23  ;;  %v9195_v57 = vrot.slane %v3287_v24, %v7293_v52  ;;  %v3302_v26 = vrot.slane %v3288_v9, %v7293_v52  ;;  %v1195_v22 = vpack.i.b16 %v1194_v58, %v1193_v25  ;;  %v3362_v37 = vshrl.u32 %v9157_v29, 16 }
 0x293   : > { %11610 = vst [vmem:[#allocation130_spill] sm:$0xff] %v9187_v36  ;;  %4424 = vrot.lane.b32.xlu1 %v8766_v51, %s6245_s23  ;;  %v9203_v27 = vpop.permute.xlu0 %3954  ;;  %v3363_v31 = vshrl.u32 %v9161_v41, 16  ;;  %v3392_v58 = vshrl.u32 %v3268_v44, 16  ;;  %v1652_v51 = vshrl.u32 %v8340_v4, 16  ;;  %v9216_v25 = vpack.i.b16 %v3315_v38, %v3314_v28  ;;  %v11614_v28 = vld [vmem:[#allocation141_spill] sm:$0xff] }
 0x294   : > { %v3303_v32 = vcombine.high %v9195_v57, %v11245_v46  ;;  %v9211_v24 = vcombine.high %v3302_v26, %v11245_v46  ;;  %v3393_v9 = vshrl.u32 %v3302_v26, 16  ;;  %v3391_v1 = vpack.i.b16 %v3302_v26, %v3268_v44  ;;  %v11621_v26 = vld [vmem:[#allocation91_spill] sm:$0xff] }
 0x295   : > { %11611 = vst [vmem:[#allocation129_spill] sm:$0xff] %v9216_v25  ;;  %v9218_v53 = vpack.i.b16 %v3363_v31, %v3362_v37  ;;  %v3386_v5 = vshrl.u32 %v3269_v17, 16  ;;  %v11613_v4 = vpack.i.b16 %v9019_v54, %v8980_v61  ;;  %v1604_v37 = vshrl.u32 %v11614_v28, 16  ;;  %v11616_v61 = vld [vmem:[#allocation88_spill] sm:$0xff]  ;;  %v11620_v28 = vld [vmem:[#allocation90_spill] sm:$0xff] }
 0x296   : > { %4470 = vrot.lane.b32.xlu0 %v11554_v16, %s6245_s23  ;;  %v3397_v3 = vpack.i.b16 %v9211_v24, %v9199_v50  ;;  %v9222_v8 = vpack.i.b16 %v3393_v9, %v3392_v58  ;;  %v3387_v47 = vshrl.u32 %v3303_v32, 16  ;;  %v3385_v44 = vpack.i.b16 %v3303_v32, %v3269_v17  ;;  %v11617_v17 = vld [vmem:[#allocation64_spill] sm:$0xff] }
 0x297   : > { %11612 = vst [vmem:[#allocation189_spill] sm:$0xff] %v9218_v53  ;;  %4428 = vrot.lane.b32.xlu1 %v8772_v55, %s6245_s23  ;;  %v9226_v36 = vpop.permute.xlu0 %3958  ;;  %v9231_v16 = vcombine.low %v11613_v4, %v3391_v1  ;;  %v11615_v31 = vpack.i.b16 %v9039_v15, %v9013_v30  ;;  %v1651_v32 = vshrl.u32 %v11617_v17, 16  ;;  %v11618_v9 = vpack.i.b16 %v9035_v40, %v8999_v56 }
 0x298   : > { %v9245_v54 = vpack.i.b16 %v3387_v47, %v3386_v5  ;;  %v3380_v4 = vshrl.u32 %v9164_v10, 16  ;;  %v2471_v38 = vshrl.u32 %v11621_v26, 16  ;;  %v6053_v40 = vcombine.low %v1147_v39, %v1195_v22  ;;  %v11626_v47 = vld [vmem:[#allocation89_spill] sm:$0xff]  ;;  %v11632_v5 = vld [vmem:[#allocation62_spill] sm:$0xff] }
 0x299   : > { %v9241_v55 = vcombine.low %v11615_v31, %v3397_v3  ;;  %v9253_v1 = vcombine.low %v11618_v9, %v3385_v44  ;;  %v3381_v3 = vshrl.u32 %v9195_v57, 16  ;;  %v2470_v31 = vshrl.u32 %v11620_v28, 16  ;;  %v11623_v44 = vld [vmem:[#allocation30_spill] sm:$0xff]  ;;  %v11625_v28 = vld [vmem:[#allocation47_spill] sm:$0xff] }
 0x29a   : > { %4474 = vrot.lane.b32.xlu0 %v11616_v61, %s6245_s23  ;;  %v11622_v61 = vld [vmem:[#allocation42_spill] sm:$0xff]  ;;  %v1603_v17 = vshrl.u32 %v11623_v44, 16  ;;  %v1653_v9 = vpack.i.b16 %v1652_v51, %v1651_v32  ;;  %v2422_v43 = vshrl.u32 %v11625_v28, 16  ;;  %v2423_v35 = vshrl.u32 %v11626_v47, 16  ;;  %v11631_v47 = vld [vmem:[#allocation44_spill] sm:$0xff] }
 0x29b   : > { %11619 = vst [vmem:[#allocation141_spill] sm:$0xff] %v9253_v1  ;;  %4432 = vrot.lane.b32.xlu1 %v11622_v61, %s6245_s23  ;;  %v9265_v56 = vpop.permute.xlu0 %3962  ;;  %v9268_v58 = vpack.i.b16 %v3381_v3, %v3380_v4  ;;  %v11627_v61 = vld [vmem:[#allocation87_spill] sm:$0xff]  ;;  %v2472_v22 = vpack.i.b16 %v2471_v38, %v2470_v31  ;;  %v11628_v44 = vld [vmem:[#allocation174_spill] sm:$0xff]  ;;  %v3399_v38 = vshrl.u32 %v9211_v24, 16 }
 0x29c   : > { %v1605_v26 = vpack.i.b16 %v1604_v37, %v1603_v17  ;;  %v2935_v51 = vshrl.u32 %v11628_v44, 16  ;;  %v2424_v32 = vpack.i.b16 %v2423_v35, %v2422_v43  ;;  %v11629_v37 = vld [vmem:[#allocation172_spill] sm:$0xff]  ;;  %v11630_v3 = vld [vmem:[#allocation79_spill] sm:$0xff]  ;;  %v3351_v43 = vshrl.u32 %v9039_v15, 16  ;;  %v11634_v44 = vld [vmem:[#allocation46_spill] sm:$0xff] }
 0x29d   : > { %11624 = vst [vmem:[#allocation88_spill] sm:$0xff] %v9268_v58  ;;  %v2887_v4 = vshrl.u32 %v11629_v37, 16  ;;  %v3398_v35 = vshrl.u32 %v9199_v50, 16  ;;  %v11637_v50 = vld [vmem:[#allocation93_spill] sm:$0xff] }
 0x29e   : > { %5002 = vrot.lane.b32.xlu0 %v6053_v40, %s6243_s21  ;;  %v6069_v39 = vcombine.low %v1605_v26, %v1653_v9  ;;  %v2934_v40 = vshrl.u32 %v11630_v3, 16  ;;  %v6085_v28 = vcombine.low %v2424_v32, %v2472_v22  ;;  %v11633_v26 = vld [vmem:[#allocation40_spill] sm:$0xff]  ;;  %v11635_v32 = vld [vmem:[#allocation39_spill] sm:$0xff] }
 0x29f   : > { %4436 = vrot.lane.b32.xlu1 %v11627_v61, %s6245_s23  ;;  %v3967_v53 = vpop.permute.xlu0 %3966  ;;  %v2886_v61 = vshrl.u32 %v11632_v5, 16  ;;  %v3400_v24 = vpack.i.b16 %v3399_v38, %v3398_v35  ;;  %v3946_v37 = vshrl.u32 %v11635_v32, 16  ;;  %v11636_v3 = vld [vmem:[#allocation92_spill] sm:$0xff]  ;;  %v3904_v35 = vshrl.u32 %v9007_v59, 16  ;;  %v11656_v59 = vld [vmem:[#allocation6_spill] sm:$0xff] }
 0x2a0   : > { %v2936_v58 = vpack.i.b16 %v2935_v51, %v2934_v40  ;;  %v4180_v9 = vcombine.low %v9170_v42, %v3967_v53  ;;  %v3350_v51 = vshrl.u32 %v9013_v30, 16  ;;  %v3897_v15 = vshrl.u32 %v11636_v3, 16 }
 0x2a1   : > { %v2888_v31 = vpack.i.b16 %v2887_v4, %v2886_v61  ;;  %v3898_v53 = vshrl.u32 %v11637_v50, 16  ;;  %v3313_v40 = vpack.i.b16 %v9138_v62, %v9129_v49 }
 0x2a2   : > { %5082 = vrot.lane.b32.xlu0 %v6069_v39, %s6261_s11  ;;  %v3945_v39 = vshrl.u32 %v11633_v26, 16  ;;  %v3352_v42 = vpack.i.b16 %v3351_v43, %v3350_v51  ;;  %v4187_v30 = vrot.slane %v4180_v9, %v6494_v13 }
 0x2a3   : > { %4440 = vrot.lane.b32.xlu1 %v11631_v47, %s6245_s23  ;;  %v3971_v17 = vpop.permute.xlu0 %3970  ;;  %v6101_v5 = vcombine.low %v2888_v31, %v2936_v58  ;;  %v3361_v58 = vpack.i.b16 %v9161_v41, %v9157_v29  ;;  %v3903_v41 = vshrl.u32 %v9004_v33, 16 }
 0x2a4   : > { %v4214_v47 = vcombine.low %v9203_v27, %v3971_v17  ;;  %v6117_v38 = vcombine.low %v3352_v42, %v3400_v24  ;;  %v3947_v31 = vpack.i.b16 %v3946_v37, %v3945_v39  ;;  %v3899_v27 = vpack.i.b16 %v3898_v53, %v3897_v15  ;;  %v11642_v15 = vld [vmem:[#allocation85_spill] sm:$0xff] }
 0x2a5   : > { %v9307_v43 = vcombine.low %v3313_v40, %v3361_v58  ;;  %v9318_v39 = vpack.i.b16 %v3904_v35, %v3903_v41  ;;  %v11652_v35 = vld [vmem:[#allocation37_spill] sm:$0xff] }
 0x2a6   : > { %5162 = vrot.lane.b32.xlu0 %v6085_v28, %s6262_s12  ;;  %v11638_v28 = vld [vmem:[#allocation12_spill] sm:$0xff]  ;;  %v4221_v17 = vrot.slane %v4214_v47, %v6494_v13 }
 0x2a7   : > { %4444 = vrot.lane.b32.xlu1 %v11634_v44, %s6245_s23  ;;  %v3975_v22 = vpop.permute.xlu0 %3974  ;;  %11639 = vst [vmem:[#allocation64_spill] sm:$0xff] %v9307_v43  ;;  %11640 = vst [vmem:[#allocation90_spill] sm:$0xff] %v9318_v39 }
 0x2a8   : > { %v4188_v4 = vcombine.low %v9226_v36, %v3975_v22 }
 0x2aa   : > { %5242 = vrot.lane.b32.xlu0 %v6101_v5, %s6263_s13  ;;  %v4195_v36 = vrot.slane %v4188_v4, %v6494_v13  ;;  %v6133_v5 = vcombine.low %v3899_v27, %v3947_v31  ;;  %v11653_v31 = vld [vmem:[#allocation94_spill] sm:$0xff] }
 0x2ab   : > { %4448 = vrot.lane.b32.xlu1 %v11638_v28, %s6245_s23  ;;  %v3979_v61 = vpop.permute.xlu0 %3978  ;;  %v2399_v47 = vshrl.u32 %v11653_v31, 16 }
 0x2ac   : > { %v4196_v49 = vcombine.low %v4187_v30, %v4195_v36  ;;  %v4197_v62 = vcombine.high %v4187_v30, %v4195_v36  ;;  %v4222_v29 = vcombine.low %v9265_v56, %v3979_v61  ;;  %v11641_v56 = vld [vmem:[#allocation29_spill] sm:$0xff] }
 0x2ae   : > { %5322 = vrot.lane.b32.xlu0 %v6117_v38, %s6264_s14  ;;  %v9315_v9 = vrot.slane %v4196_v49, %v7293_v52  ;;  %v4229_v26 = vrot.slane %v4222_v29, %v6494_v13  ;;  %v9321_v44 = vrot.slane %v4197_v62, %v7293_v52  ;;  %v9372_v62 = vpop.permute.xlu1 %3948  ;;  %v3379_v29 = vpack.i.b16 %v9195_v57, %v9164_v10  ;;  %v11647_v57 = vld [vmem:[#allocation127_spill] sm:$0xff] }
 0x2af   : > { %4452 = vrot.lane.b32.xlu1 %v11641_v56, %s6245_s23  ;;  %v9325_v22 = vpop.permute.xlu0 %3982 }
 0x2b0   : > { %v4230_v51 = vcombine.low %v4221_v17, %v4229_v26  ;;  %v4231_v24 = vcombine.high %v4221_v17, %v4229_v26  ;;  %v9330_v32 = vcombine.high %v9315_v9, %v11245_v46  ;;  %v9340_v3 = vcombine.high %v9321_v44, %v11245_v46  ;;  %v11645_v26 = vld [vmem:[#allocation128_spill] sm:$0xff] }
 0x2b1   : > { %v4355_v50 = vshrl.u32 %v9321_v44, 16  ;;  %v1170_v56 = vshrl.u32 %v11645_v26, 16 }
 0x2b2   : > { %5402 = vrot.lane.b32.xlu0 %v6133_v5, %s6265_s17  ;;  %v9333_v37 = vrot.slane %v4230_v51, %v7293_v52  ;;  %v9336_v4 = vrot.slane %v4231_v24, %v7293_v52  ;;  %v4349_v28 = vshrl.u32 %v9330_v32, 16  ;;  %v11646_v51 = vld [vmem:[#allocation108_spill] sm:$0xff]  ;;  %v1169_v24 = vshrl.u32 %v11647_v57, 16 }
 0x2b3   : > { %4456 = vrot.lane.b32.xlu1 %v11642_v15, %s6245_s23  ;;  %v9344_v42 = vpop.permute.xlu0 %3986  ;;  %v1122_v10 = vshrl.u32 %v11646_v51, 16  ;;  %v11654_v51 = vld [vmem:[#allocation96_spill] sm:$0xff] }
 0x2b4   : > { %v9349_v53 = vcombine.high %v9333_v37, %v11245_v46  ;;  %v9353_v40 = vcombine.high %v9336_v4, %v11245_v46  ;;  %v4356_v58 = vshrl.u32 %v9336_v4, 16  ;;  %v2446_v30 = vshrl.u32 %v11654_v51, 16 }
 0x2b6   : > { %v9360_v36 = vpack.i.b16 %v4356_v58, %v4355_v50  ;;  %v4350_v61 = vshrl.u32 %v9349_v53, 16  ;;  %v11649_v50 = vld [vmem:[#allocation95_spill] sm:$0xff] }
 0x2b7   : > { %4460 = vrot.lane.b32.xlu1 %v8874_v7, %s6245_s23  ;;  %v3991_v38 = vpop.permute.xlu0 %3990  ;;  %v11643_v7 = vpack.i.b16 %v9016_v63, %v8977_v34  ;;  %v2447_v58 = vshrl.u32 %v11649_v50, 16  ;;  %v11650_v34 = vld [vmem:[#allocation107_spill] sm:$0xff]  ;;  %v3308_v50 = vshrl.u32 %v9107_v2, 16 }
 0x2b8   : > { %v9370_v49 = vpack.i.b16 %v4350_v61, %v4349_v28  ;;  %v1121_v63 = vshrl.u32 %v11650_v34, 16  ;;  %v1171_v61 = vpack.i.b16 %v1170_v56, %v1169_v24  ;;  %v3356_v34 = vshrl.u32 %v9133_v60, 16  ;;  %v11655_v24 = vld [vmem:[#allocation138_spill] sm:$0xff] }
 0x2b9   : > { %v9383_v27 = vcombine.low %v11643_v7, %v3379_v29  ;;  %v3309_v29 = vshrl.u32 %v9114_v11, 16  ;;  %v11651_v7 = vld [vmem:[#allocation139_spill] sm:$0xff]  ;;  %v3357_v56 = vshrl.u32 %v9142_v48, 16  ;;  %v1579_v33 = vshrl.u32 %v11655_v24, 16 }
 0x2ba   : > { %v9385_v17 = vpop.permute.xlu1 %3952  ;;  %v1580_v26 = vshrl.u32 %v11651_v7, 16  ;;  %v2448_v39 = vpack.i.b16 %v2447_v58, %v2446_v30 }
 0x2bb   : > { %4464 = vrot.lane.b32.xlu1 %v8847_v45, %s6245_s23  ;;  %v9378_v41 = vpop.permute.xlu0 %3994  ;;  %11644 = vst [vmem:[#allocation91_spill] sm:$0xff] %v9383_v27  ;;  %v11648_v45 = vld [vmem:[#allocation164_spill] sm:$0xff]  ;;  %v11657_v27 = vld [vmem:[#allocation173_spill] sm:$0xff] }
 0x2bc   : > { %v1628_v15 = vshrl.u32 %v11648_v45, 16  ;;  %v1123_v45 = vpack.i.b16 %v1122_v10, %v1121_v63  ;;  %v2863_v43 = vshrl.u32 %v11657_v27, 16  ;;  %v9414_v10 = vpack.i.b16 %v3357_v56, %v3356_v34  ;;  %v11662_v34 = vld [vmem:[#allocation81_spill] sm:$0xff] }
 0x2bd   : > { %v1581_v0 = vpack.i.b16 %v1580_v26, %v1579_v33  ;;  %v2910_v56 = vshrl.u32 %v11662_v34, 16  ;;  %v3375_v33 = vshrl.u32 %v9151_v20, 16  ;;  %v3307_v20 = vpack.i.b16 %v9114_v11, %v9107_v2 }
 0x2be   : > { %v6045_v51 = vcombine.low %v1123_v45, %v1171_v61  ;;  %11659 = vst [vmem:[#allocation30_spill] sm:$0xff] %v9414_v10 }
 0x2bf   : > { %4468 = vrot.lane.b32.xlu1 %v8924_v14, %s6245_s23  ;;  %v3999_v5 = vpop.permute.xlu0 %3998  ;;  %v1627_v14 = vshrl.u32 %v11652_v35, 16  ;;  %v2398_v35 = vshrl.u32 %v11656_v59, 16  ;;  %v11661_v59 = vld [vmem:[#allocation177_spill] sm:$0xff] }
 0x2c0   : > { %v4248_v63 = vcombine.low %v9325_v22, %v3999_v5  ;;  %v2911_v30 = vshrl.u32 %v11661_v59, 16  ;;  %v11663_v22 = vld [vmem:[#allocation43_spill] sm:$0xff] }
 0x2c1   : > { %v9394_v28 = vpop.permute.xlu1 %3956  ;;  %v1629_v7 = vpack.i.b16 %v1628_v15, %v1627_v14  ;;  %v2400_v25 = vpack.i.b16 %v2399_v47, %v2398_v35  ;;  %v11660_v15 = vld [vmem:[#allocation74_spill] sm:$0xff]  ;;  %v3921_v47 = vshrl.u32 %v11663_v22, 16 }
 0x2c2   : > { %v2862_v14 = vshrl.u32 %v11660_v15, 16  ;;  %v4255_v5 = vrot.slane %v4248_v63, %v6494_v13 }
 0x2c3   : > { %4472 = vrot.lane.b32.xlu1 %v8892_v19, %s6245_s23  ;;  %v4003_v57 = vpop.permute.xlu0 %4002  ;;  %v9412_v19 = vpack.i.b16 %v3309_v29, %v3308_v50  ;;  %v6061_v27 = vcombine.low %v1581_v0, %v1629_v7  ;;  %v6077_v29 = vcombine.low %v2400_v25, %v2448_v39  ;;  %v2912_v25 = vpack.i.b16 %v2911_v30, %v2910_v56  ;;  %v11664_v39 = vld [vmem:[#allocation41_spill] sm:$0xff] }
 0x2c4   : > { %v2864_v50 = vpack.i.b16 %v2863_v43, %v2862_v14  ;;  %v4282_v26 = vcombine.low %v9344_v42, %v4003_v57  ;;  %v3374_v43 = vshrl.u32 %v9148_v18, 16  ;;  %v3327_v57 = vshrl.u32 %v8970_v23, 16 }
 0x2c5   : > { %v9409_v31 = vpop.permute.xlu1 %3960  ;;  %11658 = vst [vmem:[#allocation42_spill] sm:$0xff] %v9412_v19  ;;  %v4343_v23 = vshrl.u32 %v9315_v9, 16 }
 0x2c6   : > { %v4289_v18 = vrot.slane %v4282_v26, %v6494_v13  ;;  %v6093_v56 = vcombine.low %v2864_v50, %v2912_v25 }
 0x2c7   : > { %4986 = vrot.lane.b32.xlu1 %v6045_v51, %s6243_s21  ;;  %v4007_v24 = vpop.permute.xlu0 %4006  ;;  %v3355_v51 = vpack.i.b16 %v9142_v48, %v9133_v60  ;;  %v3326_v60 = vshrl.u32 %v8966_v6, 16  ;;  %v3376_v48 = vpack.i.b16 %v3375_v33, %v3374_v43  ;;  %v4362_v6 = vshrl.u32 %v9353_v40, 16 }
 0x2c8   : > { %v4256_v61 = vcombine.low %v3991_v38, %v4007_v24  ;;  %v3922_v38 = vshrl.u32 %v11664_v39, 16 }
 0x2c9   : > { %v3965_v45 = vpop.permute.xlu1 %3964  ;;  %v9438_v14 = vcombine.low %v3307_v20, %v3355_v51  ;;  %v3328_v33 = vpack.i.b16 %v3327_v57, %v3326_v60  ;;  %v11667_v51 = vld [vmem:[#allocation19_spill] sm:$0xff] }
 0x2ca   : > { %v4263_v35 = vrot.slane %v4256_v61, %v6494_v13  ;;  %v3923_v15 = vpack.i.b16 %v3922_v38, %v3921_v47  ;;  %v4344_v61 = vshrl.u32 %v9333_v37, 16 }
 0x2cb   : > { %5066 = vrot.lane.b32.xlu1 %v6061_v27, %s6261_s11  ;;  %v4011_v0 = vpop.permute.xlu0 %4010  ;;  %11665 = vst [vmem:[#allocation47_spill] sm:$0xff] %v9438_v14  ;;  %v6109_v39 = vcombine.low %v3328_v33, %v3376_v48 }
 0x2cc   : > { %v4264_v7 = vcombine.low %v4255_v5, %v4263_v35  ;;  %v4265_v63 = vcombine.high %v4255_v5, %v4263_v35  ;;  %v4290_v42 = vcombine.low %v9378_v41, %v4011_v0  ;;  %v4044_v41 = vcombine.low %v9372_v62, %v3965_v45 }
 0x2cd   : > { %v3969_v24 = vpop.permute.xlu1 %3968  ;;  %v4361_v45 = vshrl.u32 %v9340_v3, 16  ;;  %v9457_v5 = vpack.i.b16 %v4344_v61, %v4343_v23  ;;  %v6125_v50 = vcombine.low %v11667_v51, %v3923_v15  ;;  %v11670_v61 = vpack.i.b16 %v9336_v4, %v9321_v44 }
 0x2ce   : > { %v9442_v59 = vrot.slane %v4264_v7, %v7293_v52  ;;  %v4279_v2 = vrot.slane %v4265_v63, %v7293_v52  ;;  %v4297_v11 = vrot.slane %v4290_v42, %v6494_v13  ;;  %v9466_v0 = vrot.slane %v4044_v41, %v6494_v13 }
 0x2cf   : > { %v9447_v30 = vpop.permute.xlu0 %4414  ;;  %5146 = vrot.lane.b32.xlu1 %v6077_v29, %s6262_s12  ;;  %11666 = vst [vmem:[#allocation89_spill] sm:$0xff] %v9457_v5  ;;  %v4078_v25 = vcombine.low %v9385_v17, %v3969_v24  ;;  %v4363_v38 = vpack.i.b16 %v4362_v6, %v4361_v45 }
 0x2d0   : > { %v4298_v27 = vcombine.low %v4289_v18, %v4297_v11  ;;  %v4299_v34 = vcombine.high %v4289_v18, %v4297_v11  ;;  %v4280_v22 = vcombine.high %v9442_v59, %v11245_v46  ;;  %v4281_v47 = vcombine.high %v4279_v2, %v11245_v46  ;;  %11668 = vst [vmem:[#allocation87_spill] sm:$0xff] %v9466_v0 }
 0x2d1   : > { %v3973_v62 = vpop.permute.xlu1 %3972  ;;  %v4403_v60 = vshrl.u32 %v4279_v2, 16 }
 0x2d2   : > { %v9460_v29 = vrot.slane %v4298_v27, %v7293_v52  ;;  %v4313_v26 = vrot.slane %v4299_v34, %v7293_v52  ;;  %v4052_v35 = vcombine.low %v9394_v28, %v3973_v62  ;;  %v4409_v57 = vshrl.u32 %v4281_v47, 16 }
 0x2d3   : > { %v9469_v43 = vpop.permute.xlu0 %4418  ;;  %5226 = vrot.lane.b32.xlu1 %v6093_v56, %s6263_s13  ;;  %v4397_v17 = vshrl.u32 %v4280_v22, 16  ;;  %v9492_v34 = vrot.slane %v4078_v25, %v6494_v13 }
 0x2d4   : > { %v4314_v20 = vcombine.high %v9460_v29, %v11245_v46  ;;  %v4315_v7 = vcombine.high %v4313_v26, %v11245_v46  ;;  %v9476_v28 = vrot.slane %v4052_v35, %v6494_v13  ;;  %v4404_v63 = vshrl.u32 %v4313_v26, 16 }
 0x2d5   : > { %v3977_v42 = vpop.permute.xlu1 %3976  ;;  %v4402_v15 = vpack.i.b16 %v4313_v26, %v4279_v2 }
 0x2d6   : > { %11669 = vst [vmem:[#allocation174_spill] sm:$0xff] %v9476_v28  ;;  %v4061_v48 = vcombine.high %v9466_v0, %v9476_v28  ;;  %v4086_v18 = vcombine.low %v9409_v31, %v3977_v42  ;;  %v4410_v11 = vshrl.u32 %v4315_v7, 16  ;;  %v4408_v6 = vpack.i.b16 %v4315_v7, %v4281_v47 }
 0x2d7   : > { %v4423_v41 = vpop.permute.xlu0 %4422  ;;  %5306 = vrot.lane.b32.xlu1 %v6109_v39, %s6264_s14  ;;  %v9484_v23 = vpack.i.b16 %v4404_v63, %v4403_v60  ;;  %v9489_v2 = vcombine.low %v11670_v61, %v4402_v15  ;;  %v4398_v27 = vshrl.u32 %v4314_v20, 16  ;;  %v11671_v47 = vpack.i.b16 %v9353_v40, %v9340_v3 }
 0x2d8   : > { %v9495_v56 = vrot.slane %v4061_v48, %v7293_v52  ;;  %v9498_v31 = vrot.slane %v4086_v18, %v6494_v13  ;;  %v4411_v33 = vpack.i.b16 %v4410_v11, %v4409_v57  ;;  %v4396_v26 = vpack.i.b16 %v4314_v20, %v4280_v22 }
 0x2d9   : > { %v3981_v62 = vpop.permute.xlu1 %3980  ;;  %v9503_v45 = vcombine.low %v11671_v47, %v4408_v6  ;;  %v9507_v4 = vpack.i.b16 %v4398_v27, %v4397_v17  ;;  %v11672_v40 = vpack.i.b16 %v9349_v53, %v9330_v32 }
 0x2da   : > { %v4095_v51 = vcombine.high %v9492_v34, %v9498_v31  ;;  %v6149_v39 = vcombine.low %v4363_v38, %v4411_v33  ;;  %v9526_v20 = vcombine.high %v9495_v56, %v11245_v46  ;;  %v4331_v63 = vshrl.u32 %v9495_v56, 16 }
 0x2db   : > { %5386 = vrot.lane.b32.xlu1 %v6125_v50, %s6265_s17  ;;  %v9519_v7 = vcombine.low %v11672_v40, %v4396_v26 }
 0x2dc   : > { %v4427_v25 = vpop.permute.xlu0 %4426  ;;  %v9522_v22 = vrot.slane %v4095_v51, %v7293_v52  ;;  %5482 = vrot.lane.b32.xlu0 %v6149_v39, %s6266_s18 }
 0x2dd   : > { %11673 = vst [vmem:[#allocation172_spill] sm:$0xff] %v9519_v7  ;;  %v3985_v50 = vpop.permute.xlu1 %3984 }
 0x2de   : > { %v9531_v38 = vcombine.high %v9522_v22, %v11245_v46  ;;  %v4332_v32 = vshrl.u32 %v9522_v22, 16 }
 0x2e0   : > { %v4431_v42 = vpop.permute.xlu0 %4430  ;;  %v9539_v60 = vpack.i.b16 %v4332_v32, %v4331_v63  ;;  %v11677_v1 = vpack.i.b16 %v9531_v38, %v9526_v20 }
 0x2e1   : > { %v3989_v15 = vpop.permute.xlu1 %3988  ;;  %v4644_v18 = vcombine.low %v9447_v30, %v4431_v42 }
 0x2e3   : > { %v4651_v27 = vrot.slane %v4644_v18, %v6494_v13 }
 0x2e4   : > { %v4435_v17 = vpop.permute.xlu0 %4434 }
 0x2e5   : > { %v3993_v48 = vpop.permute.xlu1 %3992  ;;  %v4678_v33 = vcombine.low %v9469_v43, %v4435_v17  ;;  %v4391_v43 = vshrl.u32 %v9442_v59, 16  ;;  %v4392_v17 = vshrl.u32 %v9460_v29, 16 }
 0x2e7   : > { %v4685_v58 = vrot.slane %v4678_v33, %v6494_v13 }
 0x2e8   : > { %v4439_v11 = vpop.permute.xlu0 %4438 }
 0x2e9   : > { %v4652_v6 = vcombine.low %v4423_v41, %v4439_v11  ;;  %v3997_v61 = vpop.permute.xlu1 %3996 }
 0x2ea   : > { %v4112_v42 = vcombine.low %v3981_v62, %v3997_v61 }
 0x2eb   : > { %v4659_v47 = vrot.slane %v4652_v6, %v6494_v13 }
 0x2ec   : > { %v4443_v51 = vpop.permute.xlu0 %4442 }
 0x2ed   : > { %v4660_v39 = vcombine.low %v4651_v27, %v4659_v47  ;;  %v4686_v40 = vcombine.low %v4427_v25, %v4443_v51  ;;  %v4661_v63 = vcombine.high %v4651_v27, %v4659_v47  ;;  %v4001_v32 = vpop.permute.xlu1 %4000  ;;  %v9559_v47 = vpack.i.b16 %v4392_v17, %v4391_v43 }
 0x2ef   : > { %v4693_v30 = vrot.slane %v4686_v40, %v6494_v13  ;;  %v9550_v41 = vrot.slane %v4660_v39, %v7293_v52  ;;  %v9557_v25 = vrot.slane %v4661_v63, %v7293_v52  ;;  %11674 = vst [vmem:[#allocation79_spill] sm:$0xff] %v9559_v47  ;;  %v9572_v39 = vrot.slane %v4112_v42, %v6494_v13 }
 0x2f0   : > { %v9552_v18 = vpop.permute.xlu0 %4446 }
 0x2f1   : > { %v4694_v11 = vcombine.low %v4685_v58, %v4693_v30  ;;  %v4695_v6 = vcombine.high %v4685_v58, %v4693_v30  ;;  %v4005_v27 = vpop.permute.xlu1 %4004  ;;  %v9569_v61 = vcombine.high %v9550_v41, %v11245_v46  ;;  %v4146_v30 = vcombine.low %v3985_v50, %v4001_v32 }
 0x2f2   : > { %v4120_v62 = vcombine.low %v3989_v15, %v4005_v27 }
 0x2f3   : > { %v9562_v33 = vrot.slane %v4694_v11, %v7293_v52  ;;  %v9565_v51 = vrot.slane %v4695_v6, %v7293_v52  ;;  %v4819_v11 = vshrl.u32 %v9557_v25, 16  ;;  %v4813_v32 = vshrl.u32 %v9569_v61, 16 }
 0x2f4   : > { %v9574_v58 = vpop.permute.xlu0 %4450  ;;  %v9583_v43 = vrot.slane %v4120_v62, %v6494_v13  ;;  %v9600_v3 = vrot.slane %v4146_v30, %v6494_v13 }
 0x2f5   : > { %v9580_v63 = vcombine.high %v9562_v33, %v11245_v46  ;;  %v4820_v15 = vshrl.u32 %v9565_v51, 16  ;;  %v4009_v17 = vpop.permute.xlu1 %4008 }
 0x2f6   : > { %11675 = vst [vmem:[#allocation44_spill] sm:$0xff] %v9583_v43  ;;  %v4129_v27 = vcombine.high %v9572_v39, %v9583_v43  ;;  %v4154_v40 = vcombine.low %v3993_v48, %v4009_v17 }
 0x2f7   : > { %v9593_v50 = vpack.i.b16 %v4820_v15, %v4819_v11  ;;  %v4814_v62 = vshrl.u32 %v9580_v63, 16  ;;  %v4337_v15 = vshrl.u32 %v9526_v20, 16 }
 0x2f8   : > { %v4455_v24 = vpop.permute.xlu0 %4454  ;;  %v4143_v44 = vrot.slane %v4129_v27, %v7293_v52  ;;  %v9604_v6 = vrot.slane %v4154_v40, %v6494_v13  ;;  %v4338_v27 = vshrl.u32 %v9531_v38, 16 }
 0x2f9   : > { %v4413_v42 = vpop.permute.xlu1 %4412  ;;  %v9606_v48 = vpack.i.b16 %v4814_v62, %v4813_v32 }
 0x2fa   : > { %v4163_v17 = vcombine.high %v9600_v3, %v9604_v6  ;;  %v4145_v35 = vcombine.high %v4143_v44, %v11245_v46  ;;  %v4379_v57 = vshrl.u32 %v4143_v44, 16  ;;  %v4339_v28 = vpack.i.b16 %v4338_v27, %v4337_v15 }
 0x2fc   : > { %v4459_v11 = vpop.permute.xlu0 %4458  ;;  %v4177_v30 = vrot.slane %v4163_v17, %v7293_v52  ;;  %v4385_v14 = vshrl.u32 %v4145_v35, 16  ;;  %v11676_v17 = vpack.i.b16 %v9522_v22, %v9495_v56 }
 0x2fd   : > { %v9614_v26 = vpop.permute.xlu1 %4416 }
 0x2fe   : > { %v4179_v40 = vcombine.high %v4177_v30, %v11245_v46  ;;  %v4380_v32 = vshrl.u32 %v4177_v30, 16  ;;  %v4378_v62 = vpack.i.b16 %v4177_v30, %v4143_v44 }
 0x300   : > { %v4463_v53 = vpop.permute.xlu0 %4462  ;;  %v4386_v10 = vshrl.u32 %v4179_v40, 16  ;;  %v4384_v19 = vpack.i.b16 %v4179_v40, %v4145_v35  ;;  %v9619_v47 = vpack.i.b16 %v4380_v32, %v4379_v57  ;;  %v9624_v7 = vcombine.low %v11676_v17, %v4378_v62 }
 0x301   : > { %v4421_v5 = vpop.permute.xlu1 %4420  ;;  %v4712_v40 = vcombine.low %v9552_v18, %v4463_v53  ;;  %v11678_v53 = vpack.i.b16 %v9333_v37, %v9315_v9  ;;  %v4808_v37 = vshrl.u32 %v9562_v33, 16 }
 0x302   : > { %v4387_v0 = vpack.i.b16 %v4386_v10, %v4385_v14  ;;  %v9629_v44 = vcombine.low %v11677_v1, %v4384_v19  ;;  %v4390_v19 = vpack.i.b16 %v9460_v29, %v9442_v59  ;;  %v9654_v29 = vcombine.high %v9565_v51, %v11245_v46 }
 0x303   : > { %v4719_v10 = vrot.slane %v4712_v40, %v6494_v13  ;;  %v4807_v40 = vshrl.u32 %v9550_v41, 16 }
 0x304   : > { %v4467_v43 = vpop.permute.xlu0 %4466  ;;  %v6141_v35 = vcombine.low %v4339_v28, %v4387_v0  ;;  %v9643_v18 = vcombine.low %v11678_v53, %v4390_v19 }
 0x305   : > { %v4425_v57 = vpop.permute.xlu1 %4424  ;;  %v4746_v14 = vcombine.low %v9574_v58, %v4467_v43  ;;  %v9675_v19 = vpack.i.b16 %v4808_v37, %v4807_v40 }
 0x306   : > { %5466 = vrot.lane.b32.xlu1 %v6141_v35, %s6266_s18  ;;  %11679 = vst [vmem:[#allocation62_spill] sm:$0xff] %v9643_v18 }
 0x307   : > { %v4753_v58 = vrot.slane %v4746_v14, %v6494_v13  ;;  %11680 = vst [vmem:[#allocation40_spill] sm:$0xff] %v9675_v19 }
 0x308   : > { %v4471_v56 = vpop.permute.xlu0 %4470 }
 0x309   : > { %v4720_v22 = vcombine.low %v4455_v24, %v4471_v56  ;;  %v4429_v32 = vpop.permute.xlu1 %4428  ;;  %v9647_v24 = vcombine.high %v9557_v25, %v11245_v46 }
 0x30a   : > { %v4508_v9 = vcombine.low %v4413_v42, %v4429_v32 }
 0x30b   : > { %v4727_v1 = vrot.slane %v4720_v22, %v6494_v13  ;;  %v4825_v14 = vshrl.u32 %v9647_v24, 16 }
 0x30c   : > { %v4475_v20 = vpop.permute.xlu0 %4474  ;;  %v9672_v32 = vrot.slane %v4508_v9, %v6494_v13 }
 0x30d   : > { %v4728_v38 = vcombine.low %v4719_v10, %v4727_v1  ;;  %v4729_v0 = vcombine.high %v4719_v10, %v4727_v1  ;;  %v4754_v28 = vcombine.low %v4459_v11, %v4475_v20  ;;  %v4433_v15 = vpop.permute.xlu1 %4432  ;;  %v4826_v1 = vshrl.u32 %v9654_v29, 16 }
 0x30f   : > { %v4743_v43 = vrot.slane %v4729_v0, %v7293_v52  ;;  %v4761_v59 = vrot.slane %v4754_v28, %v6494_v13  ;;  %v9657_v11 = vrot.slane %v4728_v38, %v7293_v52  ;;  %v4827_v18 = vpack.i.b16 %v4826_v1, %v4825_v14 }
 0x311   : > { %v4762_v27 = vcombine.low %v4753_v58, %v4761_v59  ;;  %v4763_v62 = vcombine.high %v4753_v58, %v4761_v59  ;;  %v9661_v17 = vcombine.high %v4743_v43, %v11245_v46  ;;  %v4437_v35 = vpop.permute.xlu1 %4436  ;;  %v4744_v42 = vcombine.high %v9657_v11, %v11245_v46 }
 0x312   : > { %v4516_v10 = vcombine.low %v4421_v5, %v4437_v35  ;;  %v4542_v5 = vcombine.low %v9614_v26, %v4433_v15  ;;  %v4867_v58 = vshrl.u32 %v4743_v43, 16  ;;  %v11681_v26 = vpack.i.b16 %v9565_v51, %v9557_v25 }
 0x313   : > { %v9665_v56 = vrot.slane %v4762_v27, %v7293_v52  ;;  %v4777_v22 = vrot.slane %v4763_v62, %v7293_v52  ;;  %v4873_v53 = vshrl.u32 %v9661_v17, 16 }
 0x314   : > { %v9684_v0 = vrot.slane %v4516_v10, %v6494_v13  ;;  %v4861_v10 = vshrl.u32 %v4744_v42, 16 }
 0x315   : > { %v4778_v20 = vcombine.high %v9665_v56, %v11245_v46  ;;  %v9680_v38 = vcombine.high %v4777_v22, %v11245_v46  ;;  %v4441_v28 = vpop.permute.xlu1 %4440  ;;  %v4868_v59 = vshrl.u32 %v4777_v22, 16  ;;  %v4866_v9 = vpack.i.b16 %v4777_v22, %v4743_v43 }
 0x316   : > { %v4525_v27 = vcombine.high %v9672_v32, %v9684_v0  ;;  %v4550_v62 = vcombine.low %v4425_v57, %v4441_v28  ;;  %v9700_v43 = vrot.slane %v4542_v5, %v6494_v13 }
 0x317   : > { %v4874_v35 = vshrl.u32 %v9680_v38, 16  ;;  %v9692_v40 = vpack.i.b16 %v4868_v59, %v4867_v58  ;;  %v9697_v15 = vcombine.low %v11681_v26, %v4866_v9  ;;  %v4862_v30 = vshrl.u32 %v4778_v20, 16  ;;  %v11688_v9 = vld [vmem:[#allocation33_spill] sm:$0xff] }
 0x318   : > { %v9703_v22 = vrot.slane %v4550_v62, %v6494_v13  ;;  %v9710_v25 = vrot.slane %v4525_v27, %v7293_v52  ;;  %v4860_v14 = vpack.i.b16 %v4778_v20, %v4744_v42  ;;  %v11683_v42 = vld [vmem:[#allocation133_spill] sm:$0xff] }
 0x319   : > { %v4445_v37 = vpop.permute.xlu1 %4444  ;;  %v4875_v57 = vpack.i.b16 %v4874_v35, %v4873_v53  ;;  %v9707_v58 = vpack.i.b16 %v4862_v30, %v4861_v10  ;;  %v11682_v53 = vpack.i.b16 %v9580_v63, %v9569_v61  ;;  %v11684_v10 = vld [vmem:[#allocation169_spill] sm:$0xff]  ;;  %v4806_v63 = vpack.i.b16 %v9562_v33, %v9550_v41 }
 0x31a   : > { %v4559_v5 = vcombine.high %v9700_v43, %v9703_v22  ;;  %v4795_v62 = vshrl.u32 %v9710_v25, 16 }
 0x31b   : > { %v6165_v59 = vcombine.low %v4827_v18, %v4875_v57  ;;  %v9723_v27 = vcombine.low %v11682_v53, %v4860_v14  ;;  %v4855_v53 = vshrl.u32 %v9657_v11, 16 }
 0x31c   : > { %v4573_v1 = vrot.slane %v4559_v5, %v7293_v52  ;;  %v11685_v5 = vld [vmem:[#allocation34_spill] sm:$0xff] }
 0x31d   : > { %5562 = vrot.lane.b32.xlu0 %v6165_v59, %s6267_s19  ;;  %v4449_v30 = vpop.permute.xlu1 %4448  ;;  %v11686_v59 = vld [vmem:[#allocation82_spill] sm:$0xff] }
 0x31e   : > { %v4796_v35 = vshrl.u32 %v4573_v1, 16  ;;  %v4794_v18 = vpack.i.b16 %v4573_v1, %v9710_v25 }
 0x320   : > { %v9727_v26 = vpack.i.b16 %v4796_v35, %v4795_v62  ;;  %v4856_v62 = vshrl.u32 %v9665_v56, 16 }
 0x321   : > { %5000 = vrot.lane.b32.xlu0 %v11683_v42, %s6243_s21  ;;  %v4453_v20 = vpop.permute.xlu1 %4452 }
 0x322   : > { %v9741_v42 = vpack.i.b16 %v4856_v62, %v4855_v53  ;;  %v4872_v53 = vpack.i.b16 %v9680_v38, %v9661_v17 }
 0x324   : > { %11687 = vst [vmem:[#allocation46_spill] sm:$0xff] %v9741_v42 }
 0x325   : > { %5080 = vrot.lane.b32.xlu0 %v11684_v10, %s6261_s11  ;;  %v4457_v57 = vpop.permute.xlu1 %4456 }
 0x329   : > { %5160 = vrot.lane.b32.xlu0 %v11685_v5, %s6262_s12  ;;  %v4461_v61 = vpop.permute.xlu1 %4460 }
 0x32a   : > { %v4576_v35 = vcombine.low %v4445_v37, %v4461_v61 }
 0x32c   : > { %v9748_v41 = vrot.slane %v4576_v35, %v6494_v13  ;;  %v4575_v35 = vcombine.high %v4573_v1, %v11245_v46 }
 0x32d   : > { %5240 = vrot.lane.b32.xlu0 %v11686_v59, %s6263_s13  ;;  %v4465_v14 = vpop.permute.xlu1 %4464 }
 0x32e   : > { %v4610_v33 = vcombine.low %v4449_v30, %v4465_v14 }
 0x330   : > { %v9762_v62 = vrot.slane %v4610_v33, %v6494_v13 }
 0x331   : > { %5320 = vrot.lane.b32.xlu0 %v9241_v55, %s6264_s14  ;;  %v4469_v10 = vpop.permute.xlu1 %4468 }
 0x332   : > { %v4584_v5 = vcombine.low %v4453_v20, %v4469_v10  ;;  %v4541_v10 = vcombine.high %v9710_v25, %v11245_v46  ;;  %v11690_v25 = vld [vmem:[#allocation61_spill] sm:$0xff] }
 0x334   : > { %v9751_v59 = vrot.slane %v4584_v5, %v6494_v13 }
 0x335   : > { %5400 = vrot.lane.b32.xlu0 %v11688_v9, %s6265_s17  ;;  %v4473_v37 = vpop.permute.xlu1 %4472  ;;  %v4824_v9 = vpack.i.b16 %v9654_v29, %v9647_v24  ;;  %v4802_v24 = vshrl.u32 %v4575_v35, 16 }
 0x336   : > { %v4593_v55 = vcombine.high %v9748_v41, %v9751_v59  ;;  %v4618_v20 = vcombine.low %v4457_v57, %v4473_v37  ;;  %v4801_v37 = vshrl.u32 %v4541_v10, 16 }
 0x337   : > { %v6164_v38 = vcombine.low %v4824_v9, %v4872_v53  ;;  %v11689_v53 = vld [vmem:[#allocation112_spill] sm:$0xff] }
 0x338   : > { %v4607_v30 = vrot.slane %v4593_v55, %v7293_v52  ;;  %v9766_v14 = vrot.slane %v4618_v20, %v6494_v13  ;;  %v11691_v9 = vcombine.low %v11689_v53, %v11690_v25  ;;  %v11705_v25 = vld [vmem:[#allocation100_spill] sm:$0xff] }
 0x339   : > { %5480 = vrot.lane.b32.xlu0 %v9503_v45, %s6266_s18 }
 0x33a   : > { %v4627_v17 = vcombine.high %v9762_v62, %v9766_v14  ;;  %v4609_v13 = vcombine.high %v4607_v30, %v11245_v46  ;;  %v4843_v29 = vshrl.u32 %v4607_v30, 16 }
 0x33c   : > { %v4641_v5 = vrot.slane %v4627_v17, %v7293_v52  ;;  %v4849_v55 = vshrl.u32 %v4609_v13, 16  ;;  %v4803_v17 = vpack.i.b16 %v4802_v24, %v4801_v37  ;;  %v4854_v24 = vpack.i.b16 %v9665_v56, %v9657_v11  ;;  %v11700_v37 = vld [vmem:[#allocation78_spill] sm:$0xff]  ;;  %v11706_v11 = vld [vmem:[#allocation23_spill] sm:$0xff]  ;;  %v11707_v56 = vld [vmem:[#allocation101_spill] sm:$0xff] }
 0x33d   : > { %5560 = vrot.lane.b32.xlu0 %v6164_v38, %s6267_s19 }
 0x33e   : > { %v4643_v45 = vcombine.high %v4641_v5, %v11245_v46  ;;  %v4844_v1 = vshrl.u32 %v4641_v5, 16  ;;  %v4842_v33 = vpack.i.b16 %v4641_v5, %v4607_v30  ;;  %v11692_v30 = vld [vmem:[#allocation142_spill] sm:$0xff]  ;;  %v11693_v5 = vld [vmem:[#allocation55_spill] sm:$0xff] }
 0x33f   : > { %v11694_v42 = vcombine.low %v11692_v30, %v11693_v5  ;;  %v11714_v5 = vld [vmem:[#allocation132_spill] sm:$0xff] }
 0x340   : > { %v4850_v20 = vshrl.u32 %v4643_v45, 16  ;;  %v9783_v51 = vpack.i.b16 %v4844_v1, %v4843_v29  ;;  %v9789_v61 = vcombine.low %v4794_v18, %v4842_v33  ;;  %v11695_v29 = vld [vmem:[#allocation97_spill] sm:$0xff]  ;;  %v11696_v1 = vld [vmem:[#allocation99_spill] sm:$0xff]  ;;  %v11698_v18 = vld [vmem:[#allocation4_spill] sm:$0xff]  ;;  %v9806_v33 = vcombine.low %v4806_v63, %v4854_v24 }
 0x341   : > { %4998 = vrot.lane.b32.xlu0 %v11691_v9, %s6243_s21  ;;  %v11697_v53 = vcombine.low %v11695_v29, %v11696_v1  ;;  %v11708_v63 = vcombine.low %v11706_v11, %v11707_v56  ;;  %v11709_v9 = vld [vmem:[#allocation181_spill] sm:$0xff]  ;;  %v4848_v30 = vpack.i.b16 %v4643_v45, %v4609_v13  ;;  %v11715_v29 = vld [vmem:[#allocation167_spill] sm:$0xff]  ;;  %v5003_v1 = vpop.permute.xlu0 %5002  ;;  %v11724_v24 = vld [vmem:[#allocation28_spill] sm:$0xff] }
 0x342   : > { %v4851_v38 = vpack.i.b16 %v4850_v20, %v4849_v55  ;;  %v6155_v57 = vcombine.low %v9727_v26, %v9783_v51  ;;  %11699 = vst [vmem:[#allocation39_spill] sm:$0xff] %v9806_v33  ;;  %v11701_v55 = vld [vmem:[#allocation175_spill] sm:$0xff]  ;;  %v11718_v13 = vld [vmem:[#allocation5_spill] sm:$0xff]  ;;  %v11730_v11 = vld [vmem:[#allocation70_spill] sm:$0xff] }
 0x343   : > { %v11702_v20 = vcombine.low %v11700_v37, %v11701_v55  ;;  %v11725_v37 = vld [vmem:[#allocation103_spill] sm:$0xff] }
 0x344   : > { %v6157_v28 = vcombine.low %v4803_v17, %v4851_v38  ;;  %v11710_v17 = vcombine.low %v9360_v36, %v9484_v23  ;;  %v11711_v38 = vld [vmem:[#allocation130_spill] sm:$0xff]  ;;  %v4800_v36 = vpack.i.b16 %v4575_v35, %v4541_v10  ;;  %v11726_v55 = vcombine.low %v11724_v24, %v11725_v37 }
 0x345   : > { %5078 = vrot.lane.b32.xlu0 %v11694_v42, %s6261_s11  ;;  %v11704_v42 = vcombine.low %v9052_v21, %v9222_v8  ;;  %v11712_v21 = vcombine.low %v9593_v50, %v9692_v40  ;;  %v11713_v8 = vld [vmem:[#allocation50_spill] sm:$0xff] }
 0x346   : > { %5546 = vrot.lane.b32.xlu1 %v6157_v28, %s6267_s19  ;;  %v11703_v28 = vld [vmem:[#allocation66_spill] sm:$0xff]  ;;  %v6156_v23 = vcombine.low %v4800_v36, %v4848_v30  ;;  %v11738_v36 = vld [vmem:[#allocation69_spill] sm:$0xff] }
 0x347   : > { %v11716_v50 = vld [vmem:[#allocation102_spill] sm:$0xff] }
 0x348   : > { %v11717_v40 = vld [vmem:[#allocation110_spill] sm:$0xff] }
 0x349   : > { %5158 = vrot.lane.b32.xlu0 %v11697_v53, %s6262_s12  ;;  %v11719_v45 = vcombine.low %v11717_v40, %v11718_v13  ;;  %v11720_v53 = vld [vmem:[#allocation176_spill] sm:$0xff]  ;;  %v11722_v35 = vld [vmem:[#allocation54_spill] sm:$0xff]  ;;  %v11740_v13 = vld [vmem:[#allocation35_spill] sm:$0xff] }
 0x34a   : > { %4984 = vrot.lane.b32.xlu1 %v11698_v18, %s6243_s21  ;;  %v5083_v18 = vpop.permute.xlu0 %5082  ;;  %v11744_v37 = vld [vmem:[#allocation22_spill] sm:$0xff] }
 0x34d   : > { %5238 = vrot.lane.b32.xlu0 %v11702_v20, %s6263_s13  ;;  %v11727_v20 = vld [vmem:[#allocation159_spill] sm:$0xff] }
 0x34e   : > { %5064 = vrot.lane.b32.xlu1 %v11703_v28, %s6261_s11  ;;  %v11728_v28 = vld [vmem:[#allocation163_spill] sm:$0xff] }
 0x351   : > { %5318 = vrot.lane.b32.xlu0 %v11704_v42, %s6264_s14  ;;  %v625_v42 = vcombine.high %v11728_v28, %v11727_v20 }
 0x352   : > { %5144 = vrot.lane.b32.xlu1 %v11705_v25, %s6262_s12  ;;  %v11729_v25 = vld [vmem:[#allocation144_spill] sm:$0xff] }
 0x353   : > { %v557_v56 = vcombine.high %v11730_v11, %v11729_v25 }
 0x355   : > { %5398 = vrot.lane.b32.xlu0 %v11708_v63, %s6265_s17  ;;  %v11731_v63 = vld [vmem:[#allocation158_spill] sm:$0xff] }
 0x356   : > { %5224 = vrot.lane.b32.xlu1 %v11709_v9, %s6263_s13  ;;  %v11732_v9 = vld [vmem:[#allocation150_spill] sm:$0xff] }
 0x359   : > { %5478 = vrot.lane.b32.xlu0 %v11710_v17, %s6266_s18  ;;  %v591_v17 = vcombine.high %v11732_v9, %v11731_v63  ;;  %v11747_v63 = vld [vmem:[#allocation113_spill] sm:$0xff]  ;;  %v11748_v9 = vld [vmem:[#allocation32_spill] sm:$0xff] }
 0x35a   : > { %5304 = vrot.lane.b32.xlu1 %v11711_v38, %s6264_s14  ;;  %v5163_v38 = vpop.permute.xlu0 %5162 }
 0x35b   : > { %v9884_v40 = vrot.slane %v591_v17, %v7293_v52  ;;  %v11750_v17 = vcombine.low %v9539_v60, %v9619_v47  ;;  %v11754_v47 = vld [vmem:[#allocation114_spill] sm:$0xff] }
 0x35d   : > { %5558 = vrot.lane.b32.xlu0 %v11712_v21, %s6267_s19  ;;  %v11733_v21 = vld [vmem:[#allocation106_spill] sm:$0xff]  ;;  %11739 = vst [vmem:[#allocation92_spill] sm:$0xff] %v9884_v40 }
 0x35e   : > { %5384 = vrot.lane.b32.xlu1 %v11713_v8, %s6265_s17  ;;  %v11735_v8 = vld [vmem:[#allocation178_spill] sm:$0xff] }
 0x361   : > { %4996 = vrot.lane.b32.xlu0 %v11714_v5, %s6243_s21  ;;  %v11737_v5 = vld [vmem:[#allocation7_spill] sm:$0xff] }
 0x362   : > { %5464 = vrot.lane.b32.xlu1 %v9629_v44, %s6266_s18  ;;  %v11721_v44 = vld [vmem:[#allocation140_spill] sm:$0xff] }
 0x363   : > { %v11723_v10 = vcombine.low %v11721_v44, %v11722_v35 }
 0x365   : > { %5076 = vrot.lane.b32.xlu0 %v11715_v29, %s6261_s11  ;;  %v9878_v29 = vrot.slane %v625_v42, %v7293_v52 }
 0x366   : > { %5544 = vrot.lane.b32.xlu1 %v6156_v23, %s6267_s19  ;;  %v523_v23 = vcombine.high %v11738_v36, %v11737_v5  ;;  %v11752_v5 = vld [vmem:[#allocation72_spill] sm:$0xff] }
 0x367   : > { %v9897_v35 = vcombine.high %v9878_v29, %v11245_v46 }
 0x368   : > { %v9893_v44 = vrot.slane %v523_v23, %v7293_v52 }
 0x369   : > { %5156 = vrot.lane.b32.xlu0 %v11716_v50, %s6262_s12  ;;  %v9881_v50 = vrot.slane %v557_v56, %v7293_v52  ;;  %v736_v42 = vshrl.u32 %v9897_v35, 16 }
 0x36a   : > { %4982 = vrot.lane.b32.xlu1 %v11719_v45, %s6243_s21  ;;  %v11741_v45 = vld [vmem:[#allocation109_spill] sm:$0xff]  ;;  %11743 = vst [vmem:[#allocation93_spill] sm:$0xff] %v9893_v44  ;;  %v9915_v28 = vcombine.high %v9893_v44, %v11245_v46 }
 0x36b   : > { %v9901_v24 = vcombine.high %v9881_v50, %v11245_v46 }
 0x36d   : > { %5236 = vrot.lane.b32.xlu0 %v11720_v53, %s6263_s13  ;;  %v11742_v53 = vcombine.low %v11740_v13, %v11741_v45  ;;  %v688_v25 = vshrl.u32 %v9901_v24, 16  ;;  %v11755_v45 = vld [vmem:[#allocation115_spill] sm:$0xff] }
 0x36e   : > { %5062 = vrot.lane.b32.xlu1 %v11723_v10, %s6261_s11  ;;  %v5243_v10 = vpop.permute.xlu0 %5242 }
 0x371   : > { %5316 = vrot.lane.b32.xlu0 %v9231_v16, %s6264_s14  ;;  %v11734_v16 = vld [vmem:[#allocation3_spill] sm:$0xff] }
 0x372   : > { %5142 = vrot.lane.b32.xlu1 %v11726_v55, %s6262_s12  ;;  %v11736_v30 = vcombine.low %v11734_v16, %v11735_v8  ;;  %v11745_v55 = vld [vmem:[#allocation183_spill] sm:$0xff]  ;;  %v5323_v56 = vpop.permute.xlu0 %5322 }
 0x373   : > { %v11746_v20 = vcombine.low %v11744_v37, %v11745_v55  ;;  %v11757_v55 = vld [vmem:[#allocation131_spill] sm:$0xff] }
 0x375   : > { %5396 = vrot.lane.b32.xlu0 %v11733_v21, %s6265_s17  ;;  %v687_v21 = vshrl.u32 %v9915_v28, 16 }
 0x376   : > { %5222 = vrot.lane.b32.xlu1 %v11736_v30, %s6263_s13  ;;  %v11751_v30 = vld [vmem:[#allocation143_spill] sm:$0xff]  ;;  %v5403_v13 = vpop.permute.xlu0 %5402 }
 0x377   : > { %v689_v8 = vpack.i.b16 %v688_v25, %v687_v21  ;;  %v11753_v36 = vcombine.low %v11751_v30, %v11752_v5  ;;  %v11764_v21 = vld [vmem:[#allocation68_spill] sm:$0xff] }
 0x378   : > { %v11767_v30 = vld [vmem:[#allocation180_spill] sm:$0xff] }
 0x379   : > { %5476 = vrot.lane.b32.xlu0 %v9489_v2, %s6266_s18  ;;  %v9905_v2 = vcombine.high %v9884_v40, %v11245_v46  ;;  %v11842_v40 = vld [vmem:[#allocation83_spill] sm:$0xff] }
 0x37a   : > { %5302 = vrot.lane.b32.xlu1 %v11742_v53, %s6264_s14  ;;  %v11756_v53 = vcombine.low %v11754_v47, %v11755_v45  ;;  %v5483_v26 = vpop.permute.xlu0 %5482  ;;  %v11773_v47 = vld [vmem:[#allocation104_spill] sm:$0xff]  ;;  %v11774_v45 = vld [vmem:[#allocation105_spill] sm:$0xff] }
 0x37b   : > { %v735_v11 = vshrl.u32 %v9905_v2, 16 }
 0x37d   : > { %5556 = vrot.lane.b32.xlu0 %v9697_v15, %s6267_s19  ;;  %v11749_v15 = vcombine.low %v11747_v63, %v11748_v9  ;;  %v737_v16 = vpack.i.b16 %v736_v42, %v735_v11  ;;  %v11759_v42 = vld [vmem:[#allocation179_spill] sm:$0xff]  ;;  %v11761_v11 = vld [vmem:[#allocation165_spill] sm:$0xff]  ;;  %v9962_v9 = vpop.permute.xlu1 %4986 }
 0x37e   : > { %5382 = vrot.lane.b32.xlu1 %v11746_v20, %s6265_s17  ;;  %v11758_v20 = vld [vmem:[#allocation77_spill] sm:$0xff] }
 0x37f   : > { %v6037_v23 = vcombine.low %v689_v8, %v737_v16  ;;  %v11760_v25 = vcombine.low %v11758_v20, %v11759_v42  ;;  %v11765_v16 = vld [vmem:[#allocation80_spill] sm:$0xff]  ;;  %v11783_v42 = vld [vmem:[#allocation51_spill] sm:$0xff] }
 0x380   : > { %v11766_v8 = vcombine.low %v11764_v21, %v11765_v16  ;;  %v11782_v20 = vld [vmem:[#allocation52_spill] sm:$0xff]  ;;  %v11792_v16 = vld [vmem:[#allocation21_spill] sm:$0xff] }
 0x381   : > { %4994 = vrot.lane.b32.xlu0 %v11749_v15, %s6243_s21  ;;  %v5612_v60 = vsel %vm5564_vm9, %v6037_v23, %v5003_v1  ;;  %v11763_v15 = vld [vmem:[#allocation116_spill] sm:$0xff] }
 0x382   : > { %5462 = vrot.lane.b32.xlu1 %v11750_v17, %s6266_s18  ;;  %v5645_v37 = vsel %vm5613_vm10, %v5612_v60, %v5083_v18  ;;  %v11772_v60 = vcombine.low %v9370_v49, %v9507_v4  ;;  %v11784_v4 = vld [vmem:[#allocation98_spill] sm:$0xff] }
 0x383   : > { %v5678_v51 = vsel %vm5646_vm11, %v5645_v37, %v5163_v38 }
 0x385   : > { %5074 = vrot.lane.b32.xlu0 %v11753_v36, %s6261_s11 }
 0x386   : > { %5542 = vrot.lane.b32.xlu1 %v6155_v57, %s6267_s19  ;;  %v5711_v57 = vsel %vm5679_vm12, %v5678_v51, %v5243_v10  ;;  %v11778_v51 = vld [vmem:[#allocation120_spill] sm:$0xff] }
 0x387   : > { %v5744_v1 = vsel %vm5712_vm13, %v5711_v57, %v5323_v56  ;;  %v11762_v56 = vcombine.low %v9062_v12, %v9245_v54  ;;  %v11768_v12 = vld [vmem:[#allocation125_spill] sm:$0xff]  ;;  %v11769_v54 = vld [vmem:[#allocation126_spill] sm:$0xff] }
 0x388   : > { %v5777_v18 = vsel %vm5745_vm14, %v5744_v1, %v5403_v13  ;;  %v11770_v36 = vcombine.low %v11768_v12, %v11769_v54  ;;  %v9982_v13 = vpop.permute.xlu1 %5066  ;;  %v11781_v1 = vld [vmem:[#allocation111_spill] sm:$0xff]  ;;  %v11794_v12 = vld [vmem:[#allocation49_spill] sm:$0xff]  ;;  %v11795_v54 = vld [vmem:[#allocation48_spill] sm:$0xff] }
 0x389   : > { %5154 = vrot.lane.b32.xlu0 %v11756_v53, %s6262_s12  ;;  %v5810_v38 = vsel %vm5778_vm15, %v5777_v18, %v5483_v26  ;;  %v11775_v53 = vcombine.low %v11773_v47, %v11774_v45  ;;  %v11785_v18 = vld [vmem:[#allocation60_spill] sm:$0xff] }
 0x38a   : > { %4980 = vrot.lane.b32.xlu1 %v11757_v55, %s6243_s21  ;;  %v9980_v23 = vrot.slane %v11770_v36, %v7293_v52  ;;  %v11777_v55 = vld [vmem:[#allocation118_spill] sm:$0xff]  ;;  %v455_v36 = vcombine.high %v11795_v54, %v11794_v12  ;;  %v11810_v12 = vld [vmem:[#allocation9_spill] sm:$0xff] }
 0x38b   : > { %v9992_v37 = vrot.slane %v11775_v53, %v7293_v52  ;;  %v11779_v26 = vcombine.low %v11777_v55, %v11778_v51  ;;  %v11797_v53 = vld [vmem:[#allocation136_spill] sm:$0xff]  ;;  %v11798_v55 = vld [vmem:[#allocation137_spill] sm:$0xff] }
 0x38c   : > { %11771 = vst [vmem:[#allocation12_spill] sm:$0xff] %v9980_v23  ;;  %v11799_v51 = vcombine.low %v11797_v53, %v11798_v55 }
 0x38d   : > { %5234 = vrot.lane.b32.xlu0 %v11760_v25, %s6263_s13  ;;  %11776 = vst [vmem:[#allocation29_spill] sm:$0xff] %v9992_v37  ;;  %v9998_v57 = vrot.slane %v11779_v26, %v7293_v52  ;;  %v489_v25 = vcombine.high %v11783_v42, %v11782_v20  ;;  %v10032_v47 = vcombine.high %v9992_v37, %v11245_v46  ;;  %v11802_v20 = vld [vmem:[#allocation155_spill] sm:$0xff] }
 0x38e   : > { %5060 = vrot.lane.b32.xlu1 %v11761_v11, %s6261_s11  ;;  %v11786_v11 = vcombine.low %v11784_v4, %v11785_v18  ;;  %v10042_v26 = vrot.slane %v11799_v51, %v7293_v52  ;;  %v11805_v4 = vld [vmem:[#allocation186_spill] sm:$0xff]  ;;  %v10080_v51 = vrot.slane %v455_v36, %v7293_v52  ;;  %v11816_v36 = vld [vmem:[#allocation31_spill] sm:$0xff] }
 0x38f   : > { %v5563_v63 = vpop.permute.xlu0 %5562  ;;  %11780 = vst [vmem:[#allocation85_spill] sm:$0xff] %v9998_v57  ;;  %v10036_v45 = vcombine.high %v9998_v57, %v11245_v46  ;;  %v11806_v18 = vld [vmem:[#allocation18_spill] sm:$0xff] }
 0x390   : > { %v5843_v10 = vsel %vm5811_vm0, %v5810_v38, %v5563_v63  ;;  %v10010_v38 = vrot.slane %v11786_v11, %v7293_v52  ;;  %v10014_v63 = vcombine.high %v9980_v23, %v11245_v46  ;;  %11800 = vst [vmem:[#allocation127_spill] sm:$0xff] %v10042_v26  ;;  %v11807_v11 = vld [vmem:[#allocation17_spill] sm:$0xff]  ;;  %11814 = vst [vmem:[#allocation37_spill] sm:$0xff] %v10080_v51  ;;  %v11838_v23 = vld [vmem:[#allocation84_spill] sm:$0xff] }
 0x391   : > { %5314 = vrot.lane.b32.xlu0 %v11762_v56, %s6264_s14  ;;  %6189 = vmatprep.subr.msk.bf16.mxu0 %vm5845_vm3, %v5843_v10  ;;  %v11788_v10 = vld [vmem:[#allocation160_spill] sm:$0xff]  ;;  %v11789_v56 = vld [vmem:[#allocation161_spill] sm:$0xff] }
 0x392   : > { %5140 = vrot.lane.b32.xlu1 %v11763_v15, %s6262_s12  ;;  %11787 = vst [vmem:[#allocation128_spill] sm:$0xff] %v10010_v38  ;;  %v11790_v15 = vcombine.low %v11788_v10, %v11789_v56  ;;  %v387_v10 = vcombine.high %v11807_v11, %v11806_v18  ;;  %v10057_v56 = vrot.slane %v489_v25, %v7293_v52  ;;  %v1158_v55 = vshrl.u32 %v10014_v63, 16  ;;  %v11817_v18 = vld [vmem:[#allocation26_spill] sm:$0xff] }
 0x393   : > { %v9966_v17 = vpop.permute.xlu0 %5000  ;;  %v11818_v11 = vcombine.low %v11816_v36, %v11817_v18 }
 0x394   : > { %v10020_v21 = vrot.slane %v11790_v15, %v7293_v52  ;;  %11808 = vst [vmem:[#allocation95_spill] sm:$0xff] %v10057_v56 }
 0x395   : > { %5394 = vrot.lane.b32.xlu0 %v11766_v8, %s6265_s17  ;;  %v11793_v8 = vld [vmem:[#allocation20_spill] sm:$0xff] }
 0x396   : > { %5220 = vrot.lane.b32.xlu1 %v11767_v30, %s6263_s13  ;;  %11791 = vst [vmem:[#allocation108_spill] sm:$0xff] %v10020_v21  ;;  %v421_v30 = vcombine.high %v11793_v8, %v11792_v16  ;;  %v10063_v16 = vcombine.high %v10010_v38, %v11245_v46  ;;  %v11809_v8 = vld [vmem:[#allocation36_spill] sm:$0xff]  ;;  %v10073_v53 = vcombine.high %v10020_v21, %v11245_v46  ;;  %v11827_v38 = vld [vmem:[#allocation45_spill] sm:$0xff] }
 0x397   : > { %v9974_v5 = vpop.permute.xlu0 %5080  ;;  %v11811_v54 = vcombine.low %v11809_v8, %v11810_v12  ;;  %v10100_v8 = vrot.slane %v11818_v11, %v7293_v52  ;;  %v10103_v12 = vrot.slane %v387_v10, %v7293_v52  ;;  %v11822_v10 = vld [vmem:[#allocation67_spill] sm:$0xff] }
 0x398   : > { %v10077_v25 = vrot.slane %v421_v30, %v7293_v52  ;;  %v1110_v30 = vshrl.u32 %v10032_v47, 16  ;;  %v1616_v18 = vshrl.u32 %v10073_v53, 16  ;;  %v11823_v11 = vld [vmem:[#allocation71_spill] sm:$0xff] }
 0x399   : > { %5474 = vrot.lane.b32.xlu0 %v11772_v60, %s6266_s18  ;;  %v11796_v60 = vcombine.low %v9606_v48, %v9707_v58  ;;  %v10050_v58 = vpop.permute.xlu1 %5146  ;;  %11819 = vst [vmem:[#allocation94_spill] sm:$0xff] %v10100_v8  ;;  %11820 = vst [vmem:[#allocation96_spill] sm:$0xff] %v10103_v12 }
 0x39a   : > { %5300 = vrot.lane.b32.xlu1 %v11781_v1, %s6264_s14  ;;  %v11801_v1 = vld [vmem:[#allocation153_spill] sm:$0xff]  ;;  %11813 = vst [vmem:[#allocation139_spill] sm:$0xff] %v10077_v25 }
 0x39b   : > { %v10004_v49 = vpop.permute.xlu0 %5160  ;;  %v11803_v42 = vcombine.low %v11801_v1, %v11802_v20  ;;  %v11815_v1 = vld [vmem:[#allocation134_spill] sm:$0xff]  ;;  %v10086_v20 = vcombine.high %v10042_v26, %v11245_v46  ;;  %v11824_v26 = vcombine.low %v11822_v10, %v11823_v11 }
 0x39d   : > { %5554 = vrot.lane.b32.xlu0 %v11796_v60, %s6267_s19  ;;  %v10048_v48 = vrot.slane %v11803_v42, %v7293_v52  ;;  %v10069_v60 = vrot.slane %v11811_v54, %v7293_v52  ;;  %v10107_v54 = vcombine.high %v10057_v56, %v11245_v46  ;;  %v10115_v33 = vpop.permute.xlu1 %5226  ;;  %v10123_v21 = vrot.slane %v11824_v26, %v7293_v52  ;;  %v11826_v56 = vld [vmem:[#allocation16_spill] sm:$0xff] }
 0x39e   : > { %5380 = vrot.lane.b32.xlu1 %v11805_v4, %s6265_s17  ;;  %v1157_v4 = vshrl.u32 %v10036_v45, 16  ;;  %v11828_v57 = vcombine.low %v11826_v56, %v11827_v38  ;;  %v1568_v10 = vshrl.u32 %v10086_v20, 16  ;;  %v11833_v38 = vld [vmem:[#allocation76_spill] sm:$0xff]  ;;  %v11834_v56 = vld [vmem:[#allocation171_spill] sm:$0xff] }
 0x39f   : > { %11804 = vst [vmem:[#allocation164_spill] sm:$0xff] %v10048_v48  ;;  %v10059_v15 = vpop.permute.xlu0 %5240  ;;  %11812 = vst [vmem:[#allocation107_spill] sm:$0xff] %v10069_v60  ;;  %v10090_v42 = vcombine.high %v10048_v48, %v11245_v46  ;;  %v1109_v48 = vshrl.u32 %v10063_v16, 16  ;;  %v11835_v11 = vcombine.low %v11833_v38, %v11834_v56 }
 0x3a0   : > { %11821 = vst [vmem:[#allocation138_spill] sm:$0xff] %v10107_v54  ;;  %v1159_v36 = vpack.i.b16 %v1158_v55, %v1157_v4  ;;  %11825 = vst [vmem:[#allocation6_spill] sm:$0xff] %v10123_v21  ;;  %v10129_v37 = vrot.slane %v11828_v57, %v7293_v52  ;;  %v11831_v55 = vld [vmem:[#allocation170_spill] sm:$0xff]  ;;  %v10139_v4 = vcombine.high %v10080_v51, %v11245_v46 }
 0x3a1   : > { %4992 = vrot.lane.b32.xlu0 %v11815_v1, %s6243_s21  ;;  %v1111_v26 = vpack.i.b16 %v1110_v30, %v1109_v48  ;;  %v1615_v57 = vshrl.u32 %v10090_v42, 16  ;;  %v10157_v51 = vcombine.high %v10103_v12, %v11245_v46  ;;  %v11837_v30 = vld [vmem:[#allocation15_spill] sm:$0xff] }
 0x3a2   : > { %5460 = vrot.lane.b32.xlu1 %v9624_v7, %s6266_s18  ;;  %v10113_v7 = vcombine.high %v10069_v60, %v11245_v46  ;;  %11829 = vst [vmem:[#allocation173_spill] sm:$0xff] %v10129_v37  ;;  %v10133_v60 = vcombine.high %v10077_v25, %v11245_v46  ;;  %11832 = vst [vmem:[#allocation177_spill] sm:$0xff] %v10139_v4  ;;  %v10149_v25 = vrot.slane %v11835_v11, %v7293_v52 }
 0x3a3   : > { %v10109_v1 = vpop.permute.xlu0 %5320  ;;  %v11839_v19 = vcombine.low %v11837_v30, %v11838_v23  ;;  %v6041_v38 = vcombine.low %v1111_v26, %v1159_v36  ;;  %v1617_v11 = vpack.i.b16 %v1616_v18, %v1615_v57  ;;  %v10175_v12 = vcombine.high %v10129_v37, %v11245_v46  ;;  %v11843_v23 = vld [vmem:[#allocation38_spill] sm:$0xff]  ;;  %v5307_v26 = vpop.permute.xlu1 %5306 }
 0x3a4   : > { %11830 = vst [vmem:[#allocation74_spill] sm:$0xff] %v10133_v60  ;;  %11836 = vst [vmem:[#allocation81_spill] sm:$0xff] %v10149_v25  ;;  %v1567_v56 = vshrl.u32 %v10113_v7, 16  ;;  %v664_v36 = vshrl.u32 %v10133_v60, 16  ;;  %v711_v18 = vshrl.u32 %v10139_v4, 16  ;;  %v10190_v37 = vcombine.high %v10149_v25, %v11245_v46  ;;  %v11846_v4 = vld [vmem:[#allocation13_spill] sm:$0xff] }
 0x3a5   : > { %5072 = vrot.lane.b32.xlu0 %v11831_v55, %s6261_s11  ;;  %v10153_v55 = vcombine.high %v10100_v8, %v11245_v46  ;;  %v10166_v44 = vrot.slane %v11839_v19, %v7293_v52  ;;  %v10171_v8 = vcombine.high %v10123_v21, %v11245_v46  ;;  %v11844_v19 = vcombine.low %v11842_v40, %v11843_v23 }
 0x3a6   : > { %5540 = vrot.lane.b32.xlu1 %v9789_v61, %s6267_s19  ;;  %v712_v61 = vshrl.u32 %v10107_v54, 16  ;;  %v11841_v54 = vld [vmem:[#allocation117_spill] sm:$0xff]  ;;  %v1569_v57 = vpack.i.b16 %v1568_v10, %v1567_v56  ;;  %v663_v40 = vshrl.u32 %v10157_v51, 16  ;;  %v734_v25 = vpack.i.b16 %v9897_v35, %v9905_v2 }
 0x3a7   : > { %v10160_v48 = vpop.permute.xlu0 %5400  ;;  %11840 = vst [vmem:[#allocation43_spill] sm:$0xff] %v10166_v44  ;;  %v10183_v30 = vrot.slane %v11844_v19, %v7293_v52  ;;  %v10198_v60 = vcombine.high %v10166_v44, %v11245_v46  ;;  %v2851_v10 = vshrl.u32 %v10171_v8, 16  ;;  %v686_v35 = vpack.i.b16 %v9901_v24, %v9915_v28 }
 0x3a8   : > { %v713_v23 = vpack.i.b16 %v712_v61, %v711_v18  ;;  %v6057_v19 = vcombine.low %v1569_v57, %v1617_v11  ;;  %v665_v56 = vpack.i.b16 %v664_v36, %v663_v40  ;;  %v11847_v11 = vcombine.low %v9600_v3, %v9604_v6  ;;  %v5387_v40 = vpop.permute.xlu1 %5386  ;;  %v11849_v3 = vld [vmem:[#allocation44_spill] sm:$0xff] }
 0x3a9   : > { %5152 = vrot.lane.b32.xlu0 %v11841_v54, %s6262_s12  ;;  %11845 = vst [vmem:[#allocation41_spill] sm:$0xff] %v10183_v30  ;;  %v2899_v54 = vshrl.u32 %v10153_v55, 16  ;;  %v10209_v61 = vcombine.high %v10183_v30, %v11245_v46  ;;  %v2850_v57 = vshrl.u32 %v10190_v37, 16  ;;  %v3861_v2 = vshrl.u32 %v10198_v60, 16 }
 0x3aa   : > { %4978 = vrot.lane.b32.xlu1 %v6041_v38, %s6243_s21  ;;  %v2898_v38 = vshrl.u32 %v10175_v12, 16  ;;  %v10215_v18 = vrot.slane %v11847_v11, %v7293_v52  ;;  %v6029_v36 = vcombine.low %v665_v56, %v713_v23  ;;  %v11850_v6 = vcombine.low %v9572_v39, %v11849_v3  ;;  %v11853_v56 = vld [vmem:[#allocation121_spill] sm:$0xff]  ;;  %v11856_v39 = vld [vmem:[#allocation174_spill] sm:$0xff] }
 0x3ab   : > { %v10192_v21 = vpop.permute.xlu0 %5480  ;;  %v2852_v23 = vpack.i.b16 %v2851_v10, %v2850_v57  ;;  %v6036_v28 = vcombine.low %v686_v35, %v734_v25 }
 0x3ac   : > { %v2900_v44 = vpack.i.b16 %v2899_v54, %v2898_v38  ;;  %v10231_v11 = vrot.slane %v11850_v6, %v7293_v52  ;;  %v11851_v54 = vld [vmem:[#allocation141_spill] sm:$0xff]  ;;  %v5588_v24 = vsel %vm5564_vm9, %v6029_v36, %v9962_v9  ;;  %v11852_v38 = vld [vmem:[#allocation119_spill] sm:$0xff]  ;;  %v10250_v10 = vcombine.high %v10215_v18, %v11245_v46 }
 0x3ad   : > { %5232 = vrot.lane.b32.xlu0 %v11846_v4, %s6263_s13  ;;  %v5629_v9 = vsel %vm5613_vm10, %v5588_v24, %v9982_v13  ;;  %v11858_v36 = vcombine.low %v9762_v62, %v9766_v14 }
 0x3ae   : > { %5058 = vrot.lane.b32.xlu1 %v6057_v19, %s6261_s11  ;;  %v11848_v19 = vcombine.low %v9492_v34, %v9498_v31  ;;  %v11854_v34 = vcombine.low %v11852_v38, %v11853_v56  ;;  %v3862_v31 = vshrl.u32 %v10209_v61, 16  ;;  %v6089_v57 = vcombine.low %v2852_v23, %v2900_v44  ;;  %v5467_v38 = vpop.permute.xlu1 %5466 }
 0x3af   : > { %v5561_v4 = vpop.permute.xlu0 %5560  ;;  %v10260_v35 = vrot.slane %v11858_v36, %v7293_v52  ;;  %v5609_v56 = vsel %vm5564_vm9, %v6036_v28, %v9966_v17  ;;  %v10272_v44 = vcombine.high %v10231_v11, %v11245_v46  ;;  %v11860_v17 = vcombine.low %v9700_v43, %v9703_v22  ;;  %v11865_v36 = vld [vmem:[#allocation189_spill] sm:$0xff] }
 0x3b0   : > { %v10225_v30 = vrot.slane %v11848_v19, %v7293_v52  ;;  %v11855_v19 = vld [vmem:[#allocation87_spill] sm:$0xff]  ;;  %v5643_v14 = vsel %vm5613_vm10, %v5609_v56, %v9974_v5  ;;  %v11861_v23 = vcombine.low %v9748_v41, %v9751_v59  ;;  %v4374_v41 = vshrl.u32 %v10250_v10, 16 }
 0x3b1   : > { %5312 = vrot.lane.b32.xlu0 %v11851_v54, %s6264_s14  ;;  %v11857_v3 = vcombine.low %v11855_v19, %v11856_v39  ;;  %v5662_v54 = vsel %vm5646_vm11, %v5629_v9, %v10050_v58  ;;  %v11859_v58 = vld [vmem:[#allocation122_spill] sm:$0xff]  ;;  %v5676_v5 = vsel %vm5646_vm11, %v5643_v14, %v10004_v49  ;;  %v11862_v59 = vcombine.low %v9672_v32, %v9684_v0  ;;  %v11867_v14 = vld [vmem:[#allocation187_spill] sm:$0xff] }
 0x3b2   : > { %5138 = vrot.lane.b32.xlu1 %v11854_v34, %s6262_s12  ;;  %v3863_v34 = vpack.i.b16 %v3862_v31, %v3861_v2  ;;  %v10268_v13 = vcombine.high %v10225_v30, %v11245_v46  ;;  %v5695_v62 = vsel %vm5679_vm12, %v5662_v54, %v10115_v33  ;;  %v10284_v2 = vrot.slane %v11860_v17, %v7293_v52 }
 0x3b3   : > { %v10246_v6 = vrot.slane %v11857_v3, %v7293_v52  ;;  %v10254_v25 = vpop.permute.xlu0 %4998  ;;  %v10290_v24 = vrot.slane %v11861_v23, %v7293_v52  ;;  %v5728_v33 = vsel %vm5712_vm13, %v5695_v62, %v5307_v26  ;;  %v5709_v22 = vsel %vm5679_vm12, %v5676_v5, %v10059_v15  ;;  %v11863_v3 = vld [vmem:[#allocation172_spill] sm:$0xff] }
 0x3b4   : > { %v5761_v43 = vsel %vm5745_vm14, %v5728_v33, %v5387_v40  ;;  %v10310_v49 = vrot.slane %v11862_v59, %v7293_v52  ;;  %v10314_v26 = vcombine.high %v10260_v35, %v11245_v46  ;;  %v5742_v40 = vsel %vm5712_vm13, %v5709_v22, %v10109_v1 }
 0x3b5   : > { %5392 = vrot.lane.b32.xlu0 %v11859_v58, %s6265_s17  ;;  %v10298_v28 = vcombine.high %v10246_v6, %v11245_v46  ;;  %v5794_v19 = vsel %vm5778_vm15, %v5761_v43, %v5467_v38  ;;  %v5775_v39 = vsel %vm5745_vm14, %v5742_v40, %v10160_v48  ;;  %v4326_v52 = vshrl.u32 %v10268_v13, 16 }
 0x3b6   : > { %5218 = vrot.lane.b32.xlu1 %v6089_v57, %s6263_s13  ;;  %v4373_v0 = vshrl.u32 %v10272_v44, 16  ;;  %v10328_v9 = vcombine.high %v10284_v2, %v11245_v46  ;;  %v10332_v1 = vcombine.high %v10290_v24, %v11245_v46  ;;  %v5808_v48 = vsel %vm5778_vm15, %v5775_v39, %v10192_v21  ;;  %v11864_v57 = vld [vmem:[#allocation129_spill] sm:$0xff]  ;;  %v11869_v39 = vld [vmem:[#allocation135_spill] sm:$0xff] }
 0x3b7   : > { %v10303_v31 = vpop.permute.xlu0 %5078  ;;  %v11866_v54 = vcombine.low %v11864_v57, %v11865_v36  ;;  %v5841_v56 = vsel %vm5811_vm0, %v5808_v48, %v5561_v4  ;;  %v6121_v58 = vcombine.low %v3863_v34, %v11867_v14  ;;  %v10347_v17 = vcombine.high %v10310_v49, %v11245_v46  ;;  %v11871_v57 = vld [vmem:[#allocation145_spill] sm:$0xff]  ;;  %v11872_v36 = vld [vmem:[#allocation56_spill] sm:$0xff] }
 0x3b8   : > { %v5547_v15 = vpop.permute.xlu1 %5546  ;;  %v4325_v23 = vshrl.u32 %v10298_v28, 16  ;;  %v4375_v33 = vpack.i.b16 %v4374_v41, %v4373_v0  ;;  %v4838_v5 = vshrl.u32 %v10314_v26, 16  ;;  %v4790_v34 = vshrl.u32 %v10328_v9, 16  ;;  %v11868_v41 = vld [vmem:[#allocation123_spill] sm:$0xff] }
 0x3b9   : > { %5472 = vrot.lane.b32.xlu0 %v11863_v3, %s6266_s18  ;;  %v5827_v32 = vsel %vm5811_vm0, %v5794_v19, %v5547_v15  ;;  %v4837_v43 = vshrl.u32 %v10332_v1, 16  ;;  %v4789_v40 = vshrl.u32 %v10347_v17, 16  ;;  %v11870_v3 = vcombine.low %v11868_v41, %v11869_v39  ;;  %v11880_v41 = vld [vmem:[#allocation14_spill] sm:$0xff] }
 0x3ba   : > { %5298 = vrot.lane.b32.xlu1 %v11866_v54, %s6264_s14  ;;  %v5863_v38 = vsel %vm5845_vm3, %v5827_v32, 0  ;;  %v4327_v4 = vpack.i.b16 %v4326_v52, %v4325_v23  ;;  %v1156_v48 = vpack.i.b16 %v10014_v63, %v10036_v45  ;;  %v11873_v54 = vcombine.low %v11871_v57, %v11872_v36  ;;  %v11881_v39 = vld [vmem:[#allocation182_spill] sm:$0xff] }
 0x3bb   : > { %v10342_v62 = vpop.permute.xlu0 %5158  ;;  %6172 = vmatpush3.bf16.xpose.msra.mxu0 %v5863_v38  ;;  %v4839_v15 = vpack.i.b16 %v4838_v5, %v4837_v43  ;;  %v1108_v38 = vpack.i.b16 %v10032_v47, %v10063_v16  ;;  %v1614_v23 = vpack.i.b16 %v10073_v53, %v10090_v42  ;;  %v11875_v5 = vld [vmem:[#allocation63_spill] sm:$0xff]  ;;  %v730_v45 = vshrl.u32 %v9878_v29, 16  ;;  %v11877_v16 = vld [vmem:[#allocation92_spill] sm:$0xff] }
 0x3bc   : > { %6190 = vmatprep.subr.msk.bf16.mxu0 %vm5845_vm3, %v5841_v56  ;;  %v4985_v21 = vpop.permute.xlu1 %4984  ;;  %v6137_v19 = vcombine.low %v4327_v4, %v4375_v33  ;;  %v11874_v33 = vld [vmem:[#allocation124_spill] sm:$0xff]  ;;  %v1566_v4 = vpack.i.b16 %v10086_v20, %v10113_v7  ;;  %v682_v47 = vshrl.u32 %v9881_v50, 16  ;;  %v729_v43 = vshrl.u32 %v11877_v16, 16  ;;  %v11884_v20 = vld [vmem:[#allocation74_spill] sm:$0xff] }
 0x3bd   : > { %5552 = vrot.lane.b32.xlu0 %v9723_v27, %s6267_s19  ;;  %v4791_v27 = vpack.i.b16 %v4790_v34, %v4789_v40  ;;  %v11876_v63 = vcombine.low %v11874_v33, %v11875_v5  ;;  %v11879_v40 = vld [vmem:[#allocation138_spill] sm:$0xff]  ;;  %v662_v7 = vpack.i.b16 %v11884_v20, %v10157_v51  ;;  %v11886_v33 = vld [vmem:[#allocation88_spill] sm:$0xff]  ;;  %v2849_v51 = vpack.i.b16 %v10171_v8, %v10190_v37 }
 0x3be   : > { %5378 = vrot.lane.b32.xlu1 %v6121_v58, %s6265_s17  ;;  %v6040_v58 = vcombine.low %v1108_v38, %v1156_v48  ;;  %v731_v48 = vpack.i.b16 %v730_v45, %v729_v43 }
 0x3bf   : > { %v5239_v22 = vpop.permute.xlu0 %5238  ;;  %v6153_v0 = vcombine.low %v4791_v27, %v4839_v15  ;;  %v6056_v15 = vcombine.low %v1566_v4, %v1614_v23  ;;  %v11883_v27 = vld [vmem:[#allocation93_spill] sm:$0xff]  ;;  %v11885_v23 = vld [vmem:[#allocation188_spill] sm:$0xff]  ;;  %v11888_v4 = vld [vmem:[#allocation27_spill] sm:$0xff] }
 0x3c0   : > { %v5065_v59 = vpop.permute.xlu1 %5064  ;;  %v11887_v5 = vcombine.low %v11885_v23, %v11886_v33  ;;  %v11897_v23 = vld [vmem:[#allocation184_spill] sm:$0xff] }
 0x3c1   : > { %4990 = vrot.lane.b32.xlu0 %v11870_v3, %s6243_s21  ;;  %v11882_v3 = vcombine.low %v11880_v41, %v11881_v39  ;;  %v11890_v41 = vld [vmem:[#allocation8_spill] sm:$0xff] }
 0x3c2   : > { %5458 = vrot.lane.b32.xlu1 %v6137_v19, %s6266_s18  ;;  %v11878_v19 = vld [vmem:[#allocation177_spill] sm:$0xff] }
 0x3c3   : > { %v5319_v32 = vpop.permute.xlu0 %5318  ;;  %v710_v53 = vpack.i.b16 %v11879_v40, %v11878_v19 }
 0x3c4   : > { %v5145_v52 = vpop.permute.xlu1 %5144 }
 0x3c5   : > { %5070 = vrot.lane.b32.xlu0 %v11873_v54, %s6261_s11  ;;  %v6028_v54 = vcombine.low %v662_v7, %v710_v53  ;;  %v11895_v7 = vld [vmem:[#allocation64_spill] sm:$0xff] }
 0x3c6   : > { %5538 = vrot.lane.b32.xlu1 %v6153_v0, %s6267_s19  ;;  %v681_v0 = vshrl.u32 %v11883_v27, 16 }
 0x3c7   : > { %v5399_v56 = vpop.permute.xlu0 %5398  ;;  %v5585_v45 = vsel %vm5564_vm9, %v6028_v54, %v4985_v21 }
 0x3c8   : > { %v5225_v14 = vpop.permute.xlu1 %5224  ;;  %v683_v36 = vpack.i.b16 %v682_v47, %v681_v0  ;;  %v5627_v47 = vsel %vm5613_vm10, %v5585_v45, %v5065_v59  ;;  %v11900_v45 = vld [vmem:[#allocation46_spill] sm:$0xff] }
 0x3c9   : > { %5150 = vrot.lane.b32.xlu0 %v11876_v63, %s6262_s12 }
 0x3ca   : > { %4976 = vrot.lane.b32.xlu1 %v6040_v58, %s6243_s21  ;;  %v2897_v58 = vpack.i.b16 %v10153_v55, %v10175_v12  ;;  %v6035_v63 = vcombine.low %v683_v36, %v731_v48  ;;  %v5660_v55 = vsel %vm5646_vm11, %v5627_v47, %v5145_v52  ;;  %v11892_v48 = vld [vmem:[#allocation89_spill] sm:$0xff]  ;;  %v4836_v47 = vpack.i.b16 %v10314_v26, %v10332_v1 }
 0x3cb   : > { %v5479_v34 = vpop.permute.xlu0 %5478  ;;  %v5693_v53 = vsel %vm5679_vm12, %v5660_v55, %v5225_v14 }
 0x3cc   : > { %v5305_v42 = vpop.permute.xlu1 %5304  ;;  %v5606_v12 = vsel %vm5564_vm9, %v6035_v63, %v10254_v25  ;;  %v6088_v40 = vcombine.low %v2849_v51, %v2897_v58  ;;  %v11896_v58 = vld [vmem:[#allocation185_spill] sm:$0xff]  ;;  %v11899_v63 = vld [vmem:[#allocation40_spill] sm:$0xff] }
 0x3cd   : > { %5230 = vrot.lane.b32.xlu0 %v11882_v3, %s6263_s13  ;;  %v5641_v21 = vsel %vm5613_vm10, %v5606_v12, %v10303_v31  ;;  %v5726_v59 = vsel %vm5712_vm13, %v5693_v53, %v5305_v42  ;;  %v11898_v33 = vpack.i.b16 %v11896_v58, %v11897_v23  ;;  %v11902_v12 = vld [vmem:[#allocation12_spill] sm:$0xff] }
 0x3ce   : > { %5056 = vrot.lane.b32.xlu1 %v6056_v15, %s6261_s11  ;;  %v11889_v15 = vld [vmem:[#allocation65_spill] sm:$0xff]  ;;  %v5674_v8 = vsel %vm5646_vm11, %v5641_v21, %v10342_v62  ;;  %v11893_v62 = vld [vmem:[#allocation79_spill] sm:$0xff]  ;;  %v1152_v55 = vshrl.u32 %v11902_v12, 16 }
 0x3cf   : > { %v5559_v57 = vpop.permute.xlu0 %5558  ;;  %v11891_v37 = vcombine.low %v11889_v15, %v11890_v41  ;;  %v5707_v25 = vsel %vm5679_vm12, %v5674_v8, %v5239_v22  ;;  %v11894_v20 = vcombine.low %v11892_v48, %v11893_v62  ;;  %v11906_v41 = vld [vmem:[#allocation128_spill] sm:$0xff] }
 0x3d0   : > { %v5385_v38 = vpop.permute.xlu1 %5384  ;;  %v5740_v31 = vsel %vm5712_vm13, %v5707_v25, %v5319_v32  ;;  %v3860_v32 = vpack.i.b16 %v10209_v61, %v10198_v60  ;;  %v4324_v60 = vpack.i.b16 %v10268_v13, %v10298_v28  ;;  %v11905_v13 = vld [vmem:[#allocation85_spill] sm:$0xff]  ;;  %v1103_v26 = vshrl.u32 %v11906_v41, 16 }
 0x3d1   : > { %5310 = vrot.lane.b32.xlu0 %v11887_v5, %s6264_s14  ;;  %v5759_v52 = vsel %vm5745_vm14, %v5726_v59, %v5385_v38  ;;  %v5773_v0 = vsel %vm5745_vm14, %v5740_v31, %v5399_v56  ;;  %v4372_v5 = vpack.i.b16 %v10250_v10, %v10272_v44  ;;  %v11903_v10 = vld [vmem:[#allocation148_spill] sm:$0xff]  ;;  %v4788_v44 = vpack.i.b16 %v10328_v9, %v10347_v17  ;;  %v11908_v59 = vld [vmem:[#allocation25_spill] sm:$0xff]  ;;  %v11909_v9 = vld [vmem:[#allocation127_spill] sm:$0xff] }
 0x3d2   : > { %5136 = vrot.lane.b32.xlu1 %v11888_v4, %s6262_s12  ;;  %v5806_v22 = vsel %vm5778_vm15, %v5773_v0, %v5479_v34  ;;  %v6120_v34 = vcombine.low %v3860_v32, %v11898_v33  ;;  %v11901_v4 = vcombine.low %v11899_v63, %v11900_v45  ;;  %v1151_v28 = vshrl.u32 %v11905_v13, 16 }
 0x3d3   : > { %v10406_v43 = vpop.permute.xlu0 %4996  ;;  %v5839_v54 = vsel %vm5811_vm0, %v5806_v22, %v5559_v57  ;;  %v6136_v51 = vcombine.low %v4324_v60, %v4372_v5  ;;  %v6152_v15 = vcombine.low %v4788_v44, %v4836_v47  ;;  %v1562_v17 = vshrl.u32 %v11909_v9, 16  ;;  %v11917_v60 = vld [vmem:[#allocation94_spill] sm:$0xff] }
 0x3d4   : > { %v5465_v19 = vpop.permute.xlu1 %5464  ;;  %v1153_v1 = vpack.i.b16 %v1152_v55, %v1151_v28  ;;  %v11918_v47 = vld [vmem:[#allocation10_spill] sm:$0xff]  ;;  %v728_v55 = vpack.i.b16 %v9878_v29, %v11877_v16  ;;  %v11920_v28 = vld [vmem:[#allocation173_spill] sm:$0xff] }
 0x3d5   : > { %5390 = vrot.lane.b32.xlu0 %v11891_v37, %s6265_s17  ;;  %v5792_v14 = vsel %vm5778_vm15, %v5759_v52, %v5465_v19  ;;  %v11904_v19 = vld [vmem:[#allocation29_spill] sm:$0xff]  ;;  %v11907_v37 = vld [vmem:[#allocation108_spill] sm:$0xff]  ;;  %v11919_v44 = vld [vmem:[#allocation6_spill] sm:$0xff] }
 0x3d6   : > { %5216 = vrot.lane.b32.xlu1 %v6088_v40, %s6263_s13  ;;  %v1104_v40 = vshrl.u32 %v11904_v19, 16  ;;  %v1610_v8 = vshrl.u32 %v11907_v37, 16  ;;  %v11910_v52 = vld [vmem:[#allocation164_spill] sm:$0xff] }
 0x3d7   : > { %v10424_v39 = vpop.permute.xlu0 %5076  ;;  %v1609_v31 = vshrl.u32 %v11910_v52, 16 }
 0x3d8   : > { %v5545_v3 = vpop.permute.xlu1 %5544  ;;  %v1105_v25 = vpack.i.b16 %v1104_v40, %v1103_v26  ;;  %v2845_v40 = vshrl.u32 %v11919_v44, 16 }
 0x3d9   : > { %5470 = vrot.lane.b32.xlu0 %v11894_v20, %s6266_s18  ;;  %v5825_v42 = vsel %vm5811_vm0, %v5792_v14, %v5545_v3  ;;  %v11911_v3 = vld [vmem:[#allocation95_spill] sm:$0xff]  ;;  %v1611_v22 = vpack.i.b16 %v1610_v8, %v1609_v31 }
 0x3da   : > { %5296 = vrot.lane.b32.xlu1 %v11895_v7, %s6264_s14  ;;  %v5861_v36 = vsel %vm5845_vm3, %v5825_v42, 0  ;;  %v706_v0 = vshrl.u32 %v11911_v3, 16  ;;  %v6039_v62 = vcombine.low %v1105_v25, %v1153_v1  ;;  %v11912_v20 = vld [vmem:[#allocation107_spill] sm:$0xff]  ;;  %v680_v1 = vpack.i.b16 %v9881_v50, %v11883_v27  ;;  %v11921_v25 = vld [vmem:[#allocation81_spill] sm:$0xff] }
 0x3db   : > { %v10441_v56 = vpop.permute.xlu0 %5156  ;;  %6174 = vmatpush3.bf16.xpose.msra.mxu0 %v5861_v36  ;;  %v1561_v42 = vshrl.u32 %v11912_v20, 16  ;;  %v11913_v7 = vld [vmem:[#allocation59_spill] sm:$0xff] }
 0x3dc   : > { %6191 = vmatprep.subr.msk.bf16.mxu0 %vm5845_vm3, %v5839_v54  ;;  %v4983_v38 = vpop.permute.xlu1 %4982  ;;  %v11914_v36 = vld [vmem:[#allocation139_spill] sm:$0xff]  ;;  %v11915_v54 = vld [vmem:[#allocation37_spill] sm:$0xff]  ;;  %v6034_v29 = vcombine.low %v680_v1, %v728_v55 }
 0x3dd   : > { %5550 = vrot.lane.b32.xlu0 %v11901_v4, %s6267_s19  ;;  %v658_v32 = vshrl.u32 %v11914_v36, 16  ;;  %v705_v58 = vshrl.u32 %v11915_v54, 16  ;;  %v1563_v23 = vpack.i.b16 %v1562_v17, %v1561_v42  ;;  %v2844_v17 = vshrl.u32 %v11921_v25, 16  ;;  %v11924_v42 = vld [vmem:[#allocation147_spill] sm:$0xff] }
 0x3de   : > { %5376 = vrot.lane.b32.xlu1 %v6120_v34, %s6265_s17  ;;  %v11916_v34 = vld [vmem:[#allocation96_spill] sm:$0xff]  ;;  %v5603_v27 = vsel %vm5564_vm9, %v6034_v29, %v10406_v43 }
 0x3df   : > { %v10456_v61 = vpop.permute.xlu0 %5236  ;;  %v657_v5 = vshrl.u32 %v11916_v34, 16  ;;  %v707_v63 = vpack.i.b16 %v706_v0, %v705_v58  ;;  %v6055_v4 = vcombine.low %v1563_v23, %v1611_v22  ;;  %v11922_v0 = vld [vmem:[#allocation91_spill] sm:$0xff] }
 0x3e0   : > { %v5063_v57 = vpop.permute.xlu1 %5062 }
 0x3e1   : > { %4988 = vrot.lane.b32.xlu0 %v11903_v10, %s6243_s21  ;;  %v659_v10 = vpack.i.b16 %v658_v32, %v657_v5 }
 0x3e2   : > { %5456 = vrot.lane.b32.xlu1 %v6136_v51, %s6266_s18  ;;  %v2893_v51 = vshrl.u32 %v11917_v60, 16 }
 0x3e3   : > { %v10468_v21 = vpop.permute.xlu0 %5316  ;;  %v6027_v8 = vcombine.low %v659_v10, %v707_v63 }
 0x3e4   : > { %v5143_v53 = vpop.permute.xlu1 %5142 }
 0x3e5   : > { %5068 = vrot.lane.b32.xlu0 %v11908_v59, %s6261_s11  ;;  %v5582_v16 = vsel %vm5564_vm9, %v6027_v8, %v4983_v38  ;;  %v5639_v38 = vsel %vm5613_vm10, %v5603_v27, %v10424_v39  ;;  %v11929_v8 = vld [vmem:[#allocation62_spill] sm:$0xff] }
 0x3e6   : > { %5536 = vrot.lane.b32.xlu1 %v6152_v15, %s6267_s19  ;;  %v2892_v15 = vshrl.u32 %v11920_v28, 16  ;;  %v5625_v32 = vsel %vm5613_vm10, %v5582_v16, %v5063_v57  ;;  %v5672_v57 = vsel %vm5646_vm11, %v5639_v38, %v10441_v56  ;;  %v4368_v56 = vshrl.u32 %v10215_v18, 16 }
 0x3e7   : > { %v5397_v14 = vpop.permute.xlu0 %5396  ;;  %v5658_v58 = vsel %vm5646_vm11, %v5625_v32, %v5143_v53  ;;  %v5705_v43 = vsel %vm5679_vm12, %v5672_v57, %v10456_v61  ;;  %v4320_v16 = vshrl.u32 %v10225_v30, 16  ;;  %v4319_v32 = vshrl.u32 %v10246_v6, 16 }
 0x3e8   : > { %v5223_v48 = vpop.permute.xlu1 %5222  ;;  %v2894_v31 = vpack.i.b16 %v2893_v51, %v2892_v15  ;;  %v11927_v51 = vld [vmem:[#allocation43_spill] sm:$0xff]  ;;  %v4831_v38 = vshrl.u32 %v10290_v24, 16  ;;  %v4783_v57 = vshrl.u32 %v10310_v49, 16 }
 0x3e9   : > { %5148 = vrot.lane.b32.xlu0 %v11913_v7, %s6262_s12  ;;  %v2846_v7 = vpack.i.b16 %v2845_v40, %v2844_v17  ;;  %v5691_v63 = vsel %vm5679_vm12, %v5658_v58, %v5223_v48  ;;  %v11928_v48 = vld [vmem:[#allocation41_spill] sm:$0xff]  ;;  %v5738_v40 = vsel %vm5712_vm13, %v5705_v43, %v10468_v21  ;;  %v4832_v58 = vshrl.u32 %v10260_v35, 16 }
 0x3ea   : > { %4974 = vrot.lane.b32.xlu1 %v6039_v62, %s6243_s21  ;;  %v11923_v62 = vld [vmem:[#allocation146_spill] sm:$0xff]  ;;  %v3856_v10 = vshrl.u32 %v11928_v48, 16 }
 0x3eb   : > { %v5477_v33 = vpop.permute.xlu0 %5476  ;;  %v11925_v22 = vcombine.low %v11923_v62, %v11924_v42  ;;  %v6087_v5 = vcombine.low %v2846_v7, %v2894_v31  ;;  %v11930_v31 = vld [vmem:[#allocation42_spill] sm:$0xff]  ;;  %v4367_v62 = vshrl.u32 %v10231_v11, 16 }
 0x3ec   : > { %v5303_v45 = vpop.permute.xlu1 %5302 }
 0x3ed   : > { %5228 = vrot.lane.b32.xlu0 %v11918_v47, %s6263_s13  ;;  %v3855_v47 = vshrl.u32 %v11927_v51, 16  ;;  %v5724_v55 = vsel %vm5712_vm13, %v5691_v63, %v5303_v45  ;;  %v5771_v45 = vsel %vm5745_vm14, %v5738_v40, %v5397_v14  ;;  %v4369_v27 = vpack.i.b16 %v4368_v56, %v4367_v62 }
 0x3ee   : > { %5054 = vrot.lane.b32.xlu1 %v6055_v4, %s6261_s11  ;;  %v11926_v4 = vld [vmem:[#allocation149_spill] sm:$0xff]  ;;  %v5804_v17 = vsel %vm5778_vm15, %v5771_v45, %v5477_v33  ;;  %v11933_v33 = vld [vmem:[#allocation90_spill] sm:$0xff]  ;;  %v1102_v45 = vpack.i.b16 %v11904_v19, %v11906_v41  ;;  %v1560_v41 = vpack.i.b16 %v11909_v9, %v11912_v20 }
 0x3ef   : > { %v5557_v26 = vpop.permute.xlu0 %5556 }
 0x3f0   : > { %v5383_v59 = vpop.permute.xlu1 %5382  ;;  %v5837_v14 = vsel %vm5811_vm0, %v5804_v17, %v5557_v26  ;;  %v4784_v26 = vshrl.u32 %v10284_v2, 16  ;;  %v11937_v17 = vld [vmem:[#allocation168_spill] sm:$0xff] }
 0x3f1   : > { %5308 = vrot.lane.b32.xlu0 %v11922_v0, %s6264_s14  ;;  %v5757_v53 = vsel %vm5745_vm14, %v5724_v55, %v5383_v59  ;;  %v3857_v59 = vpack.i.b16 %v3856_v10, %v3855_v47  ;;  %v11931_v0 = vld [vmem:[#allocation30_spill] sm:$0xff]  ;;  %v4833_v55 = vpack.i.b16 %v4832_v58, %v4831_v38 }
 0x3f2   : > { %5134 = vrot.lane.b32.xlu1 %v11925_v22, %s6262_s12  ;;  %v11932_v29 = vcombine.low %v11930_v31, %v11931_v0  ;;  %v4785_v43 = vpack.i.b16 %v4784_v26, %v4783_v57  ;;  %v10570_v31 = vcombine.high %v11937_v17, %v11245_v46  ;;  %v2843_v26 = vpack.i.b16 %v11919_v44, %v11921_v25 }
 0x3f3   : > { %v10504_v50 = vpop.permute.xlu0 %4994  ;;  %v6119_v7 = vcombine.low %v3857_v59, %v11933_v33  ;;  %v704_v33 = vpack.i.b16 %v11911_v3, %v11915_v54  ;;  %v11939_v54 = vld [vmem:[#allocation154_spill] sm:$0xff] }
 0x3f4   : > { %v5463_v23 = vpop.permute.xlu1 %5462  ;;  %v6151_v40 = vcombine.low %v4785_v43, %v4833_v55 }
 0x3f5   : > { %5388 = vrot.lane.b32.xlu0 %v11926_v4, %s6265_s17  ;;  %v5790_v15 = vsel %vm5778_vm15, %v5757_v53, %v5463_v23  ;;  %v11934_v23 = vld [vmem:[#allocation39_spill] sm:$0xff] }
 0x3f6   : > { %5214 = vrot.lane.b32.xlu1 %v6087_v5, %s6263_s13  ;;  %v4321_v5 = vpack.i.b16 %v4320_v16, %v4319_v32  ;;  %v656_v32 = vpack.i.b16 %v11914_v36, %v11916_v34 }
 0x3f7   : > { %v10522_v39 = vpop.permute.xlu0 %5074 }
 0x3f8   : > { %v5543_v1 = vpop.permute.xlu1 %5542  ;;  %v6135_v47 = vcombine.low %v4321_v5, %v4369_v27  ;;  %v6026_v20 = vcombine.low %v656_v32, %v704_v33 }
 0x3f9   : > { %5468 = vrot.lane.b32.xlu0 %v11929_v8, %s6266_s18  ;;  %v5823_v61 = vsel %vm5811_vm0, %v5790_v15, %v5543_v1  ;;  %v1150_v15 = vpack.i.b16 %v11902_v12, %v11905_v13  ;;  %v11935_v1 = vld [vmem:[#allocation166_spill] sm:$0xff]  ;;  %v1608_v13 = vpack.i.b16 %v11907_v37, %v11910_v52 }
 0x3fa   : > { %5294 = vrot.lane.b32.xlu1 %v11932_v29, %s6264_s14  ;;  %v5859_v21 = vsel %vm5845_vm3, %v5823_v61, 0  ;;  %v10559_v56 = vcombine.high %v11935_v1, %v11245_v46  ;;  %v11936_v61 = vld [vmem:[#allocation152_spill] sm:$0xff]  ;;  %v11938_v29 = vld [vmem:[#allocation151_spill] sm:$0xff] }
 0x3fb   : > { %v10542_v42 = vpop.permute.xlu0 %5154  ;;  %6176 = vmatpush3.bf16.xpose.msra.mxu0 %v5859_v21  ;;  %v10566_v59 = vcombine.high %v11936_v61, %v11245_v46  ;;  %v6038_v12 = vcombine.low %v1102_v45, %v1150_v15  ;;  %v10576_v21 = vcombine.high %v11938_v29, %v11245_v46  ;;  %v6054_v52 = vcombine.low %v1560_v41, %v1608_v13  ;;  %v11940_v1 = vld [vmem:[#allocation47_spill] sm:$0xff] }
 0x3fc   : > { %6192 = vmatprep.subr.msk.bf16.mxu0 %vm5845_vm3, %v5837_v14  ;;  %v4981_v22 = vpop.permute.xlu1 %4980  ;;  %v724_v19 = vshrl.u32 %v10559_v56, 16  ;;  %v723_v14 = vshrl.u32 %v10570_v31, 16 }
 0x3fd   : > { %5548 = vrot.lane.b32.xlu0 %v11934_v23, %s6267_s19  ;;  %v676_v62 = vshrl.u32 %v10566_v59, 16  ;;  %v675_v46 = vshrl.u32 %v10576_v21, 16  ;;  %v2891_v23 = vpack.i.b16 %v11917_v60, %v11920_v28  ;;  %v5579_v3 = vsel %vm5564_vm9, %v6026_v20, %v4981_v22 }
 0x3fe   : > { %5374 = vrot.lane.b32.xlu1 %v6119_v7, %s6265_s17  ;;  %v725_v7 = vpack.i.b16 %v724_v19, %v723_v14  ;;  %v4366_v19 = vpack.i.b16 %v10215_v18, %v10231_v11  ;;  %v4782_v14 = vpack.i.b16 %v10284_v2, %v10310_v49  ;;  %v5930_v18 = vld [vmem:[%s10740_s3] sm:$0xff]  ;;  %v722_v2 = vpack.i.b16 %v10559_v56, %v10570_v31 }
 0x3ff   : > { %v5235_v63 = vpop.permute.xlu0 %5234  ;;  %v677_v9 = vpack.i.b16 %v676_v62, %v675_v46  ;;  %v6086_v55 = vcombine.low %v2843_v26, %v2891_v23  ;;  %v4830_v62 = vpack.i.b16 %v10260_v35, %v10290_v24  ;;  %v674_v46 = vpack.i.b16 %v10566_v59, %v10576_v21 }
 0x400   : > { %v5061_v4 = vpop.permute.xlu1 %5060 }
 0x401   : > { %v6033_v5 = vcombine.low %v677_v9, %v725_v7  ;;  %v5623_v36 = vsel %vm5613_vm10, %v5579_v3, %v5061_v4  ;;  %5933 = vperm.xlu0 %6232, %v5930_v18   ;;  %v6032_v32 = vcombine.low %v674_v46, %v722_v2  ;;  %v11945_v9 = vld [vmem:[#allocation162_spill] sm:$0xff] }
 0x402   : > { %5454 = vrot.lane.b32.xlu1 %v6135_v47, %s6266_s18 }
 0x403   : > { %v5315_v53 = vpop.permute.xlu0 %5314  ;;  %v5600_v38 = vsel %vm5564_vm9, %v6033_v5, %v10504_v50 }
 0x404   : > { %v5141_v10 = vpop.permute.xlu1 %5140  ;;  %v5637_v60 = vsel %vm5613_vm10, %v5600_v38, %v10522_v39 }
 0x405   : > { %v5656_v47 = vsel %vm5646_vm11, %v5623_v36, %v5141_v10  ;;  %v5670_v22 = vsel %vm5646_vm11, %v5637_v60, %v10542_v42 }
 0x406   : > { %5534 = vrot.lane.b32.xlu1 %v6151_v40, %s6267_s19  ;;  %v5703_v25 = vsel %vm5679_vm12, %v5670_v22, %v5235_v63  ;;  %v3854_v63 = vpack.i.b16 %v11928_v48, %v11927_v51  ;;  %v4318_v51 = vpack.i.b16 %v10225_v30, %v10246_v6  ;;  %v5922_v6 = vld [vmem:[%s10739_s2] sm:$0xff] }
 0x407   : > { %v5395_v8 = vpop.permute.xlu0 %5394  ;;  %v5736_v43 = vsel %vm5712_vm13, %v5703_v25, %v5315_v53 }
 0x408   : > { %v5221_v0 = vpop.permute.xlu1 %5220  ;;  %v5769_v39 = vsel %vm5745_vm14, %v5736_v43, %v5395_v8  ;;  %v10624_v8 = vld [vmem:[%s10738_s1] sm:$0xf] }
 0x409   : > { %v5689_v28 = vsel %vm5679_vm12, %v5656_v47, %v5221_v0  ;;  %v11941_v0 = vld [vmem:[#allocation24_spill] sm:$0xff]  ;;  %6187 = vmatprep.mubr.msk.bf16.mxu0 %vm5845_vm3, %v10624_v8 }
 0x40a   : > { %4972 = vrot.lane.b32.xlu1 %v6038_v12, %s6243_s21  ;;  %v11942_v12 = vld [vmem:[#allocation53_spill] sm:$0xff] }
 0x40b   : > { %v5475_v16 = vpop.permute.xlu0 %5474  ;;  %v11943_v13 = vpack.i.b16 %v11941_v0, %v11942_v12 }
 0x40c   : > { %v5301_v37 = vpop.permute.xlu1 %5300  ;;  %v5802_v42 = vsel %vm5778_vm15, %v5769_v39, %v5475_v16  ;;  %v6134_v16 = vcombine.low %v4318_v51, %v4366_v19 }
 0x40d   : > { %v5722_v44 = vsel %vm5712_vm13, %v5689_v28, %v5301_v37  ;;  %v6118_v29 = vcombine.low %v3854_v63, %v11943_v13  ;;  %v6150_v37 = vcombine.low %v4782_v14, %v4830_v62  ;;  %v11948_v13 = vld [vmem:[#allocation157_spill] sm:$0xff] }
 0x40e   : > { %5052 = vrot.lane.b32.xlu1 %v6054_v52, %s6261_s11 }
 0x40f   : > { %v5555_v27 = vpop.permute.xlu0 %5554 }
 0x410   : > { %v5381_v58 = vpop.permute.xlu1 %5380  ;;  %v5835_v61 = vsel %vm5811_vm0, %v5802_v42, %v5555_v27  ;;  %v11944_v27 = vld [vmem:[#allocation156_spill] sm:$0xff] }
 0x411   : > { %v5755_v50 = vsel %vm5745_vm14, %v5722_v44, %v5381_v58  ;;  %v11946_v20 = vcombine.low %v11944_v27, %v11945_v9 }
 0x412   : > { %5132 = vrot.lane.b32.xlu1 %v11939_v54, %s6262_s12 }
 0x413   : > { %v4993_v34 = vpop.permute.xlu0 %4992 }
 0x414   : > { %v5461_v57 = vpop.permute.xlu1 %5460  ;;  %v5597_v3 = vsel %vm5564_vm9, %v6032_v32, %v4993_v34 }
 0x415   : > { %v5788_v10 = vsel %vm5778_vm15, %v5755_v50, %v5461_v57 }
 0x416   : > { %5212 = vrot.lane.b32.xlu1 %v6086_v55, %s6263_s13 }
 0x417   : > { %v5073_v4 = vpop.permute.xlu0 %5072 }
 0x418   : > { %v5541_v40 = vpop.permute.xlu1 %5540  ;;  %v5635_v56 = vsel %vm5613_vm10, %v5597_v3, %v5073_v4 }
 0x419   : > { %v5821_v15 = vsel %vm5811_vm0, %v5788_v10, %v5541_v40 }
 0x41a   : > { %5292 = vrot.lane.b32.xlu1 %v11940_v1, %s6264_s14  ;;  %v5857_v45 = vsel %vm5845_vm3, %v5821_v15, 0 }
 0x41b   : > { %v5153_v53 = vpop.permute.xlu0 %5152  ;;  %6178 = vmatpush3.bf16.xpose.msra.mxu0 %v5857_v45 }
 0x41c   : > { %6193 = vmatprep.subr.msk.bf16.mxu0 %vm5845_vm3, %v5835_v61  ;;  %v4979_v17 = vpop.permute.xlu1 %4978  ;;  %v5668_v59 = vsel %vm5646_vm11, %v5635_v56, %v5153_v53  ;;  %v11947_v53 = vld [vmem:[#allocation73_spill] sm:$0xff]  ;;  %v11952_v56 = vld [vmem:[#allocation75_spill] sm:$0xff] }
 0x41d   : > { %v5576_v58 = vsel %vm5564_vm9, %v11946_v20, %v4979_v17 }
 0x41e   : > { %5372 = vrot.lane.b32.xlu1 %v6118_v29, %s6265_s17  ;;  %v11949_v29 = vld [vmem:[#allocation86_spill] sm:$0xff] }
 0x41f   : > { %v5233_v48 = vpop.permute.xlu0 %5232  ;;  %v11950_v19 = vcombine.low %v11948_v13, %v11949_v29 }
 0x420   : > { %v5059_v41 = vpop.permute.xlu1 %5058  ;;  %v5701_v36 = vsel %vm5679_vm12, %v5668_v59, %v5233_v48 }
 0x421   : > { %v5621_v23 = vsel %vm5613_vm10, %v5576_v58, %v5059_v41 }
 0x422   : > { %5452 = vrot.lane.b32.xlu1 %v6134_v16, %s6266_s18 }
 0x423   : > { %v5313_v11 = vpop.permute.xlu0 %5312 }
 0x424   : > { %v5139_v33 = vpop.permute.xlu1 %5138  ;;  %v5734_v57 = vsel %vm5712_vm13, %v5701_v36, %v5313_v11 }
 0x425   : > { %v5654_v54 = vsel %vm5646_vm11, %v5621_v23, %v5139_v33 }
 0x426   : > { %5532 = vrot.lane.b32.xlu1 %v6150_v37, %s6267_s19 }
 0x427   : > { %v5393_v30 = vpop.permute.xlu0 %5392 }
 0x428   : > { %v5219_v35 = vpop.permute.xlu1 %5218  ;;  %v5767_v60 = vsel %vm5745_vm14, %v5734_v57, %v5393_v30 }
 0x429   : > { %v5687_v31 = vsel %vm5679_vm12, %v5654_v54, %v5219_v35 }
 0x42a   : > { %5925 = vperm.xlu1 %6231, %v5922_v6  }
 0x42b   : > { %v5473_v24 = vpop.permute.xlu0 %5472 }
 0x42c   : > { %v5299_v52 = vpop.permute.xlu1 %5298  ;;  %v5800_v22 = vsel %vm5778_vm15, %v5767_v60, %v5473_v24 }
 0x42d   : > { %v5720_v21 = vsel %vm5712_vm13, %v5687_v31, %v5299_v52 }
 0x42f   : > { %v5553_v49 = vpop.permute.xlu0 %5552 }
 0x430   : > { %v5379_v7 = vpop.permute.xlu1 %5378  ;;  %v5833_v25 = vsel %vm5811_vm0, %v5800_v22, %v5553_v49 }
 0x431   : > { %v5753_v38 = vsel %vm5745_vm14, %v5720_v21, %v5379_v7 }
 0x433   : > { %v4991_v5 = vpop.permute.xlu0 %4990 }
 0x434   : > { %v5459_v26 = vpop.permute.xlu1 %5458  ;;  %v5594_v51 = vsel %vm5564_vm9, %v11950_v19, %v4991_v5 }
 0x435   : > { %v5786_v34 = vsel %vm5778_vm15, %v5753_v38, %v5459_v26  ;;  %v11951_v26 = vld [vmem:[#allocation11_spill] sm:$0xff]  ;;  %v11954_v38 = vld [vmem:[#allocation57_spill] sm:$0xff] }
 0x436   : > { %v11953_v31 = vcombine.low %v11951_v26, %v11952_v56 }
 0x437   : > { %v5071_v47 = vpop.permute.xlu0 %5070 }
 0x438   : > { %v5539_v55 = vpop.permute.xlu1 %5538  ;;  %v5633_v16 = vsel %vm5613_vm10, %v5594_v51, %v5071_v47 }
 0x439   : > { %v5819_v28 = vsel %vm5811_vm0, %v5786_v34, %v5539_v55 }
 0x43a   : > { %v5855_v44 = vsel %vm5845_vm3, %v5819_v28, 0 }
 0x43b   : > { %v5151_v50 = vpop.permute.xlu0 %5150  ;;  %6180 = vmatpush3.bf16.xpose.msra.mxu0 %v5855_v44 }
 0x43c   : > { %6194 = vmatprep.subr.msk.bf16.mxu0 %vm5845_vm3, %v5833_v25  ;;  %v4977_v4 = vpop.permute.xlu1 %4976  ;;  %v5666_v14 = vsel %vm5646_vm11, %v5633_v16, %v5151_v50 }
 0x43d   : > { %v5573_v17 = vsel %vm5564_vm9, %v11947_v53, %v4977_v4 }
 0x43f   : > { %v5231_v43 = vpop.permute.xlu0 %5230 }
 0x440   : > { %v5057_v10 = vpop.permute.xlu1 %5056  ;;  %v5699_v11 = vsel %vm5679_vm12, %v5666_v14, %v5231_v43 }
 0x441   : > { %v5619_v0 = vsel %vm5613_vm10, %v5573_v17, %v5057_v10 }
 0x443   : > { %v5311_v40 = vpop.permute.xlu0 %5310 }
 0x444   : > { %v5137_v39 = vpop.permute.xlu1 %5136  ;;  %v5732_v30 = vsel %vm5712_vm13, %v5699_v11, %v5311_v40 }
 0x445   : > { %v5652_v48 = vsel %vm5646_vm11, %v5619_v0, %v5137_v39 }
 0x447   : > { %v5391_v15 = vpop.permute.xlu0 %5390 }
 0x448   : > { %v5217_v42 = vpop.permute.xlu1 %5216  ;;  %v5765_v24 = vsel %vm5745_vm14, %v5732_v30, %v5391_v15 }
 0x449   : > { %v5685_v62 = vsel %vm5679_vm12, %v5652_v48, %v5217_v42 }
 0x44b   : > { %v5471_v1 = vpop.permute.xlu0 %5470 }
 0x44c   : > { %v5297_v45 = vpop.permute.xlu1 %5296  ;;  %v5798_v2 = vsel %vm5778_vm15, %v5765_v24, %v5471_v1 }
 0x44d   : > { %v5718_v18 = vsel %vm5712_vm13, %v5685_v62, %v5297_v45 }
 0x44f   : > { %v5551_v63 = vpop.permute.xlu0 %5550 }
 0x450   : > { %v5377_v61 = vpop.permute.xlu1 %5376  ;;  %v5831_v46 = vsel %vm5811_vm0, %v5798_v2, %v5551_v63 }
 0x451   : > { %v5751_v33 = vsel %vm5745_vm14, %v5718_v18, %v5377_v61 }
 0x453   : > { %v4989_v12 = vpop.permute.xlu0 %4988 }
 0x454   : > { %v5457_v41 = vpop.permute.xlu1 %5456  ;;  %v5591_v47 = vsel %vm5564_vm9, %v11954_v38, %v4989_v12  ;;  %v11955_v12 = vld [vmem:[#allocation58_spill] sm:$0xff] }
 0x455   : > { %v5784_v6 = vsel %vm5778_vm15, %v5751_v33, %v5457_v41 }
 0x457   : > { %v5069_v37 = vpop.permute.xlu0 %5068 }
 0x458   : > { %v5537_v35 = vpop.permute.xlu1 %5536  ;;  %v5631_v55 = vsel %vm5613_vm10, %v5591_v47, %v5069_v37 }
 0x459   : > { %v5817_v52 = vsel %vm5811_vm0, %v5784_v6, %v5537_v35 }
 0x45a   : > { %v5853_v49 = vsel %vm5845_vm3, %v5817_v52, 0 }
 0x45b   : > { %v5149_v7 = vpop.permute.xlu0 %5148  ;;  %6182 = vmatpush3.bf16.xpose.msra.mxu0 %v5853_v49 }
 0x45c   : > { %6195 = vmatprep.subr.msk.bf16.mxu0 %vm5845_vm3, %v5831_v46  ;;  %v4975_v32 = vpop.permute.xlu1 %4974  ;;  %v5664_v28 = vsel %vm5646_vm11, %v5631_v55, %v5149_v7 }
 0x45d   : > { %v5570_v59 = vsel %vm5564_vm9, %v11953_v31, %v4975_v32 }
 0x45f   : > { %v5229_v27 = vpop.permute.xlu0 %5228 }
 0x460   : > { %v5055_v9 = vpop.permute.xlu1 %5054  ;;  %v5697_v44 = vsel %vm5679_vm12, %v5664_v28, %v5229_v27 }
 0x461   : > { %v5617_v36 = vsel %vm5613_vm10, %v5570_v59, %v5055_v9 }
 0x463   : > { %v5309_v58 = vpop.permute.xlu0 %5308 }
 0x464   : > { %v5135_v20 = vpop.permute.xlu1 %5134  ;;  %v5730_v50 = vsel %vm5712_vm13, %v5697_v44, %v5309_v58 }
 0x465   : > { %v5650_v57 = vsel %vm5646_vm11, %v5617_v36, %v5135_v20 }
 0x467   : > { %v5389_v5 = vpop.permute.xlu0 %5388 }
 0x468   : > { %v5215_v23 = vpop.permute.xlu1 %5214  ;;  %v5763_v40 = vsel %vm5745_vm14, %v5730_v50, %v5389_v5 }
 0x469   : > { %v5683_v60 = vsel %vm5679_vm12, %v5650_v57, %v5215_v23 }
 0x46b   : > { %v5469_v21 = vpop.permute.xlu0 %5468 }
 0x46c   : > { %v5295_v3 = vpop.permute.xlu1 %5294  ;;  %v5796_v15 = vsel %vm5778_vm15, %v5763_v40, %v5469_v21 }
 0x46d   : > { %v5716_v22 = vsel %vm5712_vm13, %v5683_v60, %v5295_v3 }
 0x46f   : > { %v5549_v4 = vpop.permute.xlu0 %5548 }
 0x470   : > { %v5375_v54 = vpop.permute.xlu1 %5374  ;;  %v5829_v1 = vsel %vm5811_vm0, %v5796_v15, %v5549_v4 }
 0x471   : > { %v5749_v25 = vsel %vm5745_vm14, %v5716_v22, %v5375_v54 }
 0x474   : > { %v5455_v34 = vpop.permute.xlu1 %5454 }
 0x475   : > { %v5782_v43 = vsel %vm5778_vm15, %v5749_v25, %v5455_v34 }
 0x478   : > { %v5535_v10 = vpop.permute.xlu1 %5534 }
 0x479   : > { %v5815_v39 = vsel %vm5811_vm0, %v5782_v43, %v5535_v10 }
 0x47a   : > { %v5851_v42 = vsel %vm5845_vm3, %v5815_v39, 0 }
 0x47b   : > { %6184 = vmatpush3.bf16.xpose.msra.mxu0 %v5851_v42 }
 0x47c   : > { %6196 = vmatprep.subr.msk.bf16.mxu0 %vm5845_vm3, %v5829_v1  ;;  %v4973_v45 = vpop.permute.xlu1 %4972  ;;  %v5934_v30 = vpop.permute.xlu0 %5933 }
 0x47d   : > { %v5567_v13 = vsel %vm5564_vm9, %v11955_v12, %v4973_v45 }
 0x480   : > { %v5053_v63 = vpop.permute.xlu1 %5052 }
 0x481   : > { %v5615_v29 = vsel %vm5613_vm10, %v5567_v13, %v5053_v63 }
 0x484   : > { %v5133_v61 = vpop.permute.xlu1 %5132 }
 0x485   : > { %v5648_v19 = vsel %vm5646_vm11, %v5615_v29, %v5133_v61 }
 0x488   : > { %v5213_v53 = vpop.permute.xlu1 %5212 }
 0x489   : > { %v5681_v48 = vsel %vm5679_vm12, %v5648_v19, %v5213_v53 }
 0x48c   : > { %v5293_v17 = vpop.permute.xlu1 %5292 }
 0x48d   : > { %v5714_v41 = vsel %vm5712_vm13, %v5681_v48, %v5293_v17 }
 0x490   : > { %v5373_v0 = vpop.permute.xlu1 %5372 }
 0x491   : > { %v5747_v16 = vsel %vm5745_vm14, %v5714_v41, %v5373_v0 }
 0x494   : > { %v5453_v51 = vpop.permute.xlu1 %5452 }
 0x495   : > { %v5780_v62 = vsel %vm5778_vm15, %v5747_v16, %v5453_v51 }
 0x498   : > { %v5533_v14 = vpop.permute.xlu1 %5532 }
 0x499   : > { %v5813_v18 = vsel %vm5811_vm0, %v5780_v62, %v5533_v14 }
 0x49a   : > { %v5849_v11 = vsel %vm5845_vm3, %v5813_v18, 0 }
 0x49b   : > { %6186 = vmatpush3.bf16.xpose.msra.mxu0 %v5849_v11 }
 0x4a2   : > { %6188 = vmatmul.mubr.msk.bf16.vlgmr.msra.gmra.mxu0 %vm5845_vm3, %v10624_v8 }
 0x4a5   : > { %v5926_v33 = vpop.permute.xlu1 %5925 }
 0x562   : > { %v5915_v37 = vpop.f32.mrf.mxu0 }
 0x563   : > { %v5928_v6 = vmul.f32 %v5926_v33, %v5915_v37 }
 0x564   : > { %v5917_v35 = vpop.f32.mrf.mxu0 }
 0x565   : > { %v5936_v24 = vadd.f32 %v5934_v30, %v5928_v6  ;;  %v5929_v52 = vmul.f32 %v5926_v33, %v5917_v35 }
 0x566   : > { %v5919_v2 = vpop.f32.mrf.mxu0 }
 0x567   : > { %v5938_v49 = vmax.f32 %v5936_v24, 0.0  ;;  %v5937_v46 = vadd.f32 %v5934_v30, %v5929_v52 }
 0x568   : > { %v5920_v7 = vpop.f32.mrf.mxu0 }
 0x569   : > { %5940 = vst [vmem:[%s197_s29] sm:$0xff] %v5938_v49  ;;  %v5939_v32 = vmax.f32 %v5937_v46, 0.0 }
 0x56b   : > { %5941 = vst [vmem:[%s197_s29 + $0x8] sm:$0xff] %v5939_v32 }
 0x56c PF: > { %s14_s15 = sadd.s32 1, %s6240_s15  }
 0x56d   : > { %p11_p4 = scmp.ge.s32.totalorder %s14_s15, 4  }
 0x56f   :  { %13 = sbr.rel (!%p11_p4) target bundleno = 1 (0x1), region = 66 }

</bundles_post_ra>
